<compile_context>
chip_gen: v7x
topology: tpu7x:2x2x1
jax: 0.10.0
libtpu: 0.0.40
codegen_flags: <defaults>
</compile_context>

<pallas_src>
import functools

import jax
import jax.numpy as jnp
import numpy as np
from jax.experimental import pallas as pl
from jax.experimental.pallas import tpu as pltpu


def _round_up(x, m):
    return (x + m - 1) // m * m


def _pick_time_chunk(T, Bp, Hp, budget_bytes, cap=16):
    """Largest Tt <= cap whose VMEM working set fits the budget."""
    w_bytes = 2 * (Hp * 2 * Hp + Hp * Hp) * 4            # W_hh, both directions
    misc = 4 * 2 * Bp * Hp * 4                           # h0, hn, scratch + slack
    for tt in range(max(1, min(cap, T)), 0, -1):
        io = 2 * 2 * tt * Bp * (3 * Hp + Hp) * 4         # xg + out, both dirs, dbl-buffered
        if io + w_bytes + misc <= budget_bytes:
            return tt
    return 1


def _gru_step(xs, h, whh_zr, whh_n, hp, clip_value):
    """One ClippedGRUCell step. xs already contains x @ W_ih.T + b_ih + b_hh."""
    h_all = jnp.dot(h, whh_zr, preferred_element_type=jnp.float32)
    z = jax.nn.sigmoid(xs[:, :hp] + h_all[:, :hp])
    r = jax.nn.sigmoid(xs[:, hp:2 * hp] + h_all[:, hp:])
    # LFADS-style candidate: reset applied before the matmul, bias already in xs.
    n = jnp.tanh(xs[:, 2 * hp:] + jnp.dot(r * h, whh_n,
                                          preferred_element_type=jnp.float32))
    h_new = z * h + (1.0 - z) * n
    if clip_value != float("inf"):
        h_new = jnp.clip(h_new, -clip_value, clip_value)
    return h_new


def _bidir_gru_kernel(xg_f_ref, xg_b_ref, h0_ref, whh_zr_ref, whh_n_ref,
                      out_f_ref, out_b_ref, hn_ref, h_scr,
                      *, hp, tt, n_pad, clip_value):
    """One time chunk; forward & backward chains interleaved (latency hiding).

    Forward chain walks chunk `tc` rows 0..tt-1; backward chain walks chunk
    `Tc-1-tc` (via index_map) rows tt-1..0, i.e. original time Tp-1..0.
    The hidden states are carried across grid steps in VMEM scratch.
    """
    tc = pl.program_id(0)
    n_tc = pl.num_programs(0)

    @pl.when(tc == 0)
    def _():
        h_scr[...] = h0_ref[...]

    is_first = tc == 0
    is_last = tc == n_tc - 1

    h_f = h_scr[pl.ds(0, 1)][0]          # (Bp, Hp)
    h_b = h_scr[pl.ds(1, 1)][0]

    for s in range(tt):                  # static unroll (tt capped at 16)
        # ---------------- forward direction: time = tc*tt + s ----------------
        xs_f = xg_f_ref[pl.ds(s, 1)][0]                       # (Bp, 3Hp)
        hf_new = _gru_step(xs_f, h_f,
                           whh_zr_ref[pl.ds(0, 1)][0],        # indexed inside the dot
                           whh_n_ref[pl.ds(0, 1)][0],
                           hp, clip_value)
        if n_pad and s >= tt - n_pad:     # only the last chunk straddles T
            hf_new = jnp.where(is_last, h_f, hf_new)
        h_f = hf_new
        out_f_ref[pl.ds(s, 1)] = h_f[None]

        # ------------- backward direction: time = (Tc-1-tc)*tt + tt-1-s -------------
        sb = tt - 1 - s
        xs_b = xg_b_ref[pl.ds(sb, 1)][0]
        hb_new = _gru_step(xs_b, h_b,
                           whh_zr_ref[pl.ds(1, 1)][0],
                           whh_n_ref[pl.ds(1, 1)][0],
                           hp, clip_value)
        if n_pad and s < n_pad:           # only the first grid step hits padded times
            hb_new = jnp.where(is_first, h_b, hb_new)
        h_b = hb_new
        out_b_ref[pl.ds(sb, 1)] = h_b[None]

    h_scr[pl.ds(0, 1)] = h_f[None]
    h_scr[pl.ds(1, 1)] = h_b[None]

    @pl.when(tc == n_tc - 1)
    def _():
        hn_ref[pl.ds(0, 1)] = h_f[None]
        hn_ref[pl.ds(1, 1)] = h_b[None]


def _pack_direction(params, input_size, hidden_size, hp):
    """Pack one direction's PyTorch-layout params into padded, gate-aligned layout.

    Gate chunk order (z, r, n) follows ClippedGRUCell.forward.  Both biases are
    folded into an extra input row (ones-column trick) of the augmented W_ih.
    """
    weight_ih, bias_ih, weight_hh, bias_hh = [jnp.asarray(p, jnp.float32) for p in params]
    H, I = hidden_size, input_size
    wih_t = weight_ih.T                  # (I, 3H)
    whh_t = weight_hh.T                  # (H, 3H)
    b_all = bias_ih + bias_hh            # (3H,)

    wih_aug = jnp.zeros((I + 1, 3 * hp), jnp.float32)
    for g in range(3):                   # gate order: z, r, n
        wih_aug = wih_aug.at[:I, g * hp:g * hp + H].set(wih_t[:, g * H:(g + 1) * H])
        wih_aug = wih_aug.at[I, g * hp:g * hp + H].set(b_all[g * H:(g + 1) * H])

    whh_zr = jnp.zeros((hp, 2 * hp), jnp.float32)
    whh_zr = whh_zr.at[:H, :H].set(whh_t[:, :H])               # z gate
    whh_zr = whh_zr.at[:H, hp:hp + H].set(whh_t[:, H:2 * H])   # r gate
    whh_n = jnp.zeros((hp, hp), jnp.float32)
    whh_n = whh_n.at[:H, :H].set(whh_t[:, 2 * H:])             # n gate
    return wih_aug, whh_zr, whh_n


def bidirectional_clipped_gru(x_bti, h_0, params_fwd, params_bwd,
                              clip_value=float("inf"), time_chunk=None,
                              vmem_budget_bytes=12 * 1024 * 1024):
    """x_bti: (B, T, I); h_0: (2, B, H).  Returns (output (B, T, 2H), h_n (2, B, H))."""
    x = jnp.asarray(x_bti, jnp.float32)
    h_0 = jnp.asarray(h_0, jnp.float32)
    B, T, I = x.shape
    H = h_0.shape[-1]

    Bp = _round_up(B, 8)                 # sublane alignment (f32)
    Hp = _round_up(H, 128)               # lane alignment -> tile-aligned gate slices

    if time_chunk is None:
        Tt = _pick_time_chunk(T, Bp, Hp, vmem_budget_bytes)
    else:
        Tt = max(1, min(int(time_chunk), T))
    Tp = _round_up(T, Tt)
    Tc = Tp // Tt
    n_pad = Tp - T

    pf = _pack_direction(params_fwd, I, H, Hp)
    pb = _pack_direction(params_bwd, I, H, Hp)
    whh_zr = jnp.stack([pf[1], pb[1]])                  # (2, Hp, 2Hp)
    whh_n = jnp.stack([pf[2], pb[2]])                   # (2, Hp, Hp)

    # Hoisted input projection.  x is transposed/padded BEFORE the projection (cheap,
    # x-sized) and the bias is folded via a ones column, so the big (Tp,Bp,3Hp) gate
    # tensor is produced directly in the kernel's layout with no extra HBM passes.
    x_aug = jnp.zeros((Tp, Bp, I + 1), jnp.float32)
    x_aug = x_aug.at[:T, :B, :I].set(jnp.transpose(x, (1, 0, 2)))
    x_aug = x_aug.at[:, :, I].set(1.0)
    x2d = x_aug.reshape(Tp * Bp, I + 1)
    xg_f = jnp.dot(x2d, pf[0], preferred_element_type=jnp.float32).reshape(Tp, Bp, 3 * Hp)
    xg_b = jnp.dot(x2d, pb[0], preferred_element_type=jnp.float32).reshape(Tp, Bp, 3 * Hp)

    h0_p = jnp.zeros((2, Bp, Hp), jnp.float32).at[:, :B, :H].set(h_0)

    kernel = functools.partial(_bidir_gru_kernel, hp=Hp, tt=Tt, n_pad=n_pad,
                               clip_value=float(clip_value))

    out_f, out_b, hn = pl.pallas_call(
        kernel,
        out_shape=(jax.ShapeDtypeStruct((Tp, Bp, Hp), jnp.float32),
                   jax.ShapeDtypeStruct((Tp, Bp, Hp), jnp.float32),
                   jax.ShapeDtypeStruct((2, Bp, Hp), jnp.float32)),
        grid_spec=pltpu.PrefetchScalarGridSpec(
            num_scalar_prefetch=0,
            grid=(Tc,),
            in_specs=[
                pl.BlockSpec((Tt, Bp, 3 * Hp), lambda tc: (tc, 0, 0)),           # fwd gates
                pl.BlockSpec((Tt, Bp, 3 * Hp), lambda tc: (Tc - 1 - tc, 0, 0)),  # bwd gates
                pl.BlockSpec((2, Bp, Hp), lambda tc: (0, 0, 0)),                 # h0
                pl.BlockSpec((2, Hp, 2 * Hp), lambda tc: (0, 0, 0)),             # W_hh[z|r].T
                pl.BlockSpec((2, Hp, Hp), lambda tc: (0, 0, 0)),                 # W_hh[n].T
            ],
            out_specs=[
                pl.BlockSpec((Tt, Bp, Hp), lambda tc: (tc, 0, 0)),               # fwd hidden
                pl.BlockSpec((Tt, Bp, Hp), lambda tc: (Tc - 1 - tc, 0, 0)),      # bwd hidden
                pl.BlockSpec((2, Bp, Hp), lambda tc: (0, 0, 0)),                 # final hidden
            ],
            scratch_shapes=[pltpu.VMEM((2, Bp, Hp), jnp.float32)],
        ),
        compiler_params=pltpu.CompilerParams(
            dimension_semantics=("arbitrary",),
            vmem_limit_bytes=32 * 1024 * 1024),
    )(xg_f, xg_b, h0_p, whh_zr, whh_n)

    out_f = out_f[:T, :B, :H]                    # (T, B, H)
    out_b = out_b[:T, :B, :H]                    # already un-flipped
    output = jnp.transpose(jnp.concatenate([out_f, out_b], axis=-1), (1, 0, 2))
    h_n = hn[:, :B, :H]
    return output, h_n


# --------------------- pure-JAX reference (for validation) ---------------------
def _gru_cell_ref(x, h, wih, bih, whh, bhh, H, clip):
    x_all = x @ wih.T + bih
    x_z, x_r, x_n = jnp.split(x_all, 3, axis=1)
    whh_zr, whh_n = whh[:2 * H], whh[2 * H:]
    bhh_zr, bhh_n = bhh[:2 * H], bhh[2 * H:]
    h_all = h @ whh_zr.T + bhh_zr
    h_z, h_r = jnp.split(h_all, 2, axis=1)
    z = jax.nn.sigmoid(x_z + h_z)
    r = jax.nn.sigmoid(x_r + h_r)
    h_n = (r * h) @ whh_n.T + bhh_n
    n = jnp.tanh(x_n + h_n)
    return jnp.clip(z * h + (1.0 - z) * n, -clip, clip)


def _gru_ref(x_bti, h0, wih, bih, whh, bhh, H, clip):
    hidden = h0
    outs = []
    for t in range(x_bti.shape[1]):
        hidden = _gru_cell_ref(x_bti[:, t], hidden, wih, bih, whh, bhh, H, clip)
        outs.append(hidden)
    return jnp.stack(outs, axis=1), hidden


def _bidir_ref(x_bti, h_0, params_fwd, params_bwd, H, clip):
    of, hf = _gru_ref(x_bti, h_0[0], *params_fwd, H, clip)
    ob, hb = _gru_ref(jnp.flip(x_bti, axis=1), h_0[1], *params_bwd, H, clip)
    ob = jnp.flip(ob, axis=1)
    return jnp.concatenate([of, ob], axis=2), jnp.stack([hf, hb])


if __name__ == "__main__":
    B, T, I, H = 2, 8, 16, 32

    key = jax.random.PRNGKey(0)
    keys = jax.random.split(key, 10)

    # deterministic synthetic parameters (PyTorch shapes: W_ih (3H,I), W_hh (3H,H))
    def make_params(k0, k1, k2, k3):
        wih = 0.1 * jax.random.normal(k0, (3 * H, I), dtype=jnp.float32)
        whh = 0.1 * jax.random.normal(k1, (3 * H, H), dtype=jnp.float32)
        bih = 0.05 * jax.random.normal(k2, (3 * H,), dtype=jnp.float32)
        bhh = 0.05 * jax.random.normal(k3, (3 * H,), dtype=jnp.float32)
        return (wih, bih, whh, bhh)

    params_fwd = make_params(*keys[0:4])
    params_bwd = make_params(*keys[4:8])

    x = jax.random.normal(keys[8], (B, T, I), dtype=jnp.float32)
    # scale h_0 so the clip actually binds on the initial state too
    h_0 = 2.0 * jax.random.normal(keys[9], (2, B, H), dtype=jnp.float32)

    # (clip_value, time_chunk): single-chunk, multi-chunk with time padding, no clipping
    for clip, tchunk in [(0.5, None), (0.5, 3), (float("inf"), None)]:
        out_ref, hn_ref = _bidir_ref(x, h_0, params_fwd, params_bwd, H, clip)
        out, h_n = bidirectional_clipped_gru(x, h_0, params_fwd, params_bwd,
                                             clip_value=clip, time_chunk=tchunk)
        out = jax.block_until_ready(out)
        h_n = jax.block_until_ready(h_n)
        np.testing.assert_allclose(np.asarray(out), np.asarray(out_ref),
                                   rtol=1e-5, atol=1e-5)
        np.testing.assert_allclose(np.asarray(h_n), np.asarray(hn_ref),
                                   rtol=1e-5, atol=1e-5)
        assert out.shape == (B, T, 2 * H)
        assert h_n.shape == (2, B, H)

    print("KERNEL_OK")
</pallas_src>

<mosaic_0001>
module attributes {stable_mosaic.version = 11 : i64} {
  func.func @_bidir_gru_kernel(%arg0: i32, %arg1: memref<8x8x384xf32, #tpu.memory_space<vmem>>, %arg2: memref<8x8x384xf32, #tpu.memory_space<vmem>>, %arg3: memref<2x8x128xf32, #tpu.memory_space<vmem>>, %arg4: memref<2x128x256xf32, #tpu.memory_space<vmem>>, %arg5: memref<2x128x128xf32, #tpu.memory_space<vmem>>, %arg6: memref<8x8x128xf32, #tpu.memory_space<vmem>>, %arg7: memref<8x8x128xf32, #tpu.memory_space<vmem>>, %arg8: memref<2x8x128xf32, #tpu.memory_space<vmem>>, %arg9: memref<2x8x128xf32, #tpu.memory_space<vmem>>) attributes {dimension_semantics = [#tpu.dimension_semantics<arbitrary>], iteration_bounds = array<i64: 1>, scalar_prefetch = 0 : i64, scratch_operands = 1 : i64, tpu.core_type = #tpu.core_type<tc>, window_params = [{transform_indices = @transform_0, window_bounds = array<i64: 8, 8, 384>}, {transform_indices = @transform_1, window_bounds = array<i64: 8, 8, 384>}, {pipeline_mode = #tpu.pipeline_mode<synchronous>, transform_indices = @transform_2, window_bounds = array<i64: 2, 8, 128>}, {pipeline_mode = #tpu.pipeline_mode<synchronous>, transform_indices = @transform_3, window_bounds = array<i64: 2, 128, 256>}, {pipeline_mode = #tpu.pipeline_mode<synchronous>, transform_indices = @transform_4, window_bounds = array<i64: 2, 128, 128>}, {transform_indices = @transform_5, window_bounds = array<i64: 8, 8, 128>}, {transform_indices = @transform_6, window_bounds = array<i64: 8, 8, 128>}, {pipeline_mode = #tpu.pipeline_mode<synchronous>, transform_indices = @transform_7, window_bounds = array<i64: 2, 8, 128>}]} {
    %c0_i32 = arith.constant 0 : i32
    %0 = arith.cmpi eq, %arg0, %c0_i32 : i32
    %1 = arith.extui %0 : i1 to i32
    %c0_i32_0 = arith.constant 0 : i32
    %2 = arith.cmpi ne, %1, %c0_i32_0 : i32
    scf.if %2 {
      %c0_310 = arith.constant 0 : index
      %c0_311 = arith.constant 0 : index
      %c0_312 = arith.constant 0 : index
      %638 = vector.load %arg3[%c0_310, %c0_311, %c0_312] : memref<2x8x128xf32, #tpu.memory_space<vmem>>, vector<2x8x128xf32>
      %c0_313 = arith.constant 0 : index
      %c0_314 = arith.constant 0 : index
      %c0_315 = arith.constant 0 : index
      %639 = vector.load %arg9[%c0_313, %c0_314, %c0_315] : memref<2x8x128xf32, #tpu.memory_space<vmem>>, vector<2x8x128xf32>
      tpu.vector_store %arg9[%c0_313, %c0_314, %c0_315], %638 {strides = array<i32>} : memref<2x8x128xf32, #tpu.memory_space<vmem>>, vector<2x8x128xf32>,
    } else {
    }
    %c0 = arith.constant 0 : index
    %c0_1 = arith.constant 0 : index
    %c0_2 = arith.constant 0 : index
    %3 = vector.load %arg9[%c0, %c0_1, %c0_2] : memref<2x8x128xf32, #tpu.memory_space<vmem>>, vector<1x8x128xf32>
    %4 = vector.shape_cast %3 : vector<1x8x128xf32> to vector<8x128xf32>
    %c1 = arith.constant 1 : index
    %c0_3 = arith.constant 0 : index
    %c0_4 = arith.constant 0 : index
    %5 = vector.load %arg9[%c1, %c0_3, %c0_4] : memref<2x8x128xf32, #tpu.memory_space<vmem>>, vector<1x8x128xf32>
    %6 = vector.shape_cast %5 : vector<1x8x128xf32> to vector<8x128xf32>
    %c0_5 = arith.constant 0 : index
    %c0_6 = arith.constant 0 : index
    %c0_7 = arith.constant 0 : index
    %7 = vector.load %arg1[%c0_5, %c0_6, %c0_7] : memref<8x8x384xf32, #tpu.memory_space<vmem>>, vector<1x8x384xf32>
    %8 = vector.shape_cast %7 : vector<1x8x384xf32> to vector<8x384xf32>
    %c0_8 = arith.constant 0 : index
    %c0_9 = arith.constant 0 : index
    %c0_10 = arith.constant 0 : index
    %9 = vector.load %arg4[%c0_8, %c0_9, %c0_10] : memref<2x128x256xf32, #tpu.memory_space<vmem>>, vector<1x128x256xf32>
    %10 = vector.shape_cast %9 : vector<1x128x256xf32> to vector<128x256xf32>
    %c0_11 = arith.constant 0 : index
    %c0_12 = arith.constant 0 : index
    %c0_13 = arith.constant 0 : index
    %11 = vector.load %arg5[%c0_11, %c0_12, %c0_13] : memref<2x128x128xf32, #tpu.memory_space<vmem>>, vector<1x128x128xf32>
    %12 = vector.shape_cast %11 : vector<1x128x128xf32> to vector<128x128xf32>
    %cst = arith.constant dense<0.000000e+00> : vector<8x256xf32>
    %13 = tpu.matmul %4, %10, %cst {dimension_numbers = #tpu.dot_dimension_numbers<[1], [0], [0], [1], [0, 0, 1, 1], [], []>} : vector<8x128xf32>, vector<128x256xf32>, vector<8x256xf32> -> vector<8x256xf32>
    %14 = vector.extract_strided_slice %8 {offsets = [0, 0], sizes = [8, 128], strides = [1, 1]} : vector<8x384xf32> to vector<8x128xf32>
    %15 = vector.extract_strided_slice %13 {offsets = [0, 0], sizes = [8, 128], strides = [1, 1]} : vector<8x256xf32> to vector<8x128xf32>
    %16 = arith.addf %14, %15 : vector<8x128xf32>
    %17 = arith.negf %16 : vector<8x128xf32>
    %18 = math.exp %17 : vector<8x128xf32>
    %cst_14 = arith.constant 1.000000e+00 : f32
    %19 = vector.broadcast %cst_14 : f32 to vector<8x128xf32>
    %20 = arith.addf %19, %18 : vector<8x128xf32>
    %21 = arith.divf %19, %20 : vector<8x128xf32>
    %22 = vector.extract_strided_slice %8 {offsets = [0, 128], sizes = [8, 128], strides = [1, 1]} : vector<8x384xf32> to vector<8x128xf32>
    %23 = vector.extract_strided_slice %13 {offsets = [0, 128], sizes = [8, 128], strides = [1, 1]} : vector<8x256xf32> to vector<8x128xf32>
    %24 = arith.addf %22, %23 : vector<8x128xf32>
    %25 = arith.negf %24 : vector<8x128xf32>
    %26 = math.exp %25 : vector<8x128xf32>
    %cst_15 = arith.constant 1.000000e+00 : f32
    %27 = vector.broadcast %cst_15 : f32 to vector<8x128xf32>
    %28 = arith.addf %27, %26 : vector<8x128xf32>
    %29 = arith.divf %27, %28 : vector<8x128xf32>
    %30 = vector.extract_strided_slice %8 {offsets = [0, 256], sizes = [8, 128], strides = [1, 1]} : vector<8x384xf32> to vector<8x128xf32>
    %31 = arith.mulf %29, %4 : vector<8x128xf32>
    %cst_16 = arith.constant dense<0.000000e+00> : vector<8x128xf32>
    %32 = tpu.matmul %31, %12, %cst_16 {dimension_numbers = #tpu.dot_dimension_numbers<[1], [0], [0], [1], [0, 0, 1, 1], [], []>} : vector<8x128xf32>, vector<128x128xf32>, vector<8x128xf32> -> vector<8x128xf32>
    %33 = arith.addf %30, %32 : vector<8x128xf32>
    %34 = math.tanh %33 : vector<8x128xf32>
    %35 = arith.mulf %21, %4 : vector<8x128xf32>
    %cst_17 = arith.constant 1.000000e+00 : f32
    %36 = vector.broadcast %cst_17 : f32 to vector<8x128xf32>
    %37 = arith.subf %36, %21 : vector<8x128xf32>
    %38 = arith.mulf %37, %34 : vector<8x128xf32>
    %39 = arith.addf %35, %38 : vector<8x128xf32>
    %cst_18 = arith.constant -5.000000e-01 : f32
    %cst_19 = arith.constant 5.000000e-01 : f32
    %40 = vector.broadcast %cst_18 : f32 to vector<8x128xf32>
    %41 = arith.maximumf %40, %39 : vector<8x128xf32>
    %42 = vector.broadcast %cst_19 : f32 to vector<8x128xf32>
    %43 = arith.minimumf %42, %41 : vector<8x128xf32>
    %44 = vector.shape_cast %43 : vector<8x128xf32> to vector<1x8x128xf32>
    %c0_20 = arith.constant 0 : index
    %c0_21 = arith.constant 0 : index
    %c0_22 = arith.constant 0 : index
    %45 = vector.load %arg6[%c0_20, %c0_21, %c0_22] : memref<8x8x128xf32, #tpu.memory_space<vmem>>, vector<1x8x128xf32>
    tpu.vector_store %arg6[%c0_20, %c0_21, %c0_22], %44 {strides = array<i32>} : memref<8x8x128xf32, #tpu.memory_space<vmem>>, vector<1x8x128xf32>,
    %c7 = arith.constant 7 : index
    %c0_23 = arith.constant 0 : index
    %c0_24 = arith.constant 0 : index
    %46 = vector.load %arg2[%c7, %c0_23, %c0_24] : memref<8x8x384xf32, #tpu.memory_space<vmem>>, vector<1x8x384xf32>
    %47 = vector.shape_cast %46 : vector<1x8x384xf32> to vector<8x384xf32>
    %c1_25 = arith.constant 1 : index
    %c0_26 = arith.constant 0 : index
    %c0_27 = arith.constant 0 : index
    %48 = vector.load %arg4[%c1_25, %c0_26, %c0_27] : memref<2x128x256xf32, #tpu.memory_space<vmem>>, vector<1x128x256xf32>
    %49 = vector.shape_cast %48 : vector<1x128x256xf32> to vector<128x256xf32>
    %c1_28 = arith.constant 1 : index
    %c0_29 = arith.constant 0 : index
    %c0_30 = arith.constant 0 : index
    %50 = vector.load %arg5[%c1_28, %c0_29, %c0_30] : memref<2x128x128xf32, #tpu.memory_space<vmem>>, vector<1x128x128xf32>
    %51 = vector.shape_cast %50 : vector<1x128x128xf32> to vector<128x128xf32>
    %cst_31 = arith.constant dense<0.000000e+00> : vector<8x256xf32>
    %52 = tpu.matmul %6, %49, %cst_31 {dimension_numbers = #tpu.dot_dimension_numbers<[1], [0], [0], [1], [0, 0, 1, 1], [], []>} : vector<8x128xf32>, vector<128x256xf32>, vector<8x256xf32> -> vector<8x256xf32>
    %53 = vector.extract_strided_slice %47 {offsets = [0, 0], sizes = [8, 128], strides = [1, 1]} : vector<8x384xf32> to vector<8x128xf32>
    %54 = vector.extract_strided_slice %52 {offsets = [0, 0], sizes = [8, 128], strides = [1, 1]} : vector<8x256xf32> to vector<8x128xf32>
    %55 = arith.addf %53, %54 : vector<8x128xf32>
    %56 = arith.negf %55 : vector<8x128xf32>
    %57 = math.exp %56 : vector<8x128xf32>
    %cst_32 = arith.constant 1.000000e+00 : f32
    %58 = vector.broadcast %cst_32 : f32 to vector<8x128xf32>
    %59 = arith.addf %58, %57 : vector<8x128xf32>
    %60 = arith.divf %58, %59 : vector<8x128xf32>
    %61 = vector.extract_strided_slice %47 {offsets = [0, 128], sizes = [8, 128], strides = [1, 1]} : vector<8x384xf32> to vector<8x128xf32>
    %62 = vector.extract_strided_slice %52 {offsets = [0, 128], sizes = [8, 128], strides = [1, 1]} : vector<8x256xf32> to vector<8x128xf32>
    %63 = arith.addf %61, %62 : vector<8x128xf32>
    %64 = arith.negf %63 : vector<8x128xf32>
    %65 = math.exp %64 : vector<8x128xf32>
    %cst_33 = arith.constant 1.000000e+00 : f32
    %66 = vector.broadcast %cst_33 : f32 to vector<8x128xf32>
    %67 = arith.addf %66, %65 : vector<8x128xf32>
    %68 = arith.divf %66, %67 : vector<8x128xf32>
    %69 = vector.extract_strided_slice %47 {offsets = [0, 256], sizes = [8, 128], strides = [1, 1]} : vector<8x384xf32> to vector<8x128xf32>
    %70 = arith.mulf %68, %6 : vector<8x128xf32>
    %cst_34 = arith.constant dense<0.000000e+00> : vector<8x128xf32>
    %71 = tpu.matmul %70, %51, %cst_34 {dimension_numbers = #tpu.dot_dimension_numbers<[1], [0], [0], [1], [0, 0, 1, 1], [], []>} : vector<8x128xf32>, vector<128x128xf32>, vector<8x128xf32> -> vector<8x128xf32>
    %72 = arith.addf %69, %71 : vector<8x128xf32>
    %73 = math.tanh %72 : vector<8x128xf32>
    %74 = arith.mulf %60, %6 : vector<8x128xf32>
    %cst_35 = arith.constant 1.000000e+00 : f32
    %75 = vector.broadcast %cst_35 : f32 to vector<8x128xf32>
    %76 = arith.subf %75, %60 : vector<8x128xf32>
    %77 = arith.mulf %76, %73 : vector<8x128xf32>
    %78 = arith.addf %74, %77 : vector<8x128xf32>
    %cst_36 = arith.constant -5.000000e-01 : f32
    %cst_37 = arith.constant 5.000000e-01 : f32
    %79 = vector.broadcast %cst_36 : f32 to vector<8x128xf32>
    %80 = arith.maximumf %79, %78 : vector<8x128xf32>
    %81 = vector.broadcast %cst_37 : f32 to vector<8x128xf32>
    %82 = arith.minimumf %81, %80 : vector<8x128xf32>
    %83 = vector.shape_cast %82 : vector<8x128xf32> to vector<1x8x128xf32>
    %c7_38 = arith.constant 7 : index
    %c0_39 = arith.constant 0 : index
    %c0_40 = arith.constant 0 : index
    %84 = vector.load %arg7[%c7_38, %c0_39, %c0_40] : memref<8x8x128xf32, #tpu.memory_space<vmem>>, vector<1x8x128xf32>
    tpu.vector_store %arg7[%c7_38, %c0_39, %c0_40], %83 {strides = array<i32>} : memref<8x8x128xf32, #tpu.memory_space<vmem>>, vector<1x8x128xf32>,
    %c1_41 = arith.constant 1 : index
    %c0_42 = arith.constant 0 : index
    %c0_43 = arith.constant 0 : index
    %85 = vector.load %arg1[%c1_41, %c0_42, %c0_43] : memref<8x8x384xf32, #tpu.memory_space<vmem>>, vector<1x8x384xf32>
    %86 = vector.shape_cast %85 : vector<1x8x384xf32> to vector<8x384xf32>
    %c0_44 = arith.constant 0 : index
    %c0_45 = arith.constant 0 : index
    %c0_46 = arith.constant 0 : index
    %87 = vector.load %arg4[%c0_44, %c0_45, %c0_46] : memref<2x128x256xf32, #tpu.memory_space<vmem>>, vector<1x128x256xf32>
    %88 = vector.shape_cast %87 : vector<1x128x256xf32> to vector<128x256xf32>
    %c0_47 = arith.constant 0 : index
    %c0_48 = arith.constant 0 : index
    %c0_49 = arith.constant 0 : index
    %89 = vector.load %arg5[%c0_47, %c0_48, %c0_49] : memref<2x128x128xf32, #tpu.memory_space<vmem>>, vector<1x128x128xf32>
    %90 = vector.shape_cast %89 : vector<1x128x128xf32> to vector<128x128xf32>
    %cst_50 = arith.constant dense<0.000000e+00> : vector<8x256xf32>
    %91 = tpu.matmul %43, %88, %cst_50 {dimension_numbers = #tpu.dot_dimension_numbers<[1], [0], [0], [1], [0, 0, 1, 1], [], []>} : vector<8x128xf32>, vector<128x256xf32>, vector<8x256xf32> -> vector<8x256xf32>
    %92 = vector.extract_strided_slice %86 {offsets = [0, 0], sizes = [8, 128], strides = [1, 1]} : vector<8x384xf32> to vector<8x128xf32>
    %93 = vector.extract_strided_slice %91 {offsets = [0, 0], sizes = [8, 128], strides = [1, 1]} : vector<8x256xf32> to vector<8x128xf32>
    %94 = arith.addf %92, %93 : vector<8x128xf32>
    %95 = arith.negf %94 : vector<8x128xf32>
    %96 = math.exp %95 : vector<8x128xf32>
    %cst_51 = arith.constant 1.000000e+00 : f32
    %97 = vector.broadcast %cst_51 : f32 to vector<8x128xf32>
    %98 = arith.addf %97, %96 : vector<8x128xf32>
    %99 = arith.divf %97, %98 : vector<8x128xf32>
    %100 = vector.extract_strided_slice %86 {offsets = [0, 128], sizes = [8, 128], strides = [1, 1]} : vector<8x384xf32> to vector<8x128xf32>
    %101 = vector.extract_strided_slice %91 {offsets = [0, 128], sizes = [8, 128], strides = [1, 1]} : vector<8x256xf32> to vector<8x128xf32>
    %102 = arith.addf %100, %101 : vector<8x128xf32>
    %103 = arith.negf %102 : vector<8x128xf32>
    %104 = math.exp %103 : vector<8x128xf32>
    %cst_52 = arith.constant 1.000000e+00 : f32
    %105 = vector.broadcast %cst_52 : f32 to vector<8x128xf32>
    %106 = arith.addf %105, %104 : vector<8x128xf32>
    %107 = arith.divf %105, %106 : vector<8x128xf32>
    %108 = vector.extract_strided_slice %86 {offsets = [0, 256], sizes = [8, 128], strides = [1, 1]} : vector<8x384xf32> to vector<8x128xf32>
    %109 = arith.mulf %107, %43 : vector<8x128xf32>
    %cst_53 = arith.constant dense<0.000000e+00> : vector<8x128xf32>
    %110 = tpu.matmul %109, %90, %cst_53 {dimension_numbers = #tpu.dot_dimension_numbers<[1], [0], [0], [1], [0, 0, 1, 1], [], []>} : vector<8x128xf32>, vector<128x128xf32>, vector<8x128xf32> -> vector<8x128xf32>
    %111 = arith.addf %108, %110 : vector<8x128xf32>
    %112 = math.tanh %111 : vector<8x128xf32>
    %113 = arith.mulf %99, %43 : vector<8x128xf32>
    %cst_54 = arith.constant 1.000000e+00 : f32
    %114 = vector.broadcast %cst_54 : f32 to vector<8x128xf32>
    %115 = arith.subf %114, %99 : vector<8x128xf32>
    %116 = arith.mulf %115, %112 : vector<8x128xf32>
    %117 = arith.addf %113, %116 : vector<8x128xf32>
    %cst_55 = arith.constant -5.000000e-01 : f32
    %cst_56 = arith.constant 5.000000e-01 : f32
    %118 = vector.broadcast %cst_55 : f32 to vector<8x128xf32>
    %119 = arith.maximumf %118, %117 : vector<8x128xf32>
    %120 = vector.broadcast %cst_56 : f32 to vector<8x128xf32>
    %121 = arith.minimumf %120, %119 : vector<8x128xf32>
    %122 = vector.shape_cast %121 : vector<8x128xf32> to vector<1x8x128xf32>
    %c1_57 = arith.constant 1 : index
    %c0_58 = arith.constant 0 : index
    %c0_59 = arith.constant 0 : index
    %123 = vector.load %arg6[%c1_57, %c0_58, %c0_59] : memref<8x8x128xf32, #tpu.memory_space<vmem>>, vector<1x8x128xf32>
    tpu.vector_store %arg6[%c1_57, %c0_58, %c0_59], %122 {strides = array<i32>} : memref<8x8x128xf32, #tpu.memory_space<vmem>>, vector<1x8x128xf32>,
    %c6 = arith.constant 6 : index
    %c0_60 = arith.constant 0 : index
    %c0_61 = arith.constant 0 : index
    %124 = vector.load %arg2[%c6, %c0_60, %c0_61] : memref<8x8x384xf32, #tpu.memory_space<vmem>>, vector<1x8x384xf32>
    %125 = vector.shape_cast %124 : vector<1x8x384xf32> to vector<8x384xf32>
    %c1_62 = arith.constant 1 : index
    %c0_63 = arith.constant 0 : index
    %c0_64 = arith.constant 0 : index
    %126 = vector.load %arg4[%c1_62, %c0_63, %c0_64] : memref<2x128x256xf32, #tpu.memory_space<vmem>>, vector<1x128x256xf32>
    %127 = vector.shape_cast %126 : vector<1x128x256xf32> to vector<128x256xf32>
    %c1_65 = arith.constant 1 : index
    %c0_66 = arith.constant 0 : index
    %c0_67 = arith.constant 0 : index
    %128 = vector.load %arg5[%c1_65, %c0_66, %c0_67] : memref<2x128x128xf32, #tpu.memory_space<vmem>>, vector<1x128x128xf32>
    %129 = vector.shape_cast %128 : vector<1x128x128xf32> to vector<128x128xf32>
    %cst_68 = arith.constant dense<0.000000e+00> : vector<8x256xf32>
    %130 = tpu.matmul %82, %127, %cst_68 {dimension_numbers = #tpu.dot_dimension_numbers<[1], [0], [0], [1], [0, 0, 1, 1], [], []>} : vector<8x128xf32>, vector<128x256xf32>, vector<8x256xf32> -> vector<8x256xf32>
    %131 = vector.extract_strided_slice %125 {offsets = [0, 0], sizes = [8, 128], strides = [1, 1]} : vector<8x384xf32> to vector<8x128xf32>
    %132 = vector.extract_strided_slice %130 {offsets = [0, 0], sizes = [8, 128], strides = [1, 1]} : vector<8x256xf32> to vector<8x128xf32>
    %133 = arith.addf %131, %132 : vector<8x128xf32>
    %134 = arith.negf %133 : vector<8x128xf32>
    %135 = math.exp %134 : vector<8x128xf32>
    %cst_69 = arith.constant 1.000000e+00 : f32
    %136 = vector.broadcast %cst_69 : f32 to vector<8x128xf32>
    %137 = arith.addf %136, %135 : vector<8x128xf32>
    %138 = arith.divf %136, %137 : vector<8x128xf32>
    %139 = vector.extract_strided_slice %125 {offsets = [0, 128], sizes = [8, 128], strides = [1, 1]} : vector<8x384xf32> to vector<8x128xf32>
    %140 = vector.extract_strided_slice %130 {offsets = [0, 128], sizes = [8, 128], strides = [1, 1]} : vector<8x256xf32> to vector<8x128xf32>
    %141 = arith.addf %139, %140 : vector<8x128xf32>
    %142 = arith.negf %141 : vector<8x128xf32>
    %143 = math.exp %142 : vector<8x128xf32>
    %cst_70 = arith.constant 1.000000e+00 : f32
    %144 = vector.broadcast %cst_70 : f32 to vector<8x128xf32>
    %145 = arith.addf %144, %143 : vector<8x128xf32>
    %146 = arith.divf %144, %145 : vector<8x128xf32>
    %147 = vector.extract_strided_slice %125 {offsets = [0, 256], sizes = [8, 128], strides = [1, 1]} : vector<8x384xf32> to vector<8x128xf32>
    %148 = arith.mulf %146, %82 : vector<8x128xf32>
    %cst_71 = arith.constant dense<0.000000e+00> : vector<8x128xf32>
    %149 = tpu.matmul %148, %129, %cst_71 {dimension_numbers = #tpu.dot_dimension_numbers<[1], [0], [0], [1], [0, 0, 1, 1], [], []>} : vector<8x128xf32>, vector<128x128xf32>, vector<8x128xf32> -> vector<8x128xf32>
    %150 = arith.addf %147, %149 : vector<8x128xf32>
    %151 = math.tanh %150 : vector<8x128xf32>
    %152 = arith.mulf %138, %82 : vector<8x128xf32>
    %cst_72 = arith.constant 1.000000e+00 : f32
    %153 = vector.broadcast %cst_72 : f32 to vector<8x128xf32>
    %154 = arith.subf %153, %138 : vector<8x128xf32>
    %155 = arith.mulf %154, %151 : vector<8x128xf32>
    %156 = arith.addf %152, %155 : vector<8x128xf32>
    %cst_73 = arith.constant -5.000000e-01 : f32
    %cst_74 = arith.constant 5.000000e-01 : f32
    %157 = vector.broadcast %cst_73 : f32 to vector<8x128xf32>
    %158 = arith.maximumf %157, %156 : vector<8x128xf32>
    %159 = vector.broadcast %cst_74 : f32 to vector<8x128xf32>
    %160 = arith.minimumf %159, %158 : vector<8x128xf32>
    %161 = vector.shape_cast %160 : vector<8x128xf32> to vector<1x8x128xf32>
    %c6_75 = arith.constant 6 : index
    %c0_76 = arith.constant 0 : index
    %c0_77 = arith.constant 0 : index
    %162 = vector.load %arg7[%c6_75, %c0_76, %c0_77] : memref<8x8x128xf32, #tpu.memory_space<vmem>>, vector<1x8x128xf32>
    tpu.vector_store %arg7[%c6_75, %c0_76, %c0_77], %161 {strides = array<i32>} : memref<8x8x128xf32, #tpu.memory_space<vmem>>, vector<1x8x128xf32>,
    %c2 = arith.constant 2 : index
    %c0_78 = arith.constant 0 : index
    %c0_79 = arith.constant 0 : index
    %163 = vector.load %arg1[%c2, %c0_78, %c0_79] : memref<8x8x384xf32, #tpu.memory_space<vmem>>, vector<1x8x384xf32>
    %164 = vector.shape_cast %163 : vector<1x8x384xf32> to vector<8x384xf32>
    %c0_80 = arith.constant 0 : index
    %c0_81 = arith.constant 0 : index
    %c0_82 = arith.constant 0 : index
    %165 = vector.load %arg4[%c0_80, %c0_81, %c0_82] : memref<2x128x256xf32, #tpu.memory_space<vmem>>, vector<1x128x256xf32>
    %166 = vector.shape_cast %165 : vector<1x128x256xf32> to vector<128x256xf32>
    %c0_83 = arith.constant 0 : index
    %c0_84 = arith.constant 0 : index
    %c0_85 = arith.constant 0 : index
    %167 = vector.load %arg5[%c0_83, %c0_84, %c0_85] : memref<2x128x128xf32, #tpu.memory_space<vmem>>, vector<1x128x128xf32>
    %168 = vector.shape_cast %167 : vector<1x128x128xf32> to vector<128x128xf32>
    %cst_86 = arith.constant dense<0.000000e+00> : vector<8x256xf32>
    %169 = tpu.matmul %121, %166, %cst_86 {dimension_numbers = #tpu.dot_dimension_numbers<[1], [0], [0], [1], [0, 0, 1, 1], [], []>} : vector<8x128xf32>, vector<128x256xf32>, vector<8x256xf32> -> vector<8x256xf32>
    %170 = vector.extract_strided_slice %164 {offsets = [0, 0], sizes = [8, 128], strides = [1, 1]} : vector<8x384xf32> to vector<8x128xf32>
    %171 = vector.extract_strided_slice %169 {offsets = [0, 0], sizes = [8, 128], strides = [1, 1]} : vector<8x256xf32> to vector<8x128xf32>
    %172 = arith.addf %170, %171 : vector<8x128xf32>
    %173 = arith.negf %172 : vector<8x128xf32>
    %174 = math.exp %173 : vector<8x128xf32>
    %cst_87 = arith.constant 1.000000e+00 : f32
    %175 = vector.broadcast %cst_87 : f32 to vector<8x128xf32>
    %176 = arith.addf %175, %174 : vector<8x128xf32>
    %177 = arith.divf %175, %176 : vector<8x128xf32>
    %178 = vector.extract_strided_slice %164 {offsets = [0, 128], sizes = [8, 128], strides = [1, 1]} : vector<8x384xf32> to vector<8x128xf32>
    %179 = vector.extract_strided_slice %169 {offsets = [0, 128], sizes = [8, 128], strides = [1, 1]} : vector<8x256xf32> to vector<8x128xf32>
    %180 = arith.addf %178, %179 : vector<8x128xf32>
    %181 = arith.negf %180 : vector<8x128xf32>
    %182 = math.exp %181 : vector<8x128xf32>
    %cst_88 = arith.constant 1.000000e+00 : f32
    %183 = vector.broadcast %cst_88 : f32 to vector<8x128xf32>
    %184 = arith.addf %183, %182 : vector<8x128xf32>
    %185 = arith.divf %183, %184 : vector<8x128xf32>
    %186 = vector.extract_strided_slice %164 {offsets = [0, 256], sizes = [8, 128], strides = [1, 1]} : vector<8x384xf32> to vector<8x128xf32>
    %187 = arith.mulf %185, %121 : vector<8x128xf32>
    %cst_89 = arith.constant dense<0.000000e+00> : vector<8x128xf32>
    %188 = tpu.matmul %187, %168, %cst_89 {dimension_numbers = #tpu.dot_dimension_numbers<[1], [0], [0], [1], [0, 0, 1, 1], [], []>} : vector<8x128xf32>, vector<128x128xf32>, vector<8x128xf32> -> vector<8x128xf32>
    %189 = arith.addf %186, %188 : vector<8x128xf32>
    %190 = math.tanh %189 : vector<8x128xf32>
    %191 = arith.mulf %177, %121 : vector<8x128xf32>
    %cst_90 = arith.constant 1.000000e+00 : f32
    %192 = vector.broadcast %cst_90 : f32 to vector<8x128xf32>
    %193 = arith.subf %192, %177 : vector<8x128xf32>
    %194 = arith.mulf %193, %190 : vector<8x128xf32>
    %195 = arith.addf %191, %194 : vector<8x128xf32>
    %cst_91 = arith.constant -5.000000e-01 : f32
    %cst_92 = arith.constant 5.000000e-01 : f32
    %196 = vector.broadcast %cst_91 : f32 to vector<8x128xf32>
    %197 = arith.maximumf %196, %195 : vector<8x128xf32>
    %198 = vector.broadcast %cst_92 : f32 to vector<8x128xf32>
    %199 = arith.minimumf %198, %197 : vector<8x128xf32>
    %200 = vector.shape_cast %199 : vector<8x128xf32> to vector<1x8x128xf32>
    %c2_93 = arith.constant 2 : index
    %c0_94 = arith.constant 0 : index
    %c0_95 = arith.constant 0 : index
    %201 = vector.load %arg6[%c2_93, %c0_94, %c0_95] : memref<8x8x128xf32, #tpu.memory_space<vmem>>, vector<1x8x128xf32>
    tpu.vector_store %arg6[%c2_93, %c0_94, %c0_95], %200 {strides = array<i32>} : memref<8x8x128xf32, #tpu.memory_space<vmem>>, vector<1x8x128xf32>,
    %c5 = arith.constant 5 : index
    %c0_96 = arith.constant 0 : index
    %c0_97 = arith.constant 0 : index
    %202 = vector.load %arg2[%c5, %c0_96, %c0_97] : memref<8x8x384xf32, #tpu.memory_space<vmem>>, vector<1x8x384xf32>
    %203 = vector.shape_cast %202 : vector<1x8x384xf32> to vector<8x384xf32>
    %c1_98 = arith.constant 1 : index
    %c0_99 = arith.constant 0 : index
    %c0_100 = arith.constant 0 : index
    %204 = vector.load %arg4[%c1_98, %c0_99, %c0_100] : memref<2x128x256xf32, #tpu.memory_space<vmem>>, vector<1x128x256xf32>
    %205 = vector.shape_cast %204 : vector<1x128x256xf32> to vector<128x256xf32>
    %c1_101 = arith.constant 1 : index
    %c0_102 = arith.constant 0 : index
    %c0_103 = arith.constant 0 : index
    %206 = vector.load %arg5[%c1_101, %c0_102, %c0_103] : memref<2x128x128xf32, #tpu.memory_space<vmem>>, vector<1x128x128xf32>
    %207 = vector.shape_cast %206 : vector<1x128x128xf32> to vector<128x128xf32>
    %cst_104 = arith.constant dense<0.000000e+00> : vector<8x256xf32>
    %208 = tpu.matmul %160, %205, %cst_104 {dimension_numbers = #tpu.dot_dimension_numbers<[1], [0], [0], [1], [0, 0, 1, 1], [], []>} : vector<8x128xf32>, vector<128x256xf32>, vector<8x256xf32> -> vector<8x256xf32>
    %209 = vector.extract_strided_slice %203 {offsets = [0, 0], sizes = [8, 128], strides = [1, 1]} : vector<8x384xf32> to vector<8x128xf32>
    %210 = vector.extract_strided_slice %208 {offsets = [0, 0], sizes = [8, 128], strides = [1, 1]} : vector<8x256xf32> to vector<8x128xf32>
    %211 = arith.addf %209, %210 : vector<8x128xf32>
    %212 = arith.negf %211 : vector<8x128xf32>
    %213 = math.exp %212 : vector<8x128xf32>
    %cst_105 = arith.constant 1.000000e+00 : f32
    %214 = vector.broadcast %cst_105 : f32 to vector<8x128xf32>
    %215 = arith.addf %214, %213 : vector<8x128xf32>
    %216 = arith.divf %214, %215 : vector<8x128xf32>
    %217 = vector.extract_strided_slice %203 {offsets = [0, 128], sizes = [8, 128], strides = [1, 1]} : vector<8x384xf32> to vector<8x128xf32>
    %218 = vector.extract_strided_slice %208 {offsets = [0, 128], sizes = [8, 128], strides = [1, 1]} : vector<8x256xf32> to vector<8x128xf32>
    %219 = arith.addf %217, %218 : vector<8x128xf32>
    %220 = arith.negf %219 : vector<8x128xf32>
    %221 = math.exp %220 : vector<8x128xf32>
    %cst_106 = arith.constant 1.000000e+00 : f32
    %222 = vector.broadcast %cst_106 : f32 to vector<8x128xf32>
    %223 = arith.addf %222, %221 : vector<8x128xf32>
    %224 = arith.divf %222, %223 : vector<8x128xf32>
    %225 = vector.extract_strided_slice %203 {offsets = [0, 256], sizes = [8, 128], strides = [1, 1]} : vector<8x384xf32> to vector<8x128xf32>
    %226 = arith.mulf %224, %160 : vector<8x128xf32>
    %cst_107 = arith.constant dense<0.000000e+00> : vector<8x128xf32>
    %227 = tpu.matmul %226, %207, %cst_107 {dimension_numbers = #tpu.dot_dimension_numbers<[1], [0], [0], [1], [0, 0, 1, 1], [], []>} : vector<8x128xf32>, vector<128x128xf32>, vector<8x128xf32> -> vector<8x128xf32>
    %228 = arith.addf %225, %227 : vector<8x128xf32>
    %229 = math.tanh %228 : vector<8x128xf32>
    %230 = arith.mulf %216, %160 : vector<8x128xf32>
    %cst_108 = arith.constant 1.000000e+00 : f32
    %231 = vector.broadcast %cst_108 : f32 to vector<8x128xf32>
    %232 = arith.subf %231, %216 : vector<8x128xf32>
    %233 = arith.mulf %232, %229 : vector<8x128xf32>
    %234 = arith.addf %230, %233 : vector<8x128xf32>
    %cst_109 = arith.constant -5.000000e-01 : f32
    %cst_110 = arith.constant 5.000000e-01 : f32
    %235 = vector.broadcast %cst_109 : f32 to vector<8x128xf32>
    %236 = arith.maximumf %235, %234 : vector<8x128xf32>
    %237 = vector.broadcast %cst_110 : f32 to vector<8x128xf32>
    %238 = arith.minimumf %237, %236 : vector<8x128xf32>
    %239 = vector.shape_cast %238 : vector<8x128xf32> to vector<1x8x128xf32>
    %c5_111 = arith.constant 5 : index
    %c0_112 = arith.constant 0 : index
    %c0_113 = arith.constant 0 : index
    %240 = vector.load %arg7[%c5_111, %c0_112, %c0_113] : memref<8x8x128xf32, #tpu.memory_space<vmem>>, vector<1x8x128xf32>
    tpu.vector_store %arg7[%c5_111, %c0_112, %c0_113], %239 {strides = array<i32>} : memref<8x8x128xf32, #tpu.memory_space<vmem>>, vector<1x8x128xf32>,
    %c3 = arith.constant 3 : index
    %c0_114 = arith.constant 0 : index
    %c0_115 = arith.constant 0 : index
    %241 = vector.load %arg1[%c3, %c0_114, %c0_115] : memref<8x8x384xf32, #tpu.memory_space<vmem>>, vector<1x8x384xf32>
    %242 = vector.shape_cast %241 : vector<1x8x384xf32> to vector<8x384xf32>
    %c0_116 = arith.constant 0 : index
    %c0_117 = arith.constant 0 : index
    %c0_118 = arith.constant 0 : index
    %243 = vector.load %arg4[%c0_116, %c0_117, %c0_118] : memref<2x128x256xf32, #tpu.memory_space<vmem>>, vector<1x128x256xf32>
    %244 = vector.shape_cast %243 : vector<1x128x256xf32> to vector<128x256xf32>
    %c0_119 = arith.constant 0 : index
    %c0_120 = arith.constant 0 : index
    %c0_121 = arith.constant 0 : index
    %245 = vector.load %arg5[%c0_119, %c0_120, %c0_121] : memref<2x128x128xf32, #tpu.memory_space<vmem>>, vector<1x128x128xf32>
    %246 = vector.shape_cast %245 : vector<1x128x128xf32> to vector<128x128xf32>
    %cst_122 = arith.constant dense<0.000000e+00> : vector<8x256xf32>
    %247 = tpu.matmul %199, %244, %cst_122 {dimension_numbers = #tpu.dot_dimension_numbers<[1], [0], [0], [1], [0, 0, 1, 1], [], []>} : vector<8x128xf32>, vector<128x256xf32>, vector<8x256xf32> -> vector<8x256xf32>
    %248 = vector.extract_strided_slice %242 {offsets = [0, 0], sizes = [8, 128], strides = [1, 1]} : vector<8x384xf32> to vector<8x128xf32>
    %249 = vector.extract_strided_slice %247 {offsets = [0, 0], sizes = [8, 128], strides = [1, 1]} : vector<8x256xf32> to vector<8x128xf32>
    %250 = arith.addf %248, %249 : vector<8x128xf32>
    %251 = arith.negf %250 : vector<8x128xf32>
    %252 = math.exp %251 : vector<8x128xf32>
    %cst_123 = arith.constant 1.000000e+00 : f32
    %253 = vector.broadcast %cst_123 : f32 to vector<8x128xf32>
    %254 = arith.addf %253, %252 : vector<8x128xf32>
    %255 = arith.divf %253, %254 : vector<8x128xf32>
    %256 = vector.extract_strided_slice %242 {offsets = [0, 128], sizes = [8, 128], strides = [1, 1]} : vector<8x384xf32> to vector<8x128xf32>
    %257 = vector.extract_strided_slice %247 {offsets = [0, 128], sizes = [8, 128], strides = [1, 1]} : vector<8x256xf32> to vector<8x128xf32>
    %258 = arith.addf %256, %257 : vector<8x128xf32>
    %259 = arith.negf %258 : vector<8x128xf32>
    %260 = math.exp %259 : vector<8x128xf32>
    %cst_124 = arith.constant 1.000000e+00 : f32
    %261 = vector.broadcast %cst_124 : f32 to vector<8x128xf32>
    %262 = arith.addf %261, %260 : vector<8x128xf32>
    %263 = arith.divf %261, %262 : vector<8x128xf32>
    %264 = vector.extract_strided_slice %242 {offsets = [0, 256], sizes = [8, 128], strides = [1, 1]} : vector<8x384xf32> to vector<8x128xf32>
    %265 = arith.mulf %263, %199 : vector<8x128xf32>
    %cst_125 = arith.constant dense<0.000000e+00> : vector<8x128xf32>
    %266 = tpu.matmul %265, %246, %cst_125 {dimension_numbers = #tpu.dot_dimension_numbers<[1], [0], [0], [1], [0, 0, 1, 1], [], []>} : vector<8x128xf32>, vector<128x128xf32>, vector<8x128xf32> -> vector<8x128xf32>
    %267 = arith.addf %264, %266 : vector<8x128xf32>
    %268 = math.tanh %267 : vector<8x128xf32>
    %269 = arith.mulf %255, %199 : vector<8x128xf32>
    %cst_126 = arith.constant 1.000000e+00 : f32
    %270 = vector.broadcast %cst_126 : f32 to vector<8x128xf32>
    %271 = arith.subf %270, %255 : vector<8x128xf32>
    %272 = arith.mulf %271, %268 : vector<8x128xf32>
    %273 = arith.addf %269, %272 : vector<8x128xf32>
    %cst_127 = arith.constant -5.000000e-01 : f32
    %cst_128 = arith.constant 5.000000e-01 : f32
    %274 = vector.broadcast %cst_127 : f32 to vector<8x128xf32>
    %275 = arith.maximumf %274, %273 : vector<8x128xf32>
    %276 = vector.broadcast %cst_128 : f32 to vector<8x128xf32>
    %277 = arith.minimumf %276, %275 : vector<8x128xf32>
    %278 = vector.shape_cast %277 : vector<8x128xf32> to vector<1x8x128xf32>
    %c3_129 = arith.constant 3 : index
    %c0_130 = arith.constant 0 : index
    %c0_131 = arith.constant 0 : index
    %279 = vector.load %arg6[%c3_129, %c0_130, %c0_131] : memref<8x8x128xf32, #tpu.memory_space<vmem>>, vector<1x8x128xf32>
    tpu.vector_store %arg6[%c3_129, %c0_130, %c0_131], %278 {strides = array<i32>} : memref<8x8x128xf32, #tpu.memory_space<vmem>>, vector<1x8x128xf32>,
    %c4 = arith.constant 4 : index
    %c0_132 = arith.constant 0 : index
    %c0_133 = arith.constant 0 : index
    %280 = vector.load %arg2[%c4, %c0_132, %c0_133] : memref<8x8x384xf32, #tpu.memory_space<vmem>>, vector<1x8x384xf32>
    %281 = vector.shape_cast %280 : vector<1x8x384xf32> to vector<8x384xf32>
    %c1_134 = arith.constant 1 : index
    %c0_135 = arith.constant 0 : index
    %c0_136 = arith.constant 0 : index
    %282 = vector.load %arg4[%c1_134, %c0_135, %c0_136] : memref<2x128x256xf32, #tpu.memory_space<vmem>>, vector<1x128x256xf32>
    %283 = vector.shape_cast %282 : vector<1x128x256xf32> to vector<128x256xf32>
    %c1_137 = arith.constant 1 : index
    %c0_138 = arith.constant 0 : index
    %c0_139 = arith.constant 0 : index
    %284 = vector.load %arg5[%c1_137, %c0_138, %c0_139] : memref<2x128x128xf32, #tpu.memory_space<vmem>>, vector<1x128x128xf32>
    %285 = vector.shape_cast %284 : vector<1x128x128xf32> to vector<128x128xf32>
    %cst_140 = arith.constant dense<0.000000e+00> : vector<8x256xf32>
    %286 = tpu.matmul %238, %283, %cst_140 {dimension_numbers = #tpu.dot_dimension_numbers<[1], [0], [0], [1], [0, 0, 1, 1], [], []>} : vector<8x128xf32>, vector<128x256xf32>, vector<8x256xf32> -> vector<8x256xf32>
    %287 = vector.extract_strided_slice %281 {offsets = [0, 0], sizes = [8, 128], strides = [1, 1]} : vector<8x384xf32> to vector<8x128xf32>
    %288 = vector.extract_strided_slice %286 {offsets = [0, 0], sizes = [8, 128], strides = [1, 1]} : vector<8x256xf32> to vector<8x128xf32>
    %289 = arith.addf %287, %288 : vector<8x128xf32>
    %290 = arith.negf %289 : vector<8x128xf32>
    %291 = math.exp %290 : vector<8x128xf32>
    %cst_141 = arith.constant 1.000000e+00 : f32
    %292 = vector.broadcast %cst_141 : f32 to vector<8x128xf32>
    %293 = arith.addf %292, %291 : vector<8x128xf32>
    %294 = arith.divf %292, %293 : vector<8x128xf32>
    %295 = vector.extract_strided_slice %281 {offsets = [0, 128], sizes = [8, 128], strides = [1, 1]} : vector<8x384xf32> to vector<8x128xf32>
    %296 = vector.extract_strided_slice %286 {offsets = [0, 128], sizes = [8, 128], strides = [1, 1]} : vector<8x256xf32> to vector<8x128xf32>
    %297 = arith.addf %295, %296 : vector<8x128xf32>
    %298 = arith.negf %297 : vector<8x128xf32>
    %299 = math.exp %298 : vector<8x128xf32>
    %cst_142 = arith.constant 1.000000e+00 : f32
    %300 = vector.broadcast %cst_142 : f32 to vector<8x128xf32>
    %301 = arith.addf %300, %299 : vector<8x128xf32>
    %302 = arith.divf %300, %301 : vector<8x128xf32>
    %303 = vector.extract_strided_slice %281 {offsets = [0, 256], sizes = [8, 128], strides = [1, 1]} : vector<8x384xf32> to vector<8x128xf32>
    %304 = arith.mulf %302, %238 : vector<8x128xf32>
    %cst_143 = arith.constant dense<0.000000e+00> : vector<8x128xf32>
    %305 = tpu.matmul %304, %285, %cst_143 {dimension_numbers = #tpu.dot_dimension_numbers<[1], [0], [0], [1], [0, 0, 1, 1], [], []>} : vector<8x128xf32>, vector<128x128xf32>, vector<8x128xf32> -> vector<8x128xf32>
    %306 = arith.addf %303, %305 : vector<8x128xf32>
    %307 = math.tanh %306 : vector<8x128xf32>
    %308 = arith.mulf %294, %238 : vector<8x128xf32>
    %cst_144 = arith.constant 1.000000e+00 : f32
    %309 = vector.broadcast %cst_144 : f32 to vector<8x128xf32>
    %310 = arith.subf %309, %294 : vector<8x128xf32>
    %311 = arith.mulf %310, %307 : vector<8x128xf32>
    %312 = arith.addf %308, %311 : vector<8x128xf32>
    %cst_145 = arith.constant -5.000000e-01 : f32
    %cst_146 = arith.constant 5.000000e-01 : f32
    %313 = vector.broadcast %cst_145 : f32 to vector<8x128xf32>
    %314 = arith.maximumf %313, %312 : vector<8x128xf32>
    %315 = vector.broadcast %cst_146 : f32 to vector<8x128xf32>
    %316 = arith.minimumf %315, %314 : vector<8x128xf32>
    %317 = vector.shape_cast %316 : vector<8x128xf32> to vector<1x8x128xf32>
    %c4_147 = arith.constant 4 : index
    %c0_148 = arith.constant 0 : index
    %c0_149 = arith.constant 0 : index
    %318 = vector.load %arg7[%c4_147, %c0_148, %c0_149] : memref<8x8x128xf32, #tpu.memory_space<vmem>>, vector<1x8x128xf32>
    tpu.vector_store %arg7[%c4_147, %c0_148, %c0_149], %317 {strides = array<i32>} : memref<8x8x128xf32, #tpu.memory_space<vmem>>, vector<1x8x128xf32>,
    %c4_150 = arith.constant 4 : index
    %c0_151 = arith.constant 0 : index
    %c0_152 = arith.constant 0 : index
    %319 = vector.load %arg1[%c4_150, %c0_151, %c0_152] : memref<8x8x384xf32, #tpu.memory_space<vmem>>, vector<1x8x384xf32>
    %320 = vector.shape_cast %319 : vector<1x8x384xf32> to vector<8x384xf32>
    %c0_153 = arith.constant 0 : index
    %c0_154 = arith.constant 0 : index
    %c0_155 = arith.constant 0 : index
    %321 = vector.load %arg4[%c0_153, %c0_154, %c0_155] : memref<2x128x256xf32, #tpu.memory_space<vmem>>, vector<1x128x256xf32>
    %322 = vector.shape_cast %321 : vector<1x128x256xf32> to vector<128x256xf32>
    %c0_156 = arith.constant 0 : index
    %c0_157 = arith.constant 0 : index
    %c0_158 = arith.constant 0 : index
    %323 = vector.load %arg5[%c0_156, %c0_157, %c0_158] : memref<2x128x128xf32, #tpu.memory_space<vmem>>, vector<1x128x128xf32>
    %324 = vector.shape_cast %323 : vector<1x128x128xf32> to vector<128x128xf32>
    %cst_159 = arith.constant dense<0.000000e+00> : vector<8x256xf32>
    %325 = tpu.matmul %277, %322, %cst_159 {dimension_numbers = #tpu.dot_dimension_numbers<[1], [0], [0], [1], [0, 0, 1, 1], [], []>} : vector<8x128xf32>, vector<128x256xf32>, vector<8x256xf32> -> vector<8x256xf32>
    %326 = vector.extract_strided_slice %320 {offsets = [0, 0], sizes = [8, 128], strides = [1, 1]} : vector<8x384xf32> to vector<8x128xf32>
    %327 = vector.extract_strided_slice %325 {offsets = [0, 0], sizes = [8, 128], strides = [1, 1]} : vector<8x256xf32> to vector<8x128xf32>
    %328 = arith.addf %326, %327 : vector<8x128xf32>
    %329 = arith.negf %328 : vector<8x128xf32>
    %330 = math.exp %329 : vector<8x128xf32>
    %cst_160 = arith.constant 1.000000e+00 : f32
    %331 = vector.broadcast %cst_160 : f32 to vector<8x128xf32>
    %332 = arith.addf %331, %330 : vector<8x128xf32>
    %333 = arith.divf %331, %332 : vector<8x128xf32>
    %334 = vector.extract_strided_slice %320 {offsets = [0, 128], sizes = [8, 128], strides = [1, 1]} : vector<8x384xf32> to vector<8x128xf32>
    %335 = vector.extract_strided_slice %325 {offsets = [0, 128], sizes = [8, 128], strides = [1, 1]} : vector<8x256xf32> to vector<8x128xf32>
    %336 = arith.addf %334, %335 : vector<8x128xf32>
    %337 = arith.negf %336 : vector<8x128xf32>
    %338 = math.exp %337 : vector<8x128xf32>
    %cst_161 = arith.constant 1.000000e+00 : f32
    %339 = vector.broadcast %cst_161 : f32 to vector<8x128xf32>
    %340 = arith.addf %339, %338 : vector<8x128xf32>
    %341 = arith.divf %339, %340 : vector<8x128xf32>
    %342 = vector.extract_strided_slice %320 {offsets = [0, 256], sizes = [8, 128], strides = [1, 1]} : vector<8x384xf32> to vector<8x128xf32>
    %343 = arith.mulf %341, %277 : vector<8x128xf32>
    %cst_162 = arith.constant dense<0.000000e+00> : vector<8x128xf32>
    %344 = tpu.matmul %343, %324, %cst_162 {dimension_numbers = #tpu.dot_dimension_numbers<[1], [0], [0], [1], [0, 0, 1, 1], [], []>} : vector<8x128xf32>, vector<128x128xf32>, vector<8x128xf32> -> vector<8x128xf32>
    %345 = arith.addf %342, %344 : vector<8x128xf32>
    %346 = math.tanh %345 : vector<8x128xf32>
    %347 = arith.mulf %333, %277 : vector<8x128xf32>
    %cst_163 = arith.constant 1.000000e+00 : f32
    %348 = vector.broadcast %cst_163 : f32 to vector<8x128xf32>
    %349 = arith.subf %348, %333 : vector<8x128xf32>
    %350 = arith.mulf %349, %346 : vector<8x128xf32>
    %351 = arith.addf %347, %350 : vector<8x128xf32>
    %cst_164 = arith.constant -5.000000e-01 : f32
    %cst_165 = arith.constant 5.000000e-01 : f32
    %352 = vector.broadcast %cst_164 : f32 to vector<8x128xf32>
    %353 = arith.maximumf %352, %351 : vector<8x128xf32>
    %354 = vector.broadcast %cst_165 : f32 to vector<8x128xf32>
    %355 = arith.minimumf %354, %353 : vector<8x128xf32>
    %356 = vector.shape_cast %355 : vector<8x128xf32> to vector<1x8x128xf32>
    %c4_166 = arith.constant 4 : index
    %c0_167 = arith.constant 0 : index
    %c0_168 = arith.constant 0 : index
    %357 = vector.load %arg6[%c4_166, %c0_167, %c0_168] : memref<8x8x128xf32, #tpu.memory_space<vmem>>, vector<1x8x128xf32>
    tpu.vector_store %arg6[%c4_166, %c0_167, %c0_168], %356 {strides = array<i32>} : memref<8x8x128xf32, #tpu.memory_space<vmem>>, vector<1x8x128xf32>,
    %c3_169 = arith.constant 3 : index
    %c0_170 = arith.constant 0 : index
    %c0_171 = arith.constant 0 : index
    %358 = vector.load %arg2[%c3_169, %c0_170, %c0_171] : memref<8x8x384xf32, #tpu.memory_space<vmem>>, vector<1x8x384xf32>
    %359 = vector.shape_cast %358 : vector<1x8x384xf32> to vector<8x384xf32>
    %c1_172 = arith.constant 1 : index
    %c0_173 = arith.constant 0 : index
    %c0_174 = arith.constant 0 : index
    %360 = vector.load %arg4[%c1_172, %c0_173, %c0_174] : memref<2x128x256xf32, #tpu.memory_space<vmem>>, vector<1x128x256xf32>
    %361 = vector.shape_cast %360 : vector<1x128x256xf32> to vector<128x256xf32>
    %c1_175 = arith.constant 1 : index
    %c0_176 = arith.constant 0 : index
    %c0_177 = arith.constant 0 : index
    %362 = vector.load %arg5[%c1_175, %c0_176, %c0_177] : memref<2x128x128xf32, #tpu.memory_space<vmem>>, vector<1x128x128xf32>
    %363 = vector.shape_cast %362 : vector<1x128x128xf32> to vector<128x128xf32>
    %cst_178 = arith.constant dense<0.000000e+00> : vector<8x256xf32>
    %364 = tpu.matmul %316, %361, %cst_178 {dimension_numbers = #tpu.dot_dimension_numbers<[1], [0], [0], [1], [0, 0, 1, 1], [], []>} : vector<8x128xf32>, vector<128x256xf32>, vector<8x256xf32> -> vector<8x256xf32>
    %365 = vector.extract_strided_slice %359 {offsets = [0, 0], sizes = [8, 128], strides = [1, 1]} : vector<8x384xf32> to vector<8x128xf32>
    %366 = vector.extract_strided_slice %364 {offsets = [0, 0], sizes = [8, 128], strides = [1, 1]} : vector<8x256xf32> to vector<8x128xf32>
    %367 = arith.addf %365, %366 : vector<8x128xf32>
    %368 = arith.negf %367 : vector<8x128xf32>
    %369 = math.exp %368 : vector<8x128xf32>
    %cst_179 = arith.constant 1.000000e+00 : f32
    %370 = vector.broadcast %cst_179 : f32 to vector<8x128xf32>
    %371 = arith.addf %370, %369 : vector<8x128xf32>
    %372 = arith.divf %370, %371 : vector<8x128xf32>
    %373 = vector.extract_strided_slice %359 {offsets = [0, 128], sizes = [8, 128], strides = [1, 1]} : vector<8x384xf32> to vector<8x128xf32>
    %374 = vector.extract_strided_slice %364 {offsets = [0, 128], sizes = [8, 128], strides = [1, 1]} : vector<8x256xf32> to vector<8x128xf32>
    %375 = arith.addf %373, %374 : vector<8x128xf32>
    %376 = arith.negf %375 : vector<8x128xf32>
    %377 = math.exp %376 : vector<8x128xf32>
    %cst_180 = arith.constant 1.000000e+00 : f32
    %378 = vector.broadcast %cst_180 : f32 to vector<8x128xf32>
    %379 = arith.addf %378, %377 : vector<8x128xf32>
    %380 = arith.divf %378, %379 : vector<8x128xf32>
    %381 = vector.extract_strided_slice %359 {offsets = [0, 256], sizes = [8, 128], strides = [1, 1]} : vector<8x384xf32> to vector<8x128xf32>
    %382 = arith.mulf %380, %316 : vector<8x128xf32>
    %cst_181 = arith.constant dense<0.000000e+00> : vector<8x128xf32>
    %383 = tpu.matmul %382, %363, %cst_181 {dimension_numbers = #tpu.dot_dimension_numbers<[1], [0], [0], [1], [0, 0, 1, 1], [], []>} : vector<8x128xf32>, vector<128x128xf32>, vector<8x128xf32> -> vector<8x128xf32>
    %384 = arith.addf %381, %383 : vector<8x128xf32>
    %385 = math.tanh %384 : vector<8x128xf32>
    %386 = arith.mulf %372, %316 : vector<8x128xf32>
    %cst_182 = arith.constant 1.000000e+00 : f32
    %387 = vector.broadcast %cst_182 : f32 to vector<8x128xf32>
    %388 = arith.subf %387, %372 : vector<8x128xf32>
    %389 = arith.mulf %388, %385 : vector<8x128xf32>
    %390 = arith.addf %386, %389 : vector<8x128xf32>
    %cst_183 = arith.constant -5.000000e-01 : f32
    %cst_184 = arith.constant 5.000000e-01 : f32
    %391 = vector.broadcast %cst_183 : f32 to vector<8x128xf32>
    %392 = arith.maximumf %391, %390 : vector<8x128xf32>
    %393 = vector.broadcast %cst_184 : f32 to vector<8x128xf32>
    %394 = arith.minimumf %393, %392 : vector<8x128xf32>
    %395 = vector.shape_cast %394 : vector<8x128xf32> to vector<1x8x128xf32>
    %c3_185 = arith.constant 3 : index
    %c0_186 = arith.constant 0 : index
    %c0_187 = arith.constant 0 : index
    %396 = vector.load %arg7[%c3_185, %c0_186, %c0_187] : memref<8x8x128xf32, #tpu.memory_space<vmem>>, vector<1x8x128xf32>
    tpu.vector_store %arg7[%c3_185, %c0_186, %c0_187], %395 {strides = array<i32>} : memref<8x8x128xf32, #tpu.memory_space<vmem>>, vector<1x8x128xf32>,
    %c5_188 = arith.constant 5 : index
    %c0_189 = arith.constant 0 : index
    %c0_190 = arith.constant 0 : index
    %397 = vector.load %arg1[%c5_188, %c0_189, %c0_190] : memref<8x8x384xf32, #tpu.memory_space<vmem>>, vector<1x8x384xf32>
    %398 = vector.shape_cast %397 : vector<1x8x384xf32> to vector<8x384xf32>
    %c0_191 = arith.constant 0 : index
    %c0_192 = arith.constant 0 : index
    %c0_193 = arith.constant 0 : index
    %399 = vector.load %arg4[%c0_191, %c0_192, %c0_193] : memref<2x128x256xf32, #tpu.memory_space<vmem>>, vector<1x128x256xf32>
    %400 = vector.shape_cast %399 : vector<1x128x256xf32> to vector<128x256xf32>
    %c0_194 = arith.constant 0 : index
    %c0_195 = arith.constant 0 : index
    %c0_196 = arith.constant 0 : index
    %401 = vector.load %arg5[%c0_194, %c0_195, %c0_196] : memref<2x128x128xf32, #tpu.memory_space<vmem>>, vector<1x128x128xf32>
    %402 = vector.shape_cast %401 : vector<1x128x128xf32> to vector<128x128xf32>
    %cst_197 = arith.constant dense<0.000000e+00> : vector<8x256xf32>
    %403 = tpu.matmul %355, %400, %cst_197 {dimension_numbers = #tpu.dot_dimension_numbers<[1], [0], [0], [1], [0, 0, 1, 1], [], []>} : vector<8x128xf32>, vector<128x256xf32>, vector<8x256xf32> -> vector<8x256xf32>
    %404 = vector.extract_strided_slice %398 {offsets = [0, 0], sizes = [8, 128], strides = [1, 1]} : vector<8x384xf32> to vector<8x128xf32>
    %405 = vector.extract_strided_slice %403 {offsets = [0, 0], sizes = [8, 128], strides = [1, 1]} : vector<8x256xf32> to vector<8x128xf32>
    %406 = arith.addf %404, %405 : vector<8x128xf32>
    %407 = arith.negf %406 : vector<8x128xf32>
    %408 = math.exp %407 : vector<8x128xf32>
    %cst_198 = arith.constant 1.000000e+00 : f32
    %409 = vector.broadcast %cst_198 : f32 to vector<8x128xf32>
    %410 = arith.addf %409, %408 : vector<8x128xf32>
    %411 = arith.divf %409, %410 : vector<8x128xf32>
    %412 = vector.extract_strided_slice %398 {offsets = [0, 128], sizes = [8, 128], strides = [1, 1]} : vector<8x384xf32> to vector<8x128xf32>
    %413 = vector.extract_strided_slice %403 {offsets = [0, 128], sizes = [8, 128], strides = [1, 1]} : vector<8x256xf32> to vector<8x128xf32>
    %414 = arith.addf %412, %413 : vector<8x128xf32>
    %415 = arith.negf %414 : vector<8x128xf32>
    %416 = math.exp %415 : vector<8x128xf32>
    %cst_199 = arith.constant 1.000000e+00 : f32
    %417 = vector.broadcast %cst_199 : f32 to vector<8x128xf32>
    %418 = arith.addf %417, %416 : vector<8x128xf32>
    %419 = arith.divf %417, %418 : vector<8x128xf32>
    %420 = vector.extract_strided_slice %398 {offsets = [0, 256], sizes = [8, 128], strides = [1, 1]} : vector<8x384xf32> to vector<8x128xf32>
    %421 = arith.mulf %419, %355 : vector<8x128xf32>
    %cst_200 = arith.constant dense<0.000000e+00> : vector<8x128xf32>
    %422 = tpu.matmul %421, %402, %cst_200 {dimension_numbers = #tpu.dot_dimension_numbers<[1], [0], [0], [1], [0, 0, 1, 1], [], []>} : vector<8x128xf32>, vector<128x128xf32>, vector<8x128xf32> -> vector<8x128xf32>
    %423 = arith.addf %420, %422 : vector<8x128xf32>
    %424 = math.tanh %423 : vector<8x128xf32>
    %425 = arith.mulf %411, %355 : vector<8x128xf32>
    %cst_201 = arith.constant 1.000000e+00 : f32
    %426 = vector.broadcast %cst_201 : f32 to vector<8x128xf32>
    %427 = arith.subf %426, %411 : vector<8x128xf32>
    %428 = arith.mulf %427, %424 : vector<8x128xf32>
    %429 = arith.addf %425, %428 : vector<8x128xf32>
    %cst_202 = arith.constant -5.000000e-01 : f32
    %cst_203 = arith.constant 5.000000e-01 : f32
    %430 = vector.broadcast %cst_202 : f32 to vector<8x128xf32>
    %431 = arith.maximumf %430, %429 : vector<8x128xf32>
    %432 = vector.broadcast %cst_203 : f32 to vector<8x128xf32>
    %433 = arith.minimumf %432, %431 : vector<8x128xf32>
    %434 = vector.shape_cast %433 : vector<8x128xf32> to vector<1x8x128xf32>
    %c5_204 = arith.constant 5 : index
    %c0_205 = arith.constant 0 : index
    %c0_206 = arith.constant 0 : index
    %435 = vector.load %arg6[%c5_204, %c0_205, %c0_206] : memref<8x8x128xf32, #tpu.memory_space<vmem>>, vector<1x8x128xf32>
    tpu.vector_store %arg6[%c5_204, %c0_205, %c0_206], %434 {strides = array<i32>} : memref<8x8x128xf32, #tpu.memory_space<vmem>>, vector<1x8x128xf32>,
    %c2_207 = arith.constant 2 : index
    %c0_208 = arith.constant 0 : index
    %c0_209 = arith.constant 0 : index
    %436 = vector.load %arg2[%c2_207, %c0_208, %c0_209] : memref<8x8x384xf32, #tpu.memory_space<vmem>>, vector<1x8x384xf32>
    %437 = vector.shape_cast %436 : vector<1x8x384xf32> to vector<8x384xf32>
    %c1_210 = arith.constant 1 : index
    %c0_211 = arith.constant 0 : index
    %c0_212 = arith.constant 0 : index
    %438 = vector.load %arg4[%c1_210, %c0_211, %c0_212] : memref<2x128x256xf32, #tpu.memory_space<vmem>>, vector<1x128x256xf32>
    %439 = vector.shape_cast %438 : vector<1x128x256xf32> to vector<128x256xf32>
    %c1_213 = arith.constant 1 : index
    %c0_214 = arith.constant 0 : index
    %c0_215 = arith.constant 0 : index
    %440 = vector.load %arg5[%c1_213, %c0_214, %c0_215] : memref<2x128x128xf32, #tpu.memory_space<vmem>>, vector<1x128x128xf32>
    %441 = vector.shape_cast %440 : vector<1x128x128xf32> to vector<128x128xf32>
    %cst_216 = arith.constant dense<0.000000e+00> : vector<8x256xf32>
    %442 = tpu.matmul %394, %439, %cst_216 {dimension_numbers = #tpu.dot_dimension_numbers<[1], [0], [0], [1], [0, 0, 1, 1], [], []>} : vector<8x128xf32>, vector<128x256xf32>, vector<8x256xf32> -> vector<8x256xf32>
    %443 = vector.extract_strided_slice %437 {offsets = [0, 0], sizes = [8, 128], strides = [1, 1]} : vector<8x384xf32> to vector<8x128xf32>
    %444 = vector.extract_strided_slice %442 {offsets = [0, 0], sizes = [8, 128], strides = [1, 1]} : vector<8x256xf32> to vector<8x128xf32>
    %445 = arith.addf %443, %444 : vector<8x128xf32>
    %446 = arith.negf %445 : vector<8x128xf32>
    %447 = math.exp %446 : vector<8x128xf32>
    %cst_217 = arith.constant 1.000000e+00 : f32
    %448 = vector.broadcast %cst_217 : f32 to vector<8x128xf32>
    %449 = arith.addf %448, %447 : vector<8x128xf32>
    %450 = arith.divf %448, %449 : vector<8x128xf32>
    %451 = vector.extract_strided_slice %437 {offsets = [0, 128], sizes = [8, 128], strides = [1, 1]} : vector<8x384xf32> to vector<8x128xf32>
    %452 = vector.extract_strided_slice %442 {offsets = [0, 128], sizes = [8, 128], strides = [1, 1]} : vector<8x256xf32> to vector<8x128xf32>
    %453 = arith.addf %451, %452 : vector<8x128xf32>
    %454 = arith.negf %453 : vector<8x128xf32>
    %455 = math.exp %454 : vector<8x128xf32>
    %cst_218 = arith.constant 1.000000e+00 : f32
    %456 = vector.broadcast %cst_218 : f32 to vector<8x128xf32>
    %457 = arith.addf %456, %455 : vector<8x128xf32>
    %458 = arith.divf %456, %457 : vector<8x128xf32>
    %459 = vector.extract_strided_slice %437 {offsets = [0, 256], sizes = [8, 128], strides = [1, 1]} : vector<8x384xf32> to vector<8x128xf32>
    %460 = arith.mulf %458, %394 : vector<8x128xf32>
    %cst_219 = arith.constant dense<0.000000e+00> : vector<8x128xf32>
    %461 = tpu.matmul %460, %441, %cst_219 {dimension_numbers = #tpu.dot_dimension_numbers<[1], [0], [0], [1], [0, 0, 1, 1], [], []>} : vector<8x128xf32>, vector<128x128xf32>, vector<8x128xf32> -> vector<8x128xf32>
    %462 = arith.addf %459, %461 : vector<8x128xf32>
    %463 = math.tanh %462 : vector<8x128xf32>
    %464 = arith.mulf %450, %394 : vector<8x128xf32>
    %cst_220 = arith.constant 1.000000e+00 : f32
    %465 = vector.broadcast %cst_220 : f32 to vector<8x128xf32>
    %466 = arith.subf %465, %450 : vector<8x128xf32>
    %467 = arith.mulf %466, %463 : vector<8x128xf32>
    %468 = arith.addf %464, %467 : vector<8x128xf32>
    %cst_221 = arith.constant -5.000000e-01 : f32
    %cst_222 = arith.constant 5.000000e-01 : f32
    %469 = vector.broadcast %cst_221 : f32 to vector<8x128xf32>
    %470 = arith.maximumf %469, %468 : vector<8x128xf32>
    %471 = vector.broadcast %cst_222 : f32 to vector<8x128xf32>
    %472 = arith.minimumf %471, %470 : vector<8x128xf32>
    %473 = vector.shape_cast %472 : vector<8x128xf32> to vector<1x8x128xf32>
    %c2_223 = arith.constant 2 : index
    %c0_224 = arith.constant 0 : index
    %c0_225 = arith.constant 0 : index
    %474 = vector.load %arg7[%c2_223, %c0_224, %c0_225] : memref<8x8x128xf32, #tpu.memory_space<vmem>>, vector<1x8x128xf32>
    tpu.vector_store %arg7[%c2_223, %c0_224, %c0_225], %473 {strides = array<i32>} : memref<8x8x128xf32, #tpu.memory_space<vmem>>, vector<1x8x128xf32>,
    %c6_226 = arith.constant 6 : index
    %c0_227 = arith.constant 0 : index
    %c0_228 = arith.constant 0 : index
    %475 = vector.load %arg1[%c6_226, %c0_227, %c0_228] : memref<8x8x384xf32, #tpu.memory_space<vmem>>, vector<1x8x384xf32>
    %476 = vector.shape_cast %475 : vector<1x8x384xf32> to vector<8x384xf32>
    %c0_229 = arith.constant 0 : index
    %c0_230 = arith.constant 0 : index
    %c0_231 = arith.constant 0 : index
    %477 = vector.load %arg4[%c0_229, %c0_230, %c0_231] : memref<2x128x256xf32, #tpu.memory_space<vmem>>, vector<1x128x256xf32>
    %478 = vector.shape_cast %477 : vector<1x128x256xf32> to vector<128x256xf32>
    %c0_232 = arith.constant 0 : index
    %c0_233 = arith.constant 0 : index
    %c0_234 = arith.constant 0 : index
    %479 = vector.load %arg5[%c0_232, %c0_233, %c0_234] : memref<2x128x128xf32, #tpu.memory_space<vmem>>, vector<1x128x128xf32>
    %480 = vector.shape_cast %479 : vector<1x128x128xf32> to vector<128x128xf32>
    %cst_235 = arith.constant dense<0.000000e+00> : vector<8x256xf32>
    %481 = tpu.matmul %433, %478, %cst_235 {dimension_numbers = #tpu.dot_dimension_numbers<[1], [0], [0], [1], [0, 0, 1, 1], [], []>} : vector<8x128xf32>, vector<128x256xf32>, vector<8x256xf32> -> vector<8x256xf32>
    %482 = vector.extract_strided_slice %476 {offsets = [0, 0], sizes = [8, 128], strides = [1, 1]} : vector<8x384xf32> to vector<8x128xf32>
    %483 = vector.extract_strided_slice %481 {offsets = [0, 0], sizes = [8, 128], strides = [1, 1]} : vector<8x256xf32> to vector<8x128xf32>
    %484 = arith.addf %482, %483 : vector<8x128xf32>
    %485 = arith.negf %484 : vector<8x128xf32>
    %486 = math.exp %485 : vector<8x128xf32>
    %cst_236 = arith.constant 1.000000e+00 : f32
    %487 = vector.broadcast %cst_236 : f32 to vector<8x128xf32>
    %488 = arith.addf %487, %486 : vector<8x128xf32>
    %489 = arith.divf %487, %488 : vector<8x128xf32>
    %490 = vector.extract_strided_slice %476 {offsets = [0, 128], sizes = [8, 128], strides = [1, 1]} : vector<8x384xf32> to vector<8x128xf32>
    %491 = vector.extract_strided_slice %481 {offsets = [0, 128], sizes = [8, 128], strides = [1, 1]} : vector<8x256xf32> to vector<8x128xf32>
    %492 = arith.addf %490, %491 : vector<8x128xf32>
    %493 = arith.negf %492 : vector<8x128xf32>
    %494 = math.exp %493 : vector<8x128xf32>
    %cst_237 = arith.constant 1.000000e+00 : f32
    %495 = vector.broadcast %cst_237 : f32 to vector<8x128xf32>
    %496 = arith.addf %495, %494 : vector<8x128xf32>
    %497 = arith.divf %495, %496 : vector<8x128xf32>
    %498 = vector.extract_strided_slice %476 {offsets = [0, 256], sizes = [8, 128], strides = [1, 1]} : vector<8x384xf32> to vector<8x128xf32>
    %499 = arith.mulf %497, %433 : vector<8x128xf32>
    %cst_238 = arith.constant dense<0.000000e+00> : vector<8x128xf32>
    %500 = tpu.matmul %499, %480, %cst_238 {dimension_numbers = #tpu.dot_dimension_numbers<[1], [0], [0], [1], [0, 0, 1, 1], [], []>} : vector<8x128xf32>, vector<128x128xf32>, vector<8x128xf32> -> vector<8x128xf32>
    %501 = arith.addf %498, %500 : vector<8x128xf32>
    %502 = math.tanh %501 : vector<8x128xf32>
    %503 = arith.mulf %489, %433 : vector<8x128xf32>
    %cst_239 = arith.constant 1.000000e+00 : f32
    %504 = vector.broadcast %cst_239 : f32 to vector<8x128xf32>
    %505 = arith.subf %504, %489 : vector<8x128xf32>
    %506 = arith.mulf %505, %502 : vector<8x128xf32>
    %507 = arith.addf %503, %506 : vector<8x128xf32>
    %cst_240 = arith.constant -5.000000e-01 : f32
    %cst_241 = arith.constant 5.000000e-01 : f32
    %508 = vector.broadcast %cst_240 : f32 to vector<8x128xf32>
    %509 = arith.maximumf %508, %507 : vector<8x128xf32>
    %510 = vector.broadcast %cst_241 : f32 to vector<8x128xf32>
    %511 = arith.minimumf %510, %509 : vector<8x128xf32>
    %512 = vector.shape_cast %511 : vector<8x128xf32> to vector<1x8x128xf32>
    %c6_242 = arith.constant 6 : index
    %c0_243 = arith.constant 0 : index
    %c0_244 = arith.constant 0 : index
    %513 = vector.load %arg6[%c6_242, %c0_243, %c0_244] : memref<8x8x128xf32, #tpu.memory_space<vmem>>, vector<1x8x128xf32>
    tpu.vector_store %arg6[%c6_242, %c0_243, %c0_244], %512 {strides = array<i32>} : memref<8x8x128xf32, #tpu.memory_space<vmem>>, vector<1x8x128xf32>,
    %c1_245 = arith.constant 1 : index
    %c0_246 = arith.constant 0 : index
    %c0_247 = arith.constant 0 : index
    %514 = vector.load %arg2[%c1_245, %c0_246, %c0_247] : memref<8x8x384xf32, #tpu.memory_space<vmem>>, vector<1x8x384xf32>
    %515 = vector.shape_cast %514 : vector<1x8x384xf32> to vector<8x384xf32>
    %c1_248 = arith.constant 1 : index
    %c0_249 = arith.constant 0 : index
    %c0_250 = arith.constant 0 : index
    %516 = vector.load %arg4[%c1_248, %c0_249, %c0_250] : memref<2x128x256xf32, #tpu.memory_space<vmem>>, vector<1x128x256xf32>
    %517 = vector.shape_cast %516 : vector<1x128x256xf32> to vector<128x256xf32>
    %c1_251 = arith.constant 1 : index
    %c0_252 = arith.constant 0 : index
    %c0_253 = arith.constant 0 : index
    %518 = vector.load %arg5[%c1_251, %c0_252, %c0_253] : memref<2x128x128xf32, #tpu.memory_space<vmem>>, vector<1x128x128xf32>
    %519 = vector.shape_cast %518 : vector<1x128x128xf32> to vector<128x128xf32>
    %cst_254 = arith.constant dense<0.000000e+00> : vector<8x256xf32>
    %520 = tpu.matmul %472, %517, %cst_254 {dimension_numbers = #tpu.dot_dimension_numbers<[1], [0], [0], [1], [0, 0, 1, 1], [], []>} : vector<8x128xf32>, vector<128x256xf32>, vector<8x256xf32> -> vector<8x256xf32>
    %521 = vector.extract_strided_slice %515 {offsets = [0, 0], sizes = [8, 128], strides = [1, 1]} : vector<8x384xf32> to vector<8x128xf32>
    %522 = vector.extract_strided_slice %520 {offsets = [0, 0], sizes = [8, 128], strides = [1, 1]} : vector<8x256xf32> to vector<8x128xf32>
    %523 = arith.addf %521, %522 : vector<8x128xf32>
    %524 = arith.negf %523 : vector<8x128xf32>
    %525 = math.exp %524 : vector<8x128xf32>
    %cst_255 = arith.constant 1.000000e+00 : f32
    %526 = vector.broadcast %cst_255 : f32 to vector<8x128xf32>
    %527 = arith.addf %526, %525 : vector<8x128xf32>
    %528 = arith.divf %526, %527 : vector<8x128xf32>
    %529 = vector.extract_strided_slice %515 {offsets = [0, 128], sizes = [8, 128], strides = [1, 1]} : vector<8x384xf32> to vector<8x128xf32>
    %530 = vector.extract_strided_slice %520 {offsets = [0, 128], sizes = [8, 128], strides = [1, 1]} : vector<8x256xf32> to vector<8x128xf32>
    %531 = arith.addf %529, %530 : vector<8x128xf32>
    %532 = arith.negf %531 : vector<8x128xf32>
    %533 = math.exp %532 : vector<8x128xf32>
    %cst_256 = arith.constant 1.000000e+00 : f32
    %534 = vector.broadcast %cst_256 : f32 to vector<8x128xf32>
    %535 = arith.addf %534, %533 : vector<8x128xf32>
    %536 = arith.divf %534, %535 : vector<8x128xf32>
    %537 = vector.extract_strided_slice %515 {offsets = [0, 256], sizes = [8, 128], strides = [1, 1]} : vector<8x384xf32> to vector<8x128xf32>
    %538 = arith.mulf %536, %472 : vector<8x128xf32>
    %cst_257 = arith.constant dense<0.000000e+00> : vector<8x128xf32>
    %539 = tpu.matmul %538, %519, %cst_257 {dimension_numbers = #tpu.dot_dimension_numbers<[1], [0], [0], [1], [0, 0, 1, 1], [], []>} : vector<8x128xf32>, vector<128x128xf32>, vector<8x128xf32> -> vector<8x128xf32>
    %540 = arith.addf %537, %539 : vector<8x128xf32>
    %541 = math.tanh %540 : vector<8x128xf32>
    %542 = arith.mulf %528, %472 : vector<8x128xf32>
    %cst_258 = arith.constant 1.000000e+00 : f32
    %543 = vector.broadcast %cst_258 : f32 to vector<8x128xf32>
    %544 = arith.subf %543, %528 : vector<8x128xf32>
    %545 = arith.mulf %544, %541 : vector<8x128xf32>
    %546 = arith.addf %542, %545 : vector<8x128xf32>
    %cst_259 = arith.constant -5.000000e-01 : f32
    %cst_260 = arith.constant 5.000000e-01 : f32
    %547 = vector.broadcast %cst_259 : f32 to vector<8x128xf32>
    %548 = arith.maximumf %547, %546 : vector<8x128xf32>
    %549 = vector.broadcast %cst_260 : f32 to vector<8x128xf32>
    %550 = arith.minimumf %549, %548 : vector<8x128xf32>
    %551 = vector.shape_cast %550 : vector<8x128xf32> to vector<1x8x128xf32>
    %c1_261 = arith.constant 1 : index
    %c0_262 = arith.constant 0 : index
    %c0_263 = arith.constant 0 : index
    %552 = vector.load %arg7[%c1_261, %c0_262, %c0_263] : memref<8x8x128xf32, #tpu.memory_space<vmem>>, vector<1x8x128xf32>
    tpu.vector_store %arg7[%c1_261, %c0_262, %c0_263], %551 {strides = array<i32>} : memref<8x8x128xf32, #tpu.memory_space<vmem>>, vector<1x8x128xf32>,
    %c7_264 = arith.constant 7 : index
    %c0_265 = arith.constant 0 : index
    %c0_266 = arith.constant 0 : index
    %553 = vector.load %arg1[%c7_264, %c0_265, %c0_266] : memref<8x8x384xf32, #tpu.memory_space<vmem>>, vector<1x8x384xf32>
    %554 = vector.shape_cast %553 : vector<1x8x384xf32> to vector<8x384xf32>
    %c0_267 = arith.constant 0 : index
    %c0_268 = arith.constant 0 : index
    %c0_269 = arith.constant 0 : index
    %555 = vector.load %arg4[%c0_267, %c0_268, %c0_269] : memref<2x128x256xf32, #tpu.memory_space<vmem>>, vector<1x128x256xf32>
    %556 = vector.shape_cast %555 : vector<1x128x256xf32> to vector<128x256xf32>
    %c0_270 = arith.constant 0 : index
    %c0_271 = arith.constant 0 : index
    %c0_272 = arith.constant 0 : index
    %557 = vector.load %arg5[%c0_270, %c0_271, %c0_272] : memref<2x128x128xf32, #tpu.memory_space<vmem>>, vector<1x128x128xf32>
    %558 = vector.shape_cast %557 : vector<1x128x128xf32> to vector<128x128xf32>
    %cst_273 = arith.constant dense<0.000000e+00> : vector<8x256xf32>
    %559 = tpu.matmul %511, %556, %cst_273 {dimension_numbers = #tpu.dot_dimension_numbers<[1], [0], [0], [1], [0, 0, 1, 1], [], []>} : vector<8x128xf32>, vector<128x256xf32>, vector<8x256xf32> -> vector<8x256xf32>
    %560 = vector.extract_strided_slice %554 {offsets = [0, 0], sizes = [8, 128], strides = [1, 1]} : vector<8x384xf32> to vector<8x128xf32>
    %561 = vector.extract_strided_slice %559 {offsets = [0, 0], sizes = [8, 128], strides = [1, 1]} : vector<8x256xf32> to vector<8x128xf32>
    %562 = arith.addf %560, %561 : vector<8x128xf32>
    %563 = arith.negf %562 : vector<8x128xf32>
    %564 = math.exp %563 : vector<8x128xf32>
    %cst_274 = arith.constant 1.000000e+00 : f32
    %565 = vector.broadcast %cst_274 : f32 to vector<8x128xf32>
    %566 = arith.addf %565, %564 : vector<8x128xf32>
    %567 = arith.divf %565, %566 : vector<8x128xf32>
    %568 = vector.extract_strided_slice %554 {offsets = [0, 128], sizes = [8, 128], strides = [1, 1]} : vector<8x384xf32> to vector<8x128xf32>
    %569 = vector.extract_strided_slice %559 {offsets = [0, 128], sizes = [8, 128], strides = [1, 1]} : vector<8x256xf32> to vector<8x128xf32>
    %570 = arith.addf %568, %569 : vector<8x128xf32>
    %571 = arith.negf %570 : vector<8x128xf32>
    %572 = math.exp %571 : vector<8x128xf32>
    %cst_275 = arith.constant 1.000000e+00 : f32
    %573 = vector.broadcast %cst_275 : f32 to vector<8x128xf32>
    %574 = arith.addf %573, %572 : vector<8x128xf32>
    %575 = arith.divf %573, %574 : vector<8x128xf32>
    %576 = vector.extract_strided_slice %554 {offsets = [0, 256], sizes = [8, 128], strides = [1, 1]} : vector<8x384xf32> to vector<8x128xf32>
    %577 = arith.mulf %575, %511 : vector<8x128xf32>
    %cst_276 = arith.constant dense<0.000000e+00> : vector<8x128xf32>
    %578 = tpu.matmul %577, %558, %cst_276 {dimension_numbers = #tpu.dot_dimension_numbers<[1], [0], [0], [1], [0, 0, 1, 1], [], []>} : vector<8x128xf32>, vector<128x128xf32>, vector<8x128xf32> -> vector<8x128xf32>
    %579 = arith.addf %576, %578 : vector<8x128xf32>
    %580 = math.tanh %579 : vector<8x128xf32>
    %581 = arith.mulf %567, %511 : vector<8x128xf32>
    %cst_277 = arith.constant 1.000000e+00 : f32
    %582 = vector.broadcast %cst_277 : f32 to vector<8x128xf32>
    %583 = arith.subf %582, %567 : vector<8x128xf32>
    %584 = arith.mulf %583, %580 : vector<8x128xf32>
    %585 = arith.addf %581, %584 : vector<8x128xf32>
    %cst_278 = arith.constant -5.000000e-01 : f32
    %cst_279 = arith.constant 5.000000e-01 : f32
    %586 = vector.broadcast %cst_278 : f32 to vector<8x128xf32>
    %587 = arith.maximumf %586, %585 : vector<8x128xf32>
    %588 = vector.broadcast %cst_279 : f32 to vector<8x128xf32>
    %589 = arith.minimumf %588, %587 : vector<8x128xf32>
    %590 = vector.shape_cast %589 : vector<8x128xf32> to vector<1x8x128xf32>
    %c7_280 = arith.constant 7 : index
    %c0_281 = arith.constant 0 : index
    %c0_282 = arith.constant 0 : index
    %591 = vector.load %arg6[%c7_280, %c0_281, %c0_282] : memref<8x8x128xf32, #tpu.memory_space<vmem>>, vector<1x8x128xf32>
    tpu.vector_store %arg6[%c7_280, %c0_281, %c0_282], %590 {strides = array<i32>} : memref<8x8x128xf32, #tpu.memory_space<vmem>>, vector<1x8x128xf32>,
    %c0_283 = arith.constant 0 : index
    %c0_284 = arith.constant 0 : index
    %c0_285 = arith.constant 0 : index
    %592 = vector.load %arg2[%c0_283, %c0_284, %c0_285] : memref<8x8x384xf32, #tpu.memory_space<vmem>>, vector<1x8x384xf32>
    %593 = vector.shape_cast %592 : vector<1x8x384xf32> to vector<8x384xf32>
    %c1_286 = arith.constant 1 : index
    %c0_287 = arith.constant 0 : index
    %c0_288 = arith.constant 0 : index
    %594 = vector.load %arg4[%c1_286, %c0_287, %c0_288] : memref<2x128x256xf32, #tpu.memory_space<vmem>>, vector<1x128x256xf32>
    %595 = vector.shape_cast %594 : vector<1x128x256xf32> to vector<128x256xf32>
    %c1_289 = arith.constant 1 : index
    %c0_290 = arith.constant 0 : index
    %c0_291 = arith.constant 0 : index
    %596 = vector.load %arg5[%c1_289, %c0_290, %c0_291] : memref<2x128x128xf32, #tpu.memory_space<vmem>>, vector<1x128x128xf32>
    %597 = vector.shape_cast %596 : vector<1x128x128xf32> to vector<128x128xf32>
    %cst_292 = arith.constant dense<0.000000e+00> : vector<8x256xf32>
    %598 = tpu.matmul %550, %595, %cst_292 {dimension_numbers = #tpu.dot_dimension_numbers<[1], [0], [0], [1], [0, 0, 1, 1], [], []>} : vector<8x128xf32>, vector<128x256xf32>, vector<8x256xf32> -> vector<8x256xf32>
    %599 = vector.extract_strided_slice %593 {offsets = [0, 0], sizes = [8, 128], strides = [1, 1]} : vector<8x384xf32> to vector<8x128xf32>
    %600 = vector.extract_strided_slice %598 {offsets = [0, 0], sizes = [8, 128], strides = [1, 1]} : vector<8x256xf32> to vector<8x128xf32>
    %601 = arith.addf %599, %600 : vector<8x128xf32>
    %602 = arith.negf %601 : vector<8x128xf32>
    %603 = math.exp %602 : vector<8x128xf32>
    %cst_293 = arith.constant 1.000000e+00 : f32
    %604 = vector.broadcast %cst_293 : f32 to vector<8x128xf32>
    %605 = arith.addf %604, %603 : vector<8x128xf32>
    %606 = arith.divf %604, %605 : vector<8x128xf32>
    %607 = vector.extract_strided_slice %593 {offsets = [0, 128], sizes = [8, 128], strides = [1, 1]} : vector<8x384xf32> to vector<8x128xf32>
    %608 = vector.extract_strided_slice %598 {offsets = [0, 128], sizes = [8, 128], strides = [1, 1]} : vector<8x256xf32> to vector<8x128xf32>
    %609 = arith.addf %607, %608 : vector<8x128xf32>
    %610 = arith.negf %609 : vector<8x128xf32>
    %611 = math.exp %610 : vector<8x128xf32>
    %cst_294 = arith.constant 1.000000e+00 : f32
    %612 = vector.broadcast %cst_294 : f32 to vector<8x128xf32>
    %613 = arith.addf %612, %611 : vector<8x128xf32>
    %614 = arith.divf %612, %613 : vector<8x128xf32>
    %615 = vector.extract_strided_slice %593 {offsets = [0, 256], sizes = [8, 128], strides = [1, 1]} : vector<8x384xf32> to vector<8x128xf32>
    %616 = arith.mulf %614, %550 : vector<8x128xf32>
    %cst_295 = arith.constant dense<0.000000e+00> : vector<8x128xf32>
    %617 = tpu.matmul %616, %597, %cst_295 {dimension_numbers = #tpu.dot_dimension_numbers<[1], [0], [0], [1], [0, 0, 1, 1], [], []>} : vector<8x128xf32>, vector<128x128xf32>, vector<8x128xf32> -> vector<8x128xf32>
    %618 = arith.addf %615, %617 : vector<8x128xf32>
    %619 = math.tanh %618 : vector<8x128xf32>
    %620 = arith.mulf %606, %550 : vector<8x128xf32>
    %cst_296 = arith.constant 1.000000e+00 : f32
    %621 = vector.broadcast %cst_296 : f32 to vector<8x128xf32>
    %622 = arith.subf %621, %606 : vector<8x128xf32>
    %623 = arith.mulf %622, %619 : vector<8x128xf32>
    %624 = arith.addf %620, %623 : vector<8x128xf32>
    %cst_297 = arith.constant -5.000000e-01 : f32
    %cst_298 = arith.constant 5.000000e-01 : f32
    %625 = vector.broadcast %cst_297 : f32 to vector<8x128xf32>
    %626 = arith.maximumf %625, %624 : vector<8x128xf32>
    %627 = vector.broadcast %cst_298 : f32 to vector<8x128xf32>
    %628 = arith.minimumf %627, %626 : vector<8x128xf32>
    %629 = vector.shape_cast %628 : vector<8x128xf32> to vector<1x8x128xf32>
    %c0_299 = arith.constant 0 : index
    %c0_300 = arith.constant 0 : index
    %c0_301 = arith.constant 0 : index
    %630 = vector.load %arg7[%c0_299, %c0_300, %c0_301] : memref<8x8x128xf32, #tpu.memory_space<vmem>>, vector<1x8x128xf32>
    tpu.vector_store %arg7[%c0_299, %c0_300, %c0_301], %629 {strides = array<i32>} : memref<8x8x128xf32, #tpu.memory_space<vmem>>, vector<1x8x128xf32>,
    %631 = vector.shape_cast %589 : vector<8x128xf32> to vector<1x8x128xf32>
    %c0_302 = arith.constant 0 : index
    %c0_303 = arith.constant 0 : index
    %c0_304 = arith.constant 0 : index
    %632 = vector.load %arg9[%c0_302, %c0_303, %c0_304] : memref<2x8x128xf32, #tpu.memory_space<vmem>>, vector<1x8x128xf32>
    tpu.vector_store %arg9[%c0_302, %c0_303, %c0_304], %631 {strides = array<i32>} : memref<2x8x128xf32, #tpu.memory_space<vmem>>, vector<1x8x128xf32>,
    %633 = vector.shape_cast %628 : vector<8x128xf32> to vector<1x8x128xf32>
    %c1_305 = arith.constant 1 : index
    %c0_306 = arith.constant 0 : index
    %c0_307 = arith.constant 0 : index
    %634 = vector.load %arg9[%c1_305, %c0_306, %c0_307] : memref<2x8x128xf32, #tpu.memory_space<vmem>>, vector<1x8x128xf32>
    tpu.vector_store %arg9[%c1_305, %c0_306, %c0_307], %633 {strides = array<i32>} : memref<2x8x128xf32, #tpu.memory_space<vmem>>, vector<1x8x128xf32>,
    %c0_i32_308 = arith.constant 0 : i32
    %635 = arith.cmpi eq, %arg0, %c0_i32_308 : i32
    %636 = arith.extui %635 : i1 to i32
    %c0_i32_309 = arith.constant 0 : i32
    %637 = arith.cmpi ne, %636, %c0_i32_309 : i32
    scf.if %637 {
      %638 = vector.shape_cast %589 : vector<8x128xf32> to vector<1x8x128xf32>
      %c0_310 = arith.constant 0 : index
      %c0_311 = arith.constant 0 : index
      %c0_312 = arith.constant 0 : index
      %639 = vector.load %arg8[%c0_310, %c0_311, %c0_312] : memref<2x8x128xf32, #tpu.memory_space<vmem>>, vector<1x8x128xf32>
      tpu.vector_store %arg8[%c0_310, %c0_311, %c0_312], %638 {strides = array<i32>} : memref<2x8x128xf32, #tpu.memory_space<vmem>>, vector<1x8x128xf32>,
      %640 = vector.shape_cast %628 : vector<8x128xf32> to vector<1x8x128xf32>
      %c1_313 = arith.constant 1 : index
      %c0_314 = arith.constant 0 : index
      %c0_315 = arith.constant 0 : index
      %641 = vector.load %arg8[%c1_313, %c0_314, %c0_315] : memref<2x8x128xf32, #tpu.memory_space<vmem>>, vector<1x8x128xf32>
      tpu.vector_store %arg8[%c1_313, %c0_314, %c0_315], %640 {strides = array<i32>} : memref<2x8x128xf32, #tpu.memory_space<vmem>>, vector<1x8x128xf32>,
    } else {
    }
    return
  }
  func.func @transform_0(%arg0: i32) -> (i32, i32, i32) {
    %c0_i32 = arith.constant 0 : i32
    %c0_i32_0 = arith.constant 0 : i32
    %c0_i32_1 = arith.constant 0 : i32
    return %arg0, %c0_i32, %c0_i32_0 : i32, i32, i32
  }
  func.func @transform_1(%arg0: i32) -> (i32, i32, i32) {
    %c0_i32 = arith.constant 0 : i32
    %0 = arith.subi %c0_i32, %arg0 : i32
    %c0_i32_0 = arith.constant 0 : i32
    %c0_i32_1 = arith.constant 0 : i32
    %c0_i32_2 = arith.constant 0 : i32
    return %0, %c0_i32_0, %c0_i32_1 : i32, i32, i32
  }
  func.func @transform_2(%arg0: i32) -> (i32, i32, i32) {
    %c0_i32 = arith.constant 0 : i32
    %c0_i32_0 = arith.constant 0 : i32
    %c0_i32_1 = arith.constant 0 : i32
    %c0_i32_2 = arith.constant 0 : i32
    return %c0_i32, %c0_i32_0, %c0_i32_1 : i32, i32, i32
  }
  func.func @transform_3(%arg0: i32) -> (i32, i32, i32) {
    %c0_i32 = arith.constant 0 : i32
    %c0_i32_0 = arith.constant 0 : i32
    %c0_i32_1 = arith.constant 0 : i32
    %c0_i32_2 = arith.constant 0 : i32
    return %c0_i32, %c0_i32_0, %c0_i32_1 : i32, i32, i32
  }
  func.func @transform_4(%arg0: i32) -> (i32, i32, i32) {
    %c0_i32 = arith.constant 0 : i32
    %c0_i32_0 = arith.constant 0 : i32
    %c0_i32_1 = arith.constant 0 : i32
    %c0_i32_2 = arith.constant 0 : i32
    return %c0_i32, %c0_i32_0, %c0_i32_1 : i32, i32, i32
  }
  func.func @transform_5(%arg0: i32) -> (i32, i32, i32) {
    %c0_i32 = arith.constant 0 : i32
    %c0_i32_0 = arith.constant 0 : i32
    %c0_i32_1 = arith.constant 0 : i32
    return %arg0, %c0_i32, %c0_i32_0 : i32, i32, i32
  }
  func.func @transform_6(%arg0: i32) -> (i32, i32, i32) {
    %c0_i32 = arith.constant 0 : i32
    %0 = arith.subi %c0_i32, %arg0 : i32
    %c0_i32_0 = arith.constant 0 : i32
    %c0_i32_1 = arith.constant 0 : i32
    %c0_i32_2 = arith.constant 0 : i32
    return %0, %c0_i32_0, %c0_i32_1 : i32, i32, i32
  }
  func.func @transform_7(%arg0: i32) -> (i32, i32, i32) {
    %c0_i32 = arith.constant 0 : i32
    %c0_i32_0 = arith.constant 0 : i32
    %c0_i32_1 = arith.constant 0 : i32
    %c0_i32_2 = arith.constant 0 : i32
    return %c0_i32, %c0_i32_0, %c0_i32_1 : i32, i32, i32
  }
}

</mosaic_0001>

<bundles_post_ra>
// kernel: tpu_custom_call.1
= control target key start
LH: loop header
LB: loop body
LE: loop exit
PB: predicated region body
PF: predicated region fallthrough
CT: control target
= control target key end

     0   :  { %13 = vsyncpa [#allocation4], 0  ;;  %s7079_s0 = inlined_call_operand.hbm [shape: f32[8,8,384], index: 0, kind: input, shape index: {}]   ;;  %s7080_s1 = inlined_call_operand.hbm [shape: f32[8,8,384], index: 1, kind: input, shape index: {}]   ;;  %s7081_s2 = inlined_call_operand.hbm [shape: f32[2,8,128], index: 2, kind: input, shape index: {}]   ;;  %s7082_s3 = inlined_call_operand.hbm [shape: f32[2,128,256], index: 3, kind: input, shape index: {}]   ;;  %s7083_s4 = inlined_call_operand.hbm [shape: f32[2,128,128], index: 4, kind: input, shape index: {}]   ;;  %s7084_s5 = inlined_call_operand.hbm [shape: f32[8,8,128], index: 5, kind: output, shape index: {0}]   ;;  %s7085_s6 = inlined_call_operand.hbm [shape: f32[8,8,128], index: 6, kind: output, shape index: {1}]   ;;  %s7086_s7 = inlined_call_operand.hbm [shape: f32[2,8,128], index: 7, kind: output, shape index: {2}]  }
   0x1   :  { %14 = vsyncpa [#allocation7], 0 }
   0x2   :  { %15 = vsyncpa [#allocation10], 0 }
   0x3   :  { %16 = vsyncpa [#allocation5], 0 }
   0x4   :  { %17 = vsyncpa [#allocation14], 0  ;;  %s5804_s24 = smov [#allocation6]   ;;  %s5805_s26 = smov [#allocation9]  }
   0x5   :  { %s40_s25 = sshll.u32 %s5804_s24, 4  ;;  %s64_s27 = sshll.u32 %s5805_s26, 4  ;;  %s41_s25 = int_to_ptr.vmem [resolvable:$true] %s40_s25  ;;  %s5861_s27 = int_to_ptr.vmem [resolvable:$true] %s64_s27 }
   0x6   :  { %s5618_s30 = scalar_lea.hbm %s7080_s1, 3072 }
   0x7   :  { %p5619_p0 = scmp.ne.s32.totalorder %s7080_s1, %s5618_s30  ;;  %p5622_p1 = scmp.lt.u32.totalorder %s5618_s30, %s7080_s1 }
   0x9   :  { %p5624_p2 = pnand %p5622_p1, %p5619_p0 }
   0xb   :  { %5627 = shalt.err (!%p5624_p2)
}
   0xc   :  { %s5628_s12 = scalar_lea.vmem %s41_s25, 3072  ;;  %p5633_p4 = scmp.lt.s32.totalorder %s41_s25, %s41_s25 }
   0xd   :  { %p5629_p3 = scmp.ne.s32.totalorder %s41_s25, %s5628_s12  ;;  %p5634_p5 = scmp.lt.s32.totalorder %s5628_s12, %s5628_s12 }
   0xf   :  { %p5635_p6 = por %p5634_p5, %p5633_p4 }
  0x11   :  { %p5636_p7 = pnand %p5635_p6, %p5629_p3 }
  0x13   :  { %5639 = shalt.err (!%p5636_p7)
}
  0x14   :  { %s5806_s13 = smov 384   ;;  %s5807_s14 = smov 24  }
  0x15   :  { %46 = dma.hbm_to_vmem [thread:$0]  %s7080_s1, 3072, %s41_s25, [#allocation7], %s5806_s13, %s5806_s13, %s5807_s14  }
  0x16   :  { %s5640_s19 = scalar_lea.hbm %s7082_s3, 8192 }
  0x17   :  { %p5641_p8 = scmp.ne.s32.totalorder %s7082_s3, %s5640_s19  ;;  %p5644_p9 = scmp.lt.u32.totalorder %s5640_s19, %s7082_s3 }
  0x19   :  { %p5646_p10 = pnand %p5644_p9, %p5641_p8 }
  0x1b   :  { %5649 = shalt.err (!%p5646_p10)
}
  0x1c   :  { %s5650_s24 = scalar_lea.vmem %s5861_s27, 8192  ;;  %p5655_p12 = scmp.lt.s32.totalorder %s5861_s27, %s5861_s27 }
  0x1d   :  { %p5651_p11 = scmp.ne.s32.totalorder %s5861_s27, %s5650_s24  ;;  %p5656_p13 = scmp.lt.s32.totalorder %s5650_s24, %s5650_s24 }
  0x1f   :  { %p5657_p0 = por %p5656_p13, %p5655_p12 }
  0x21   :  { %p5658_p1 = pnand %p5657_p0, %p5651_p11 }
  0x23   :  { %5661 = shalt.err (!%p5658_p1)
}
  0x24   :  { %s5808_s1 = smov 256   ;;  %s5809_s25 = smov 16  }
  0x25   :  { %70 = dma.hbm_to_vmem [thread:$0]  %s7082_s3, 8192, %s5861_s27, [#allocation10], %s5808_s1, %s5808_s1, %s5809_s25  }
  0x26   :  { %s5810_s29 = smov [#allocation3]   ;;  %s5811_s8 = smov [#allocation8]  }
  0x27   :  { %s23_s30 = sshll.u32 %s5810_s29, 4  ;;  %s52_s9 = sshll.u32 %s5811_s8, 4  ;;  %s24_s30 = int_to_ptr.vmem [resolvable:$true] %s23_s30  ;;  %s5895_s9 = int_to_ptr.vmem [resolvable:$true] %s52_s9 }
  0x28   :  { %s5662_s12 = scalar_lea.hbm %s7079_s0, 3072 }
  0x29   :  { %p5663_p2 = scmp.ne.s32.totalorder %s7079_s0, %s5662_s12  ;;  %p5666_p3 = scmp.lt.u32.totalorder %s5662_s12, %s7079_s0 }
  0x2b   :  { %p5668_p4 = pnand %p5666_p3, %p5663_p2 }
  0x2d   :  { %5671 = shalt.err (!%p5668_p4)
}
  0x2e   :  { %s5672_s3 = scalar_lea.vmem %s24_s30, 3072  ;;  %p5677_p6 = scmp.lt.s32.totalorder %s24_s30, %s24_s30 }
  0x2f   :  { %p5673_p5 = scmp.ne.s32.totalorder %s24_s30, %s5672_s3  ;;  %p5678_p7 = scmp.lt.s32.totalorder %s5672_s3, %s5672_s3 }
  0x31   :  { %p5679_p8 = por %p5678_p7, %p5677_p6 }
  0x33   :  { %p5680_p9 = pnand %p5679_p8, %p5673_p5 }
  0x35   :  { %5683 = shalt.err (!%p5680_p9)
}
  0x36   :  { %29 = dma.hbm_to_vmem [thread:$0]  %s7079_s0, 3072, %s24_s30, [#allocation4], %s5806_s13, %s5806_s13, %s5807_s14  }
  0x37   :  { %s5684_s22 = scalar_lea.hbm %s7081_s2, 256 }
  0x38   :  { %p5685_p10 = scmp.ne.s32.totalorder %s7081_s2, %s5684_s22  ;;  %p5688_p11 = scmp.lt.u32.totalorder %s5684_s22, %s7081_s2 }
  0x3a   :  { %p5690_p12 = pnand %p5688_p11, %p5685_p10 }
  0x3c   :  { %5693 = shalt.err (!%p5690_p12)
}
  0x3d   :  { %s5694_s26 = scalar_lea.vmem %s5895_s9, 256  ;;  %p5699_p0 = scmp.lt.s32.totalorder %s5895_s9, %s5895_s9 }
  0x3e   :  { %p5695_p13 = scmp.ne.s32.totalorder %s5895_s9, %s5694_s26  ;;  %p5700_p1 = scmp.lt.s32.totalorder %s5694_s26, %s5694_s26 }
  0x40   :  { %p5701_p2 = por %p5700_p1, %p5699_p0 }
  0x42   :  { %p5702_p3 = pnand %p5701_p2, %p5695_p13 }
  0x44   :  { %5705 = shalt.err (!%p5702_p3)
}
  0x45   :  { %s5812_s0 = smov 128   ;;  %s5813_s13 = smov 8  }
  0x46   :  { %58 = dma.hbm_to_vmem [thread:$0]  %s7081_s2, 256, %s5895_s9, [#allocation7], %s5812_s0, %s5812_s0, %s5813_s13  }
  0x47   :  { %s5814_s29 = smov [#allocation11]   ;;  %s5706_s11 = scalar_lea.hbm %s7083_s4, 4096 }
  0x48   :  { %s76_s30 = sshll.u32 %s5814_s29, 4  ;;  %p5707_p4 = scmp.ne.s32.totalorder %s7083_s4, %s5706_s11  ;;  %s77_s30 = int_to_ptr.vmem [resolvable:$true] %s76_s30 }
  0x49   :  { %p5710_p5 = scmp.lt.u32.totalorder %s5706_s11, %s7083_s4 }
  0x4b   :  { %p5712_p6 = pnand %p5710_p5, %p5707_p4 }
  0x4d   :  { %5715 = shalt.err (!%p5712_p6)
}
  0x4e   :  { %s5716_s18 = scalar_lea.vmem %s77_s30, 4096  ;;  %p5721_p8 = scmp.lt.s32.totalorder %s77_s30, %s77_s30 }
  0x4f   :  { %p5717_p7 = scmp.ne.s32.totalorder %s77_s30, %s5716_s18  ;;  %p5722_p9 = scmp.lt.s32.totalorder %s5716_s18, %s5716_s18 }
  0x51   :  { %p5723_p10 = por %p5722_p9, %p5721_p8 }
  0x53   :  { %p5724_p11 = pnand %p5723_p10, %p5717_p7 }
  0x55   :  { %5727 = shalt.err (!%p5724_p11)
}
  0x56   :  { %82 = dma.hbm_to_vmem [thread:$0]  %s7083_s4, 4096, %s77_s30, [#allocation10], %s5812_s0, %s5812_s0, %s5813_s13  }
  0x57   :  { %5794 = dma.done.wait [#allocation4], 3072  }
  0x58   :  { %5795 = vsyncadd [#allocation4], 4294964224 }
  0x59   :  { %5796 = dma.done.wait [#allocation7], 3328  }
  0x5a   :  { %5797 = vsyncadd [#allocation7], 4294963968 }
  0x5b   :  { %5798 = dma.done.wait [#allocation10], 12288  }
  0x5c   :  { %5799 = vsyncadd [#allocation10], 4294955008  ;;  %v5815_v0 = vmov 0.0   ;;  %v117_v1 = vld [vmem:[#allocation9 + $0x8] sm:$0xff]  ;;  %v119_v2 = vld [vmem:[#allocation9 + $0x18] sm:$0xff]  ;;  %vm5817_vm0 = vmmov 0  }
  0x5d   :  { %228 = vmatprep.mubr.f32.mxu0 %v5815_v0  ;;  %v116_v3 = vld [vmem:[#allocation9] sm:$0xff]  ;;  %v5948_v4 = vpack.c.bf16 %v119_v2, %v117_v1  ;;  %v118_v5 = vld [vmem:[#allocation9 + $0x10] sm:$0xff]  ;;  %v121_v6 = vld [vmem:[#allocation9 + $0x28] sm:$0xff]  ;;  %4017 = vmatprep.mubr.msk.f32.mxu1 %vm5817_vm0, %v5815_v0  ;;  %s5818_s4 = smov [#allocation12]  }
  0x5e   :  { %v123_v7 = vld [vmem:[#allocation9 + $0x38] sm:$0xff]  ;;  %v5950_v8 = vpack.c.bf16 %v118_v5, %v116_v3  ;;  %v120_v10 = vld [vmem:[#allocation9 + $0x20] sm:$0xff]  ;;  %v122_v11 = vld [vmem:[#allocation9 + $0x30] sm:$0xff]  ;;  %s3612_s3 = sshll.u32 %s5818_s4, 4  ;;  %s3613_s3 = int_to_ptr.vmem [resolvable:$true] %s3612_s3 }
  0x5f   :  { %v5952_v9 = vpack.c.bf16 %v123_v7, %v121_v6  ;;  %v125_v12 = vld [vmem:[#allocation9 + $0x48] sm:$0xff]  ;;  %4546 = vmatprep.subr.bf16.mxu0 %v5948_v4  ;;  %v127_v13 = vld [vmem:[#allocation9 + $0x58] sm:$0xff]  ;;  %v5956_v14 = vpack.c.bf16 %v122_v11, %v120_v10  ;;  %v124_v16 = vld [vmem:[#allocation9 + $0x40] sm:$0xff]  ;;  %s5728_s27 = scalar_lea.vmem %s3613_s3, 1024  ;;  %p5733_p13 = scmp.lt.s32.totalorder %s3613_s3, %s3613_s3 }
  0x60   :  { %4548 = vmatpush1.bf16.msra.mxu0 %v5950_v8  ;;  %v5959_v15 = vpack.c.bf16 %v127_v13, %v125_v12  ;;  %v126_v17 = vld [vmem:[#allocation9 + $0x50] sm:$0xff]  ;;  %v129_v18 = vld [vmem:[#allocation9 + $0x68] sm:$0xff]  ;;  %v131_v19 = vld [vmem:[#allocation9 + $0x78] sm:$0xff]  ;;  %p5729_p12 = scmp.ne.s32.totalorder %s3613_s3, %s5728_s27  ;;  %p5734_p0 = scmp.lt.s32.totalorder %s5728_s27, %s5728_s27 }
  0x61   :  { %4550 = vmatprep.subr.bf16.mxu0 %v5952_v9  ;;  %v5962_v20 = vpack.c.bf16 %v126_v17, %v124_v16  ;;  %v5965_v21 = vpack.c.bf16 %v131_v19, %v129_v18  ;;  %v128_v22 = vld [vmem:[#allocation9 + $0x60] sm:$0xff]  ;;  %v130_v23 = vld [vmem:[#allocation9 + $0x70] sm:$0xff]  ;;  %v133_v24 = vld [vmem:[#allocation9 + $0x88] sm:$0xff] }
  0x62   :  { %v135_v25 = vld [vmem:[#allocation9 + $0x98] sm:$0xff]  ;;  %v5968_v26 = vpack.c.bf16 %v130_v23, %v128_v22  ;;  %v132_v28 = vld [vmem:[#allocation9 + $0x80] sm:$0xff]  ;;  %v134_v29 = vld [vmem:[#allocation9 + $0x90] sm:$0xff]  ;;  %p5735_p1 = por %p5734_p0, %p5733_p13 }
  0x63   :  { %v5971_v27 = vpack.c.bf16 %v135_v25, %v133_v24  ;;  %v137_v30 = vld [vmem:[#allocation9 + $0xa8] sm:$0xff]  ;;  %v139_v31 = vld [vmem:[#allocation9 + $0xb8] sm:$0xff]  ;;  %v5974_v32 = vpack.c.bf16 %v134_v29, %v132_v28  ;;  %v136_v34 = vld [vmem:[#allocation9 + $0xa0] sm:$0xff] }
  0x64   :  { %4552 = vmatpush1.bf16.msra.mxu0 %v5956_v14  ;;  %v5977_v33 = vpack.c.bf16 %v139_v31, %v137_v30  ;;  %v138_v35 = vld [vmem:[#allocation9 + $0xb0] sm:$0xff]  ;;  %v141_v36 = vld [vmem:[#allocation9 + $0xc8] sm:$0xff]  ;;  %v143_v37 = vld [vmem:[#allocation9 + $0xd8] sm:$0xff]  ;;  %p5736_p2 = pnand %p5735_p1, %p5729_p12 }
  0x65   :  { %4554 = vmatprep.subr.bf16.mxu0 %v5959_v15  ;;  %v5980_v38 = vpack.c.bf16 %v138_v35, %v136_v34  ;;  %v5983_v39 = vpack.c.bf16 %v143_v37, %v141_v36  ;;  %v140_v40 = vld [vmem:[#allocation9 + $0xc0] sm:$0xff]  ;;  %v142_v41 = vld [vmem:[#allocation9 + $0xd0] sm:$0xff]  ;;  %v145_v42 = vld [vmem:[#allocation9 + $0xe8] sm:$0xff] }
  0x66   :  { %v147_v43 = vld [vmem:[#allocation9 + $0xf8] sm:$0xff]  ;;  %v5986_v44 = vpack.c.bf16 %v142_v41, %v140_v40  ;;  %v144_v46 = vld [vmem:[#allocation9 + $0xe0] sm:$0xff]  ;;  %v146_v47 = vld [vmem:[#allocation9 + $0xf0] sm:$0xff] }
  0x67   :  { %v5989_v45 = vpack.c.bf16 %v147_v43, %v145_v42  ;;  %v335_v48 = vld [vmem:[#allocation9 + $0x108] sm:$0xff]  ;;  %v337_v49 = vld [vmem:[#allocation9 + $0x118] sm:$0xff]  ;;  %v5992_v50 = vpack.c.bf16 %v146_v47, %v144_v46  ;;  %v334_v52 = vld [vmem:[#allocation9 + $0x100] sm:$0xff] }
  0x68   :  { %4556 = vmatpush1.bf16.msra.mxu0 %v5962_v20  ;;  %v5995_v51 = vpack.c.bf16 %v337_v49, %v335_v48  ;;  %v336_v53 = vld [vmem:[#allocation9 + $0x110] sm:$0xff]  ;;  %v339_v54 = vld [vmem:[#allocation9 + $0x128] sm:$0xff]  ;;  %v341_v55 = vld [vmem:[#allocation9 + $0x138] sm:$0xff] }
  0x69   :  { %4558 = vmatprep.subr.bf16.mxu0 %v5965_v21  ;;  %v5998_v56 = vld [vmem:[#allocation8] sm:$0xff]  ;;  %v6000_v57 = vpack.c.bf16 %v336_v53, %v334_v52  ;;  %v6003_v58 = vpack.c.bf16 %v341_v55, %v339_v54  ;;  %v338_v59 = vld [vmem:[#allocation9 + $0x120] sm:$0xff]  ;;  %v343_v61 = vld [vmem:[#allocation9 + $0x148] sm:$0xff] }
  0x6a   :  { %v340_v60 = vld [vmem:[#allocation9 + $0x130] sm:$0xff]  ;;  %v345_v62 = vld [vmem:[#allocation9 + $0x158] sm:$0xff]  ;;  %v342_v2 = vld [vmem:[#allocation9 + $0x140] sm:$0xff] }
  0x6b   :  { %v6007_v63 = vpack.c.bf16 %v340_v60, %v338_v59  ;;  %v6011_v1 = vpack.c.bf16 %v345_v62, %v343_v61  ;;  %v344_v3 = vld [vmem:[#allocation9 + $0x150] sm:$0xff]  ;;  %v347_v5 = vld [vmem:[#allocation9 + $0x168] sm:$0xff]  ;;  %v349_v6 = vld [vmem:[#allocation9 + $0x178] sm:$0xff] }
  0x6c   :  { %4560 = vmatpush1.bf16.msra.mxu0 %v5968_v26  ;;  %v6014_v7 = vpack.c.bf16 %v344_v3, %v342_v2  ;;  %v6017_v10 = vpack.c.bf16 %v349_v6, %v347_v5  ;;  %v346_v11 = vld [vmem:[#allocation9 + $0x160] sm:$0xff]  ;;  %v348_v12 = vld [vmem:[#allocation9 + $0x170] sm:$0xff]  ;;  %v351_v13 = vld [vmem:[#allocation9 + $0x188] sm:$0xff] }
  0x6d   :  { %4562 = vmatprep.subr.bf16.mxu0 %v5971_v27  ;;  %v353_v16 = vld [vmem:[#allocation9 + $0x198] sm:$0xff]  ;;  %v6020_v17 = vpack.c.bf16 %v348_v12, %v346_v11  ;;  %v350_v19 = vld [vmem:[#allocation9 + $0x180] sm:$0xff]  ;;  %v352_v22 = vld [vmem:[#allocation9 + $0x190] sm:$0xff] }
  0x6e   :  { %v6023_v18 = vpack.c.bf16 %v353_v16, %v351_v13  ;;  %v355_v23 = vld [vmem:[#allocation9 + $0x1a8] sm:$0xff]  ;;  %v357_v24 = vld [vmem:[#allocation9 + $0x1b8] sm:$0xff]  ;;  %v6026_v25 = vpack.c.bf16 %v352_v22, %v350_v19  ;;  %v354_v29 = vld [vmem:[#allocation9 + $0x1a0] sm:$0xff] }
  0x6f   :  { %v6029_v28 = vpack.c.bf16 %v357_v24, %v355_v23  ;;  %v356_v30 = vld [vmem:[#allocation9 + $0x1b0] sm:$0xff]  ;;  %v359_v31 = vld [vmem:[#allocation9 + $0x1c8] sm:$0xff]  ;;  %v361_v34 = vld [vmem:[#allocation9 + $0x1d8] sm:$0xff] }
  0x70   :  { %4564 = vmatpush1.bf16.msra.mxu0 %v5974_v32  ;;  %v6032_v35 = vpack.c.bf16 %v356_v30, %v354_v29  ;;  %v6035_v36 = vpack.c.bf16 %v361_v34, %v359_v31  ;;  %v358_v37 = vld [vmem:[#allocation9 + $0x1c0] sm:$0xff]  ;;  %v360_v40 = vld [vmem:[#allocation9 + $0x1d0] sm:$0xff]  ;;  %v363_v41 = vld [vmem:[#allocation9 + $0x1e8] sm:$0xff] }
  0x71   :  { %4566 = vmatprep.subr.bf16.mxu0 %v5977_v33  ;;  %v365_v42 = vld [vmem:[#allocation9 + $0x1f8] sm:$0xff]  ;;  %v6038_v43 = vpack.c.bf16 %v360_v40, %v358_v37  ;;  %v362_v47 = vld [vmem:[#allocation9 + $0x1e0] sm:$0xff]  ;;  %v364_v48 = vld [vmem:[#allocation9 + $0x1f0] sm:$0xff] }
  0x72   :  { %v6041_v46 = vpack.c.bf16 %v365_v42, %v363_v41  ;;  %v6044_v49 = vpack.c.bf16 %v364_v48, %v362_v47  ;;  %v6048_v52 = vld [vmem:[#allocation8 + $0x8] sm:$0xff]  ;;  %v160_v55 = vld [vmem:[#allocation11 + $0x60] sm:$0xff]  ;;  %v161_v59 = vld [vmem:[#allocation11 + $0x68] sm:$0xff] }
  0x73   :  { %v159_v53 = vld [vmem:[#allocation11 + $0x58] sm:$0xff]  ;;  %v6095_v60 = vpack.c.bf16 %v161_v59, %v160_v55  ;;  %v162_v61 = vld [vmem:[#allocation11 + $0x70] sm:$0xff]  ;;  %v367_v19 = vld [vmem:[#allocation11 + $0x80] sm:$0xff] }
  0x74   :  { %4568 = vmatpush1.bf16.msra.mxu0 %v5980_v38  ;;  %v163_v62 = vld [vmem:[#allocation11 + $0x78] sm:$0xff]  ;;  %v368_v22 = vld [vmem:[#allocation11 + $0x88] sm:$0xff]  ;;  %v369_v30 = vld [vmem:[#allocation11 + $0x90] sm:$0xff] }
  0x75   :  { %4570 = vmatprep.subr.bf16.mxu0 %v5983_v39  ;;  %v6099_v2 = vpack.c.bf16 %v163_v62, %v162_v61  ;;  %v114_v3 = vld [vmem:[#allocation3 + $0x8] sm:$0xff]  ;;  %v6106_v24 = vpack.c.bf16 %v368_v22, %v367_v19  ;;  %v331_v34 = vld [vmem:[#allocation6 + $0xb0] sm:$0xff]  ;;  %v372_v48 = vld [vmem:[#allocation11 + $0xa8] sm:$0xff] }
  0x76   :  { %v370_v31 = vld [vmem:[#allocation11 + $0x98] sm:$0xff]  ;;  %v371_v47 = vld [vmem:[#allocation11 + $0xa0] sm:$0xff]  ;;  %v380_v61 = vld [vmem:[#allocation11 + $0xe8] sm:$0xff] }
  0x77   :  { %v6112_v41 = vpack.c.bf16 %v370_v31, %v369_v30  ;;  %v379_v59 = vld [vmem:[#allocation11 + $0xe0] sm:$0xff] }
  0x78   :  { %4572 = vmatpush1.bf16.msra.mxu0 %v5986_v44  ;;  %v6134_v62 = vpack.c.bf16 %v380_v61, %v379_v59  ;;  %v999_v59 = vld [vmem:[#allocation9 + $0x50] sm:$0xff] }
  0x79   :  { %4574 = vmatprep.subr.bf16.mxu0 %v5989_v45 }
  0x7c   :  { %4576 = vmatpush1.bf16.msra.mxu0 %v5992_v50 }
  0x7d   :  { %4602 = vmatprep.subr.bf16.mxu0 %v5995_v51 }
  0x7f   :  { %229 = vmatmul.mubr.f32.vlgmr.msra.gmra.mrb[0].mxu0 %v5998_v56 }
  0x80   :  { %4604 = vmatpush1.bf16.msra.mxu0 %v6000_v57  ;;  %447 = vmatprep.mubr.f32.mxu0 %v5815_v0 }
  0x81   :  { %4606 = vmatprep.subr.bf16.mxu0 %v6003_v58 }
  0x84   :  { %4608 = vmatpush1.bf16.msra.mxu0 %v6007_v63 }
  0x85   :  { %4610 = vmatprep.subr.bf16.mxu0 %v6011_v1 }
  0x88   :  { %4612 = vmatpush1.bf16.msra.mxu0 %v6014_v7 }
  0x89   :  { %4614 = vmatprep.subr.bf16.mxu0 %v6017_v10 }
  0x8c   :  { %4616 = vmatpush1.bf16.msra.mxu0 %v6020_v17 }
  0x8d   :  { %4618 = vmatprep.subr.bf16.mxu0 %v6023_v18 }
  0x90   :  { %4620 = vmatpush1.bf16.msra.mxu0 %v6026_v25 }
  0x91   :  { %4622 = vmatprep.subr.bf16.mxu0 %v6029_v28 }
  0x94   :  { %4624 = vmatpush1.bf16.msra.mxu0 %v6032_v35 }
  0x95   :  { %4626 = vmatprep.subr.bf16.mxu0 %v6035_v36 }
  0x98   :  { %4628 = vmatpush1.bf16.msra.mxu0 %v6038_v43 }
  0x99   :  { %4630 = vmatprep.subr.bf16.mxu0 %v6041_v46 }
  0x9c   :  { %4632 = vmatpush1.bf16.msra.mxu0 %v6044_v49 }
  0x9d   :  { %4658 = vmatprep.subr.bf16.mxu0 %v5948_v4  ;;  %v148_v4 = vld [vmem:[#allocation11] sm:$0xff] }
  0x9f   :  { %448 = vmatmul.mubr.f32.vlgmr.msra.gmra.mrb[2].mxu0 %v6048_v52 }
  0xa0   :  { %4660 = vmatpush1.bf16.msra.mxu0 %v5950_v8  ;;  %665 = vmatprep.mubr.f32.mxu0 %v5815_v0  ;;  %v149_v8 = vld [vmem:[#allocation11 + $0x8] sm:$0xff] }
  0xa1   :  { %4662 = vmatprep.subr.bf16.mxu0 %v5952_v9  ;;  %v6069_v9 = vpack.c.bf16 %v149_v8, %v148_v4  ;;  %v6118_v8 = vpack.c.bf16 %v372_v48, %v371_v47  ;;  %v332_v47 = vld [vmem:[#allocation6 + $0xb8] sm:$0xff] }
  0xa4   :  { %4664 = vmatpush1.bf16.msra.mxu0 %v5956_v14  ;;  %v5816_v14 = vmov 0.0|0.0  }
  0xa5   :  { %4666 = vmatprep.subr.bf16.mxu0 %v5959_v15  ;;  %4577 = vmatprep.subr.bf16.mxu1 %v5816_v14  ;;  %v150_v15 = vld [vmem:[#allocation11 + $0x10] sm:$0xff] }
  0xa6   :  { %4579 = vmatpush3.bf16.msra.mxu1 %v6069_v9 }
  0xa7   :  { %4580 = vmatprep.subr.bf16.mxu1 %v5816_v14 }
  0xa8   :  { %4668 = vmatpush1.bf16.msra.mxu0 %v5962_v20  ;;  %v151_v20 = vld [vmem:[#allocation11 + $0x18] sm:$0xff] }
  0xa9   :  { %4670 = vmatprep.subr.bf16.mxu0 %v5965_v21  ;;  %v6074_v21 = vpack.c.bf16 %v151_v20, %v150_v15  ;;  %v373_v15 = vld [vmem:[#allocation11 + $0xb0] sm:$0xff]  ;;  %v374_v20 = vld [vmem:[#allocation11 + $0xb8] sm:$0xff] }
  0xab   :  { %4582 = vmatpush3.bf16.msra.mxu1 %v6074_v21 }
  0xac   :  { %4672 = vmatpush1.bf16.msra.mxu0 %v5968_v26  ;;  %4583 = vmatprep.subr.bf16.mxu1 %v5816_v14  ;;  %v152_v26 = vld [vmem:[#allocation11 + $0x20] sm:$0xff] }
  0xad   :  { %4674 = vmatprep.subr.bf16.mxu0 %v5971_v27  ;;  %v153_v27 = vld [vmem:[#allocation11 + $0x28] sm:$0xff] }
  0xb0   :  { %4676 = vmatpush1.bf16.msra.mxu0 %v5974_v32  ;;  %v6078_v32 = vpack.c.bf16 %v153_v27, %v152_v26  ;;  %v6122_v26 = vpack.c.bf16 %v374_v20, %v373_v15  ;;  %v375_v27 = vld [vmem:[#allocation11 + $0xc0] sm:$0xff] }
  0xb1   :  { %4678 = vmatprep.subr.bf16.mxu0 %v5977_v33  ;;  %v154_v33 = vld [vmem:[#allocation11 + $0x30] sm:$0xff] }
  0xb2   :  { %4585 = vmatpush3.bf16.msra.mxu1 %v6078_v32 }
  0xb3   :  { %4586 = vmatprep.subr.bf16.mxu1 %v5816_v14 }
  0xb4   :  { %4680 = vmatpush1.bf16.msra.mxu0 %v5980_v38  ;;  %v155_v38 = vld [vmem:[#allocation11 + $0x38] sm:$0xff] }
  0xb5   :  { %4682 = vmatprep.subr.bf16.mxu0 %v5983_v39  ;;  %v6082_v39 = vpack.c.bf16 %v155_v38, %v154_v33  ;;  %v376_v33 = vld [vmem:[#allocation11 + $0xc8] sm:$0xff] }
  0xb6   :  { %v6126_v38 = vpack.c.bf16 %v376_v33, %v375_v27  ;;  %v995_v27 = vld [vmem:[#allocation9 + $0x30] sm:$0xff]  ;;  %v998_v33 = vld [vmem:[#allocation9 + $0x48] sm:$0xff] }
  0xb7   :  { %4588 = vmatpush3.bf16.msra.mxu1 %v6082_v39 }
  0xb8   :  { %4684 = vmatpush1.bf16.msra.mxu0 %v5986_v44  ;;  %4589 = vmatprep.subr.bf16.mxu1 %v5816_v14  ;;  %v156_v44 = vld [vmem:[#allocation11 + $0x40] sm:$0xff] }
  0xb9   :  { %4686 = vmatprep.subr.bf16.mxu0 %v5989_v45  ;;  %v157_v45 = vld [vmem:[#allocation11 + $0x48] sm:$0xff] }
  0xbc   :  { %4688 = vmatpush1.bf16.msra.mxu0 %v5992_v50  ;;  %v6086_v50 = vpack.c.bf16 %v157_v45, %v156_v44  ;;  %v377_v44 = vld [vmem:[#allocation11 + $0xd0] sm:$0xff]  ;;  %v378_v45 = vld [vmem:[#allocation11 + $0xd8] sm:$0xff] }
  0xbd   :  { %4714 = vmatprep.subr.bf16.mxu0 %v5995_v51  ;;  %v158_v51 = vld [vmem:[#allocation11 + $0x50] sm:$0xff]  ;;  %v6130_v55 = vpack.c.bf16 %v378_v45, %v377_v44  ;;  %v1000_v44 = vld [vmem:[#allocation9 + $0x58] sm:$0xff] }
  0xbe   :  { %4591 = vmatpush3.bf16.msra.mxu1 %v6086_v50  ;;  %v6090_v54 = vpack.c.bf16 %v159_v53, %v158_v51 }
  0xbf   :  { %4592 = vmatprep.subr.bf16.mxu1 %v5816_v14 }
  0xc2   :  { %4594 = vmatpush3.bf16.msra.mxu1 %v6090_v54 }
  0xc3   :  { %4595 = vmatprep.subr.bf16.mxu1 %v5816_v14 }
  0xc6   :  { %4597 = vmatpush3.bf16.msra.mxu1 %v6095_v60 }
  0xc7   :  { %4598 = vmatprep.subr.bf16.mxu1 %v5816_v14 }
  0xca   :  { %4600 = vmatpush3.bf16.msra.mxu1 %v6099_v2 }
  0xcb   :  { %4633 = vmatprep.subr.bf16.mxu1 %v5816_v14 }
 0x152   :  { %v6104_v5 = vpop.f32.mrb[0].mxu0 }
 0x153   :  { %v232_v6 = vpop.f32.mrb[1].mxu0 }
 0x154   :  { %v242_v11 = vadd.f32 %v232_v6, %v114_v3  ;;  %v381_v3 = vld [vmem:[#allocation11 + $0xf0] sm:$0xff]  ;;  %v382_v6 = vld [vmem:[#allocation11 + $0xf8] sm:$0xff] }
 0x156   :  { %v3666_v12 = vmul.f32 -1.442695, %v242_v11  ;;  %v6138_v11 = vpack.c.bf16 %v382_v6, %v381_v3  ;;  %v551_v3 = vld [vmem:[#allocation3 + $0x20] sm:$0xff] }
 0x158   :  { %5458 = vpow2.f32 %v3666_v12 }
 0x162   :  { %v5459_v13 = vpop.eup %5458 }
 0x163   :  { %v246_v16 = vadd.f32 1.0, %v5459_v13 }
 0x165   :  { %5460 = vrcp.f32 %v246_v16  ;;  %v115_v16 = vld [vmem:[#allocation3 + $0x10] sm:$0xff] }
 0x16f   :  { %v5461_v23 = vpop.eup %5460 }
 0x170   :  { %v249_v29 = vmul.f32 %v5461_v23, %v5998_v56  ;;  %v330_v23 = vld [vmem:[#allocation6 + $0xa8] sm:$0xff] }
 0x172   :  { %4018 = vmatmul.mubr.f32.vlgmr.msra.gmra.mrb[0].mxu1 %v249_v29  ;;  %v6109_v37 = vpop.f32.mrb[2].mxu0 }
 0x173   :  { %v451_v40 = vpop.f32.mrb[3].mxu0  ;;  %4635 = vmatpush3.bf16.msra.mxu1 %v6106_v24  ;;  %4052 = vmatprep.mubr.msk.f32.mxu1 %vm5817_vm0, %v5815_v0 }
 0x174   :  { %v461_v42 = vadd.f32 %v451_v40, %v331_v34  ;;  %4636 = vmatprep.subr.bf16.mxu1 %v5816_v14 }
 0x176   :  { %v3669_v4 = vmul.f32 -1.442695, %v461_v42 }
 0x177   :  { %4638 = vmatpush3.bf16.msra.mxu1 %v6112_v41 }
 0x178   :  { %5462 = vpow2.f32 %v3669_v4  ;;  %4639 = vmatprep.subr.bf16.mxu1 %v5816_v14 }
 0x17b   :  { %4641 = vmatpush3.bf16.msra.mxu1 %v6118_v8 }
 0x17c   :  { %4642 = vmatprep.subr.bf16.mxu1 %v5816_v14 }
 0x17f   :  { %4644 = vmatpush3.bf16.msra.mxu1 %v6122_v26 }
 0x180   :  { %4645 = vmatprep.subr.bf16.mxu1 %v5816_v14 }
 0x182   :  { %v5463_v51 = vpop.eup %5462 }
 0x183   :  { %v465_v53 = vadd.f32 1.0, %v5463_v51  ;;  %4647 = vmatpush3.bf16.msra.mxu1 %v6126_v38  ;;  %v6202_v51 = vpack.c.bf16 %v1000_v44, %v998_v33  ;;  %v550_v44 = vld [vmem:[#allocation3 + $0x18] sm:$0xff] }
 0x184   :  { %4648 = vmatprep.subr.bf16.mxu1 %v5816_v14 }
 0x185   :  { %5464 = vrcp.f32 %v465_v53  ;;  %v997_v53 = vld [vmem:[#allocation9 + $0x40] sm:$0xff] }
 0x186   :  { %v6205_v61 = vpack.c.bf16 %v999_v59, %v997_v53 }
 0x187   :  { %4650 = vmatpush3.bf16.msra.mxu1 %v6130_v55 }
 0x188   :  { %4651 = vmatprep.subr.bf16.mxu1 %v5816_v14 }
 0x18b   :  { %4653 = vmatpush3.bf16.msra.mxu1 %v6134_v62 }
 0x18c   :  { %4654 = vmatprep.subr.bf16.mxu1 %v5816_v14 }
 0x18f   :  { %v5465_v12 = vpop.eup %5464  ;;  %4656 = vmatpush3.bf16.msra.mxu1 %v6138_v11 }
 0x190   :  { %v468_v13 = vmul.f32 %v5465_v12, %v6048_v52  ;;  %4689 = vmatprep.subr.bf16.mxu1 %v5816_v14 }
 0x192   :  { %4053 = vmatmul.mubr.f32.vlgmr.msra.gmra.mrb[2].mxu1 %v468_v13 }
 0x193   :  { %4691 = vmatpush3.bf16.msra.mxu1 %v6069_v9  ;;  %4087 = vmatprep.mubr.msk.f32.mxu1 %vm5817_vm0, %v5815_v0  ;;  %v113_v9 = vld [vmem:[#allocation3] sm:$0xff] }
 0x194   :  { %4692 = vmatprep.subr.bf16.mxu1 %v5816_v14 }
 0x197   :  { %4694 = vmatpush3.bf16.msra.mxu1 %v6074_v21  ;;  %v235_v21 = vadd.f32 %v6104_v5, %v113_v9 }
 0x198   :  { %4695 = vmatprep.subr.bf16.mxu1 %v5816_v14 }
 0x19b   :  { %4697 = vmatpush3.bf16.msra.mxu1 %v6078_v32  ;;  %v3665_v32 = vmul.f32 -1.442695, %v235_v21 }
 0x19c   :  { %4698 = vmatprep.subr.bf16.mxu1 %v5816_v14 }
 0x19d   :  { %5466 = vpow2.f32 %v3665_v32 }
 0x19f   :  { %4700 = vmatpush3.bf16.msra.mxu1 %v6082_v39 }
 0x1a0   :  { %4701 = vmatprep.subr.bf16.mxu1 %v5816_v14 }
 0x1a3   :  { %4703 = vmatpush3.bf16.msra.mxu1 %v6086_v50 }
 0x1a4   :  { %4704 = vmatprep.subr.bf16.mxu1 %v5816_v14 }
 0x1a7   :  { %4706 = vmatpush3.bf16.msra.mxu1 %v6090_v54  ;;  %v5467_v39 = vpop.eup %5466 }
 0x1a8   :  { %4707 = vmatprep.subr.bf16.mxu1 %v5816_v14  ;;  %v239_v50 = vadd.f32 1.0, %v5467_v39 }
 0x1aa   :  { %5468 = vrcp.f32 %v239_v50 }
 0x1ab   :  { %4709 = vmatpush3.bf16.msra.mxu1 %v6095_v60  ;;  %v454_v60 = vadd.f32 %v6109_v37, %v330_v23 }
 0x1ac   :  { %4710 = vmatprep.subr.bf16.mxu1 %v5816_v14 }
 0x1af   :  { %4712 = vmatpush3.bf16.msra.mxu1 %v6099_v2  ;;  %v3668_v2 = vmul.f32 -1.442695, %v454_v60 }
 0x1b0   :  { %4745 = vmatprep.subr.bf16.mxu1 %v5816_v14 }
 0x1b4   :  { %v5469_v29 = vpop.eup %5468 }
 0x1b5   :  { %v323_v30 = vsub.f32 1.0, %v5469_v29  ;;  %v322_v5 = vmul.f32 %v5469_v29, %v5998_v56  ;;  %v1001_v29 = vld [vmem:[#allocation9 + $0x60] sm:$0xff] }
 0x245   :  { %v316_v54 = vpop.f32.mrb[0].mxu1 }
 0x246   :  { %v320_v19 = vadd.f32 %v316_v54, %v115_v16  ;;  %v4019_v22 = vpop.f32.mrb[1].mxu1  ;;  %v769_v16 = vld [vmem:[#allocation6 + $0x98] sm:$0xff] }
 0x248   :  { %5470 = vtanh.f32 %v320_v19 }
 0x249   :  { %5472 = vpow2.f32 %v3668_v2  ;;  %v1003_v2 = vld [vmem:[#allocation9 + $0x70] sm:$0xff] }
 0x252   :  { %v5471_v31 = vpop.eup %5470 }
 0x253   :  { %v324_v34 = vmul.f32 %v5471_v31, %v323_v30  ;;  %v5473_v37 = vpop.eup %5472  ;;  %v1008_v30 = vld [vmem:[#allocation9 + $0x98] sm:$0xff] }
 0x254   :  { %v458_v56 = vadd.f32 1.0, %v5473_v37  ;;  %v1010_v37 = vld [vmem:[#allocation9 + $0xa8] sm:$0xff] }
 0x255   :  { %v325_v40 = vadd.f32 %v324_v34, %v322_v5  ;;  %v1005_v5 = vld [vmem:[#allocation9 + $0x80] sm:$0xff]  ;;  %v1007_v34 = vld [vmem:[#allocation9 + $0x90] sm:$0xff] }
 0x256   :  { %5474 = vrcp.f32 %v458_v56  ;;  %v1012_v56 = vld [vmem:[#allocation9 + $0xb8] sm:$0xff] }
 0x257   :  { %v6165_v42 = vclamps-f32 %v325_v40, 0.5  ;;  %v6243_v40 = vpack.c.bf16 %v1007_v34, %v1005_v5  ;;  %v1216_v5 = vld [vmem:[#allocation9 + $0x148] sm:$0xff]  ;;  %v1218_v34 = vld [vmem:[#allocation9 + $0x158] sm:$0xff] }
 0x259   :  { %328 = vst [vmem:[#allocation12] sm:$0xff] %v6165_v42  ;;  %666 = vmatmul.mubr.f32.vlgmr.msra.gmra.mrb[4].mxu0 %v6165_v42 }
 0x25a   :  { %4716 = vmatpush1.bf16.msra.mxu0 %v6000_v57  ;;  %883 = vmatprep.mubr.f32.mxu0 %v5815_v0 }
 0x25b   :  { %4718 = vmatprep.subr.bf16.mxu0 %v6003_v58 }
 0x25e   :  { %4720 = vmatpush1.bf16.msra.mxu0 %v6007_v63 }
 0x25f   :  { %4722 = vmatprep.subr.bf16.mxu0 %v6011_v1 }
 0x260   :  { %v5475_v57 = vpop.eup %5474 }
 0x261   :  { %v542_v58 = vsub.f32 1.0, %v5475_v57  ;;  %v541_v1 = vmul.f32 %v5475_v57, %v6048_v52  ;;  %v1016_v57 = vld [vmem:[#allocation9 + $0xd8] sm:$0xff] }
 0x262   :  { %4724 = vmatpush1.bf16.msra.mxu0 %v6014_v7 }
 0x263   :  { %4726 = vmatprep.subr.bf16.mxu0 %v6017_v10 }
 0x265   :  { %v535_v48 = vpop.f32.mrb[2].mxu1 }
 0x266   :  { %v539_v4 = vadd.f32 %v535_v48, %v332_v47  ;;  %v4054_v15 = vpop.f32.mrb[3].mxu1  ;;  %4728 = vmatpush1.bf16.msra.mxu0 %v6020_v17  ;;  %v1009_v47 = vld [vmem:[#allocation9 + $0xa0] sm:$0xff]  ;;  %v6246_v48 = vpack.c.bf16 %v1012_v56, %v1010_v37  ;;  %v6284_v37 = vpack.c.bf16 %v1218_v34, %v1216_v5  ;;  %v1237_v34 = vld [vmem:[#allocation9 + $0x1f0] sm:$0xff] }
 0x267   :  { %4730 = vmatprep.subr.bf16.mxu0 %v6023_v18  ;;  %v990_v18 = vld [vmem:[#allocation9 + $0x8] sm:$0xff]  ;;  %v1215_v56 = vld [vmem:[#allocation9 + $0x140] sm:$0xff] }
 0x268   :  { %5476 = vtanh.f32 %v539_v4  ;;  %v1011_v4 = vld [vmem:[#allocation9 + $0xb0] sm:$0xff]  ;;  %v1014_v15 = vld [vmem:[#allocation9 + $0xc8] sm:$0xff]  ;;  %v1235_v5 = vld [vmem:[#allocation9 + $0x1e0] sm:$0xff] }
 0x26a   :  { %4732 = vmatpush1.bf16.msra.mxu0 %v6026_v25  ;;  %v992_v25 = vld [vmem:[#allocation9 + $0x18] sm:$0xff] }
 0x26b   :  { %4734 = vmatprep.subr.bf16.mxu0 %v6029_v28  ;;  %v989_v28 = vld [vmem:[#allocation9] sm:$0xff] }
 0x26e   :  { %4736 = vmatpush1.bf16.msra.mxu0 %v6032_v35  ;;  %v6191_v35 = vpack.c.bf16 %v992_v25, %v990_v18  ;;  %v1020_v18 = vld [vmem:[#allocation9 + $0xf8] sm:$0xff] }
 0x26f   :  { %4738 = vmatprep.subr.bf16.mxu0 %v6035_v36  ;;  %v991_v36 = vld [vmem:[#allocation9 + $0x10] sm:$0xff] }
 0x270   :  { %v6193_v52 = vpack.c.bf16 %v991_v36, %v989_v28  ;;  %v1017_v36 = vld [vmem:[#allocation9 + $0xe0] sm:$0xff] }
 0x272   :  { %v5477_v63 = vpop.eup %5476  ;;  %4740 = vmatpush1.bf16.msra.mxu0 %v6038_v43  ;;  %v994_v43 = vld [vmem:[#allocation9 + $0x28] sm:$0xff] }
 0x273   :  { %4742 = vmatprep.subr.bf16.mxu0 %v6041_v46  ;;  %v543_v7 = vmul.f32 %v5477_v63, %v542_v58  ;;  %v996_v46 = vld [vmem:[#allocation9 + $0x38] sm:$0xff]  ;;  %v6249_v58 = vpack.c.bf16 %v1011_v4, %v1009_v47  ;;  %v6252_v63 = vpack.c.bf16 %v1016_v57, %v1014_v15  ;;  %v1217_v47 = vld [vmem:[#allocation9 + $0x150] sm:$0xff]  ;;  %v1220_v4 = vld [vmem:[#allocation9 + $0x168] sm:$0xff] }
 0x274   :  { %v6195_v20 = vpack.c.bf16 %v996_v46, %v994_v43  ;;  %v1019_v43 = vld [vmem:[#allocation9 + $0xf0] sm:$0xff]  ;;  %v1222_v15 = vld [vmem:[#allocation9 + $0x178] sm:$0xff] }
 0x275   :  { %v544_v10 = vadd.f32 %v543_v7, %v541_v1  ;;  %v1013_v1 = vld [vmem:[#allocation9 + $0xc0] sm:$0xff]  ;;  %v1015_v7 = vld [vmem:[#allocation9 + $0xd0] sm:$0xff]  ;;  %v6261_v46 = vpack.c.bf16 %v1019_v43, %v1017_v36  ;;  %v1224_v43 = vld [vmem:[#allocation9 + $0x188] sm:$0xff] }
 0x276   :  { %4744 = vmatpush1.bf16.msra.mxu0 %v6044_v49  ;;  %v993_v49 = vld [vmem:[#allocation9 + $0x20] sm:$0xff]  ;;  %v6255_v25 = vpack.c.bf16 %v1015_v7, %v1013_v1  ;;  %v6287_v1 = vpack.c.bf16 %v1217_v47, %v1215_v56  ;;  %v6290_v7 = vpack.c.bf16 %v1222_v15, %v1220_v4  ;;  %v6317_v4 = vpack.c.bf16 %v1237_v34, %v1235_v5  ;;  %v1205_v5 = vld [vmem:[#allocation6 + $0x80] sm:$0xff] }
 0x277   :  { %v6186_v17 = vclamps-f32 %v544_v10, 0.5  ;;  %4770 = vmatprep.subr.bf16.mxu0 %v6191_v35  ;;  %v6199_v45 = vpack.c.bf16 %v995_v27, %v993_v49  ;;  %v1018_v10 = vld [vmem:[#allocation9 + $0xe8] sm:$0xff]  ;;  %v1210_v27 = vld [vmem:[#allocation9 + $0x118] sm:$0xff] }
 0x278   :  { %v6258_v28 = vpack.c.bf16 %v1020_v18, %v1018_v10  ;;  %v1208_v49 = vld [vmem:[#allocation9 + $0x108] sm:$0xff]  ;;  %v1219_v10 = vld [vmem:[#allocation9 + $0x160] sm:$0xff]  ;;  %v1221_v18 = vld [vmem:[#allocation9 + $0x170] sm:$0xff] }
 0x279   :  { %548 = vst [vmem:[#allocation13 + $0x38] sm:$0xff] %v6186_v17  ;;  %884 = vmatmul.mubr.f32.vlgmr.msra.gmra.mrb[6].mxu0 %v6186_v17  ;;  %v6265_v33 = vpack.c.bf16 %v1210_v27, %v1208_v49  ;;  %v1226_v49 = vld [vmem:[#allocation9 + $0x198] sm:$0xff]  ;;  %v6293_v27 = vpack.c.bf16 %v1221_v18, %v1219_v10 }
 0x27a   :  { %1101 = vmatprep.mubr.f32.mxu0 %v5815_v0  ;;  %4772 = vmatpush1.bf16.msra.mxu0 %v6193_v52 }
 0x27b   :  { %4774 = vmatprep.subr.bf16.mxu0 %v6195_v20 }
 0x27e   :  { %4776 = vmatpush1.bf16.msra.mxu0 %v6199_v45 }
 0x27f   :  { %4778 = vmatprep.subr.bf16.mxu0 %v6202_v51 }
 0x282   :  { %4780 = vmatpush1.bf16.msra.mxu0 %v6205_v61 }
 0x32c   :  { %v6209_v6 = vpop.f32.mrb[4].mxu0 }
 0x32d   :  { %v669_v12 = vpop.f32.mrb[5].mxu0  ;;  %v672_v53 = vadd.f32 %v6209_v6, %v550_v44  ;;  %v770_v44 = vld [vmem:[#allocation6 + $0xa0] sm:$0xff] }
 0x32e   :  { %v679_v13 = vadd.f32 %v669_v12, %v551_v3 }
 0x32f   :  { %v3671_v59 = vmul.f32 -1.442695, %v672_v53  ;;  %v6296_v53 = vpack.c.bf16 %v1226_v49, %v1224_v43  ;;  %v1034_v43 = vld [vmem:[#allocation11 + $0x68] sm:$0xff] }
 0x330   :  { %v3672_v9 = vmul.f32 -1.442695, %v679_v13  ;;  %v552_v13 = vld [vmem:[#allocation3 + $0x28] sm:$0xff] }
 0x332   :  { %5478 = vpow2.f32 %v3672_v9 }
 0x33c   :  { %v5479_v21 = vpop.eup %5478 }
 0x33d   :  { %v683_v32 = vadd.f32 1.0, %v5479_v21 }
 0x33f   :  { %5480 = vrcp.f32 %v683_v32 }
 0x349   :  { %v5481_v39 = vpop.eup %5480 }
 0x34a   :  { %v686_v50 = vmul.f32 %v5481_v39, %v6165_v42  ;;  %v768_v39 = vld [vmem:[#allocation6 + $0x90] sm:$0xff] }
 0x34c   :  { %4088 = vmatmul.mubr.f32.vlgmr.msra.gmra.mrb[4].mxu1 %v686_v50  ;;  %v6212_v54 = vpop.f32.mrb[6].mxu0 }
 0x34d   :  { %v887_v19 = vpop.f32.mrb[7].mxu0  ;;  %4747 = vmatpush3.bf16.msra.mxu1 %v6106_v24  ;;  %4122 = vmatprep.mubr.msk.f32.mxu1 %vm5817_vm0, %v5815_v0  ;;  %v890_v50 = vadd.f32 %v6212_v54, %v768_v39  ;;  %v1211_v54 = vld [vmem:[#allocation9 + $0x120] sm:$0xff] }
 0x34e   :  { %v897_v22 = vadd.f32 %v887_v19, %v769_v16  ;;  %4748 = vmatprep.subr.bf16.mxu1 %v5816_v14 }
 0x34f   :  { %v3674_v19 = vmul.f32 -1.442695, %v890_v50 }
 0x350   :  { %v3675_v23 = vmul.f32 -1.442695, %v897_v22 }
 0x351   :  { %4750 = vmatpush3.bf16.msra.mxu1 %v6112_v41 }
 0x352   :  { %5482 = vpow2.f32 %v3675_v23  ;;  %4751 = vmatprep.subr.bf16.mxu1 %v5816_v14 }
 0x355   :  { %4753 = vmatpush3.bf16.msra.mxu1 %v6118_v8 }
 0x356   :  { %4754 = vmatprep.subr.bf16.mxu1 %v5816_v14 }
 0x359   :  { %4756 = vmatpush3.bf16.msra.mxu1 %v6122_v26  ;;  %v1002_v26 = vld [vmem:[#allocation9 + $0x68] sm:$0xff] }
 0x35a   :  { %4757 = vmatprep.subr.bf16.mxu1 %v5816_v14 }
 0x35c   :  { %v5483_v24 = vpop.eup %5482 }
 0x35d   :  { %v901_v60 = vadd.f32 1.0, %v5483_v24  ;;  %4759 = vmatpush3.bf16.msra.mxu1 %v6126_v38  ;;  %v1004_v38 = vld [vmem:[#allocation9 + $0x78] sm:$0xff] }
 0x35e   :  { %4760 = vmatprep.subr.bf16.mxu1 %v5816_v14 }
 0x35f   :  { %5484 = vrcp.f32 %v901_v60  ;;  %v1207_v60 = vld [vmem:[#allocation9 + $0x100] sm:$0xff] }
 0x360   :  { %5486 = vpow2.f32 %v3671_v59  ;;  %v1223_v59 = vld [vmem:[#allocation9 + $0x180] sm:$0xff] }
 0x361   :  { %4762 = vmatpush3.bf16.msra.mxu1 %v6130_v55  ;;  %v6235_v55 = vpack.c.bf16 %v1004_v38, %v1002_v26  ;;  %v1214_v26 = vld [vmem:[#allocation9 + $0x138] sm:$0xff] }
 0x362   :  { %4763 = vmatprep.subr.bf16.mxu1 %v5816_v14 }
 0x363   :  { %4782 = vmatprep.subr.bf16.mxu0 %v6235_v55 }
 0x365   :  { %4765 = vmatpush3.bf16.msra.mxu1 %v6134_v62  ;;  %v6237_v62 = vpack.c.bf16 %v1003_v2, %v1001_v29 }
 0x366   :  { %4766 = vmatprep.subr.bf16.mxu1 %v5816_v14 }
 0x367   :  { %4784 = vmatpush1.bf16.msra.mxu0 %v6237_v62 }
 0x369   :  { %v5485_v41 = vpop.eup %5484  ;;  %4768 = vmatpush3.bf16.msra.mxu1 %v6138_v11  ;;  %v1006_v11 = vld [vmem:[#allocation9 + $0x88] sm:$0xff] }
 0x36a   :  { %v904_v8 = vmul.f32 %v5485_v41, %v6186_v17  ;;  %4801 = vmatprep.subr.bf16.mxu1 %v5816_v14  ;;  %v6241_v31 = vpack.c.bf16 %v1008_v30, %v1006_v11  ;;  %v5487_v3 = vpop.eup %5486  ;;  %v1209_v41 = vld [vmem:[#allocation9 + $0x110] sm:$0xff] }
 0x36b   :  { %v676_v12 = vadd.f32 1.0, %v5487_v3  ;;  %v6271_v29 = vpack.c.bf16 %v1209_v41, %v1207_v60  ;;  %v1213_v30 = vld [vmem:[#allocation9 + $0x130] sm:$0xff]  ;;  %v1231_v60 = vld [vmem:[#allocation9 + $0x1c0] sm:$0xff] }
 0x36c   :  { %4123 = vmatmul.mubr.f32.vlgmr.msra.gmra.mrb[6].mxu1 %v904_v8  ;;  %4786 = vmatprep.subr.bf16.mxu0 %v6241_v31  ;;  %v1212_v8 = vld [vmem:[#allocation9 + $0x128] sm:$0xff]  ;;  %v1225_v3 = vld [vmem:[#allocation9 + $0x190] sm:$0xff] }
 0x36d   :  { %4157 = vmatprep.mubr.msk.f32.mxu1 %vm5817_vm0, %v5815_v0  ;;  %4788 = vmatpush1.bf16.msra.mxu0 %v6243_v40  ;;  %5488 = vrcp.f32 %v676_v12  ;;  %v6275_v11 = vpack.c.bf16 %v1214_v26, %v1212_v8  ;;  %v1228_v12 = vld [vmem:[#allocation9 + $0x1a8] sm:$0xff]  ;;  %v6299_v39 = vpack.c.bf16 %v1225_v3, %v1223_v59  ;;  %v1233_v41 = vld [vmem:[#allocation9 + $0x1d0] sm:$0xff]  ;;  %v1238_v26 = vld [vmem:[#allocation9 + $0x1f8] sm:$0xff] }
 0x36e   :  { %4790 = vmatprep.subr.bf16.mxu0 %v6246_v48  ;;  %v1236_v8 = vld [vmem:[#allocation9 + $0x1e8] sm:$0xff]  ;;  %v1036_v59 = vld [vmem:[#allocation11 + $0x78] sm:$0xff] }
 0x371   :  { %4792 = vmatpush1.bf16.msra.mxu0 %v6249_v58 }
 0x372   :  { %4794 = vmatprep.subr.bf16.mxu0 %v6252_v63 }
 0x375   :  { %4796 = vmatpush1.bf16.msra.mxu0 %v6255_v25 }
 0x376   :  { %4798 = vmatprep.subr.bf16.mxu0 %v6258_v28 }
 0x377   :  { %v5489_v16 = vpop.eup %5488 }
 0x378   :  { %v760_v22 = vsub.f32 1.0, %v5489_v16  ;;  %v759_v6 = vmul.f32 %v5489_v16, %v6165_v42  ;;  %v6280_v42 = vpack.c.bf16 %v1213_v30, %v1211_v54  ;;  %v1227_v16 = vld [vmem:[#allocation9 + $0x1a0] sm:$0xff]  ;;  %v6311_v54 = vpack.c.bf16 %v1233_v41, %v1231_v60 }
 0x379   :  { %4800 = vmatpush1.bf16.msra.mxu0 %v6261_v46  ;;  %v6314_v30 = vpack.c.bf16 %v1238_v26, %v1236_v8  ;;  %v1241_v26 = vld [vmem:[#allocation11 + $0x90] sm:$0xff] }
 0x37a   :  { %4826 = vmatprep.subr.bf16.mxu0 %v6265_v33 }
 0x41f   :  { %v753_v9 = vpop.f32.mrb[4].mxu1 }
 0x420   :  { %v757_v21 = vadd.f32 %v753_v9, %v552_v13  ;;  %v4089_v32 = vpop.f32.mrb[5].mxu1  ;;  %v1230_v13 = vld [vmem:[#allocation9 + $0x1b8] sm:$0xff] }
 0x421   :  { %v6302_v50 = vpack.c.bf16 %v1230_v13, %v1228_v12  ;;  %v987_v12 = vld [vmem:[#allocation3 + $0x38] sm:$0xff] }
 0x422   :  { %5490 = vtanh.f32 %v757_v21 }
 0x423   :  { %5492 = vpow2.f32 %v3674_v19  ;;  %v1229_v19 = vld [vmem:[#allocation9 + $0x1b0] sm:$0xff] }
 0x42c   :  { %v5491_v23 = vpop.eup %5490 }
 0x42d   :  { %v761_v24 = vmul.f32 %v5491_v23, %v760_v22  ;;  %v5493_v57 = vpop.eup %5492  ;;  %v1232_v22 = vld [vmem:[#allocation9 + $0x1c8] sm:$0xff]  ;;  %v1234_v23 = vld [vmem:[#allocation9 + $0x1d8] sm:$0xff] }
 0x42e   :  { %v894_v36 = vadd.f32 1.0, %v5493_v57 }
 0x42f   :  { %v762_v38 = vadd.f32 %v761_v24, %v759_v6  ;;  %v6305_v6 = vpack.c.bf16 %v1229_v19, %v1227_v16  ;;  %v6308_v24 = vpack.c.bf16 %v1234_v23, %v1232_v22  ;;  %v1239_v22 = vld [vmem:[#allocation11 + $0x80] sm:$0xff]  ;;  %v1240_v23 = vld [vmem:[#allocation11 + $0x88] sm:$0xff] }
 0x430   :  { %5494 = vrcp.f32 %v894_v36  ;;  %v1033_v36 = vld [vmem:[#allocation11 + $0x60] sm:$0xff]  ;;  %v6378_v41 = vpack.c.bf16 %v1240_v23, %v1239_v22 }
 0x431   :  { %v6273_v2 = vclamps-f32 %v762_v38, 0.5  ;;  %v6367_v49 = vpack.c.bf16 %v1034_v43, %v1033_v36  ;;  %v1251_v43 = vld [vmem:[#allocation11 + $0xe0] sm:$0xff] }
 0x433   :  { %766 = vst [vmem:[#allocation12 + $0x8] sm:$0xff] %v6273_v2  ;;  %1102 = vmatmul.mubr.f32.vlgmr.msra.gmra.mrb[8].mxu0 %v6273_v2 }
 0x434   :  { %4828 = vmatpush1.bf16.msra.mxu0 %v6271_v29  ;;  %1319 = vmatprep.mubr.f32.mxu0 %v5815_v0 }
 0x435   :  { %4830 = vmatprep.subr.bf16.mxu0 %v6275_v11 }
 0x438   :  { %4832 = vmatpush1.bf16.msra.mxu0 %v6280_v42 }
 0x439   :  { %4834 = vmatprep.subr.bf16.mxu0 %v6284_v37 }
 0x43a   :  { %v5495_v38 = vpop.eup %5494 }
 0x43b   :  { %v978_v56 = vsub.f32 1.0, %v5495_v38  ;;  %v977_v15 = vmul.f32 %v5495_v38, %v6186_v17  ;;  %v1021_v17 = vld [vmem:[#allocation11] sm:$0xff]  ;;  %v1242_v38 = vld [vmem:[#allocation11 + $0x98] sm:$0xff] }
 0x43c   :  { %4836 = vmatpush1.bf16.msra.mxu0 %v6287_v1 }
 0x43d   :  { %4838 = vmatprep.subr.bf16.mxu0 %v6290_v7 }
 0x43f   :  { %v971_v9 = vpop.f32.mrb[6].mxu1 }
 0x440   :  { %v975_v21 = vadd.f32 %v971_v9, %v770_v44  ;;  %v4124_v32 = vpop.f32.mrb[7].mxu1  ;;  %4840 = vmatpush1.bf16.msra.mxu0 %v6293_v27  ;;  %v1035_v44 = vld [vmem:[#allocation11 + $0x70] sm:$0xff] }
 0x441   :  { %4842 = vmatprep.subr.bf16.mxu0 %v6296_v53  ;;  %v6371_v3 = vpack.c.bf16 %v1036_v59, %v1035_v44  ;;  %v1252_v44 = vld [vmem:[#allocation11 + $0xe8] sm:$0xff] }
 0x442   :  { %5496 = vtanh.f32 %v975_v21  ;;  %v6406_v59 = vpack.c.bf16 %v1252_v44, %v1251_v43  ;;  %v1871_v43 = vld [vmem:[#allocation9 + $0x50] sm:$0xff] }
 0x444   :  { %4844 = vmatpush1.bf16.msra.mxu0 %v6299_v39 }
 0x445   :  { %4846 = vmatprep.subr.bf16.mxu0 %v6302_v50 }
 0x448   :  { %4848 = vmatpush1.bf16.msra.mxu0 %v6305_v6 }
 0x449   :  { %4850 = vmatprep.subr.bf16.mxu0 %v6308_v24 }
 0x44c   :  { %v5497_v47 = vpop.eup %5496  ;;  %4852 = vmatpush1.bf16.msra.mxu0 %v6311_v54 }
 0x44d   :  { %4854 = vmatprep.subr.bf16.mxu0 %v6314_v30  ;;  %v979_v57 = vmul.f32 %v5497_v47, %v978_v56  ;;  %v6384_v47 = vpack.c.bf16 %v1242_v38, %v1241_v26 }
 0x44f   :  { %v980_v10 = vadd.f32 %v979_v57, %v977_v15  ;;  %v1243_v57 = vld [vmem:[#allocation11 + $0xa0] sm:$0xff] }
 0x450   :  { %4856 = vmatpush1.bf16.msra.mxu0 %v6317_v4 }
 0x451   :  { %v6322_v18 = vclamps-f32 %v980_v10, 0.5  ;;  %4882 = vmatprep.subr.bf16.mxu0 %v6191_v35  ;;  %v1022_v35 = vld [vmem:[#allocation11 + $0x8] sm:$0xff] }
 0x452   :  { %v1244_v10 = vld [vmem:[#allocation11 + $0xa8] sm:$0xff] }
 0x453   :  { %984 = vst [vmem:[#allocation13 + $0x30] sm:$0xff] %v6322_v18  ;;  %1320 = vmatmul.mubr.f32.vlgmr.msra.gmra.mrb[10].mxu0 %v6322_v18 }
 0x454   :  { %4884 = vmatpush1.bf16.msra.mxu0 %v6193_v52  ;;  %1537 = vmatprep.mubr.f32.mxu0 %v5815_v0  ;;  %v6344_v52 = vpack.c.bf16 %v1022_v35, %v1021_v17  ;;  %v6390_v35 = vpack.c.bf16 %v1244_v10, %v1243_v57  ;;  %v1206_v57 = vld [vmem:[#allocation6 + $0x88] sm:$0xff] }
 0x455   :  { %4886 = vmatprep.subr.bf16.mxu0 %v6195_v20  ;;  %v1023_v20 = vld [vmem:[#allocation11 + $0x10] sm:$0xff] }
 0x456   :  { %4803 = vmatpush3.bf16.msra.mxu1 %v6344_v52 }
 0x457   :  { %4804 = vmatprep.subr.bf16.mxu1 %v5816_v14 }
 0x458   :  { %4888 = vmatpush1.bf16.msra.mxu0 %v6199_v45  ;;  %v1024_v45 = vld [vmem:[#allocation11 + $0x18] sm:$0xff] }
 0x459   :  { %4890 = vmatprep.subr.bf16.mxu0 %v6202_v51  ;;  %v6348_v51 = vpack.c.bf16 %v1024_v45, %v1023_v20  ;;  %v1245_v20 = vld [vmem:[#allocation11 + $0xb0] sm:$0xff]  ;;  %v1246_v45 = vld [vmem:[#allocation11 + $0xb8] sm:$0xff] }
 0x45b   :  { %4806 = vmatpush3.bf16.msra.mxu1 %v6348_v51 }
 0x45c   :  { %4892 = vmatpush1.bf16.msra.mxu0 %v6205_v61  ;;  %4807 = vmatprep.subr.bf16.mxu1 %v5816_v14  ;;  %v1025_v61 = vld [vmem:[#allocation11 + $0x20] sm:$0xff] }
 0x45d   :  { %4894 = vmatprep.subr.bf16.mxu0 %v6235_v55  ;;  %v1026_v55 = vld [vmem:[#allocation11 + $0x28] sm:$0xff] }
 0x460   :  { %4896 = vmatpush1.bf16.msra.mxu0 %v6237_v62  ;;  %v6352_v62 = vpack.c.bf16 %v1026_v55, %v1025_v61  ;;  %v6394_v61 = vpack.c.bf16 %v1246_v45, %v1245_v20  ;;  %v1247_v55 = vld [vmem:[#allocation11 + $0xc0] sm:$0xff] }
 0x461   :  { %4898 = vmatprep.subr.bf16.mxu0 %v6241_v31  ;;  %v1027_v31 = vld [vmem:[#allocation11 + $0x30] sm:$0xff] }
 0x462   :  { %4809 = vmatpush3.bf16.msra.mxu1 %v6352_v62 }
 0x463   :  { %4810 = vmatprep.subr.bf16.mxu1 %v5816_v14 }
 0x464   :  { %4900 = vmatpush1.bf16.msra.mxu0 %v6243_v40  ;;  %v1028_v40 = vld [vmem:[#allocation11 + $0x38] sm:$0xff] }
 0x465   :  { %4902 = vmatprep.subr.bf16.mxu0 %v6246_v48  ;;  %v6356_v48 = vpack.c.bf16 %v1028_v40, %v1027_v31  ;;  %v1248_v31 = vld [vmem:[#allocation11 + $0xc8] sm:$0xff] }
 0x466   :  { %v6398_v40 = vpack.c.bf16 %v1248_v31, %v1247_v55  ;;  %v1867_v55 = vld [vmem:[#allocation9 + $0x30] sm:$0xff]  ;;  %v1870_v31 = vld [vmem:[#allocation9 + $0x48] sm:$0xff] }
 0x467   :  { %4812 = vmatpush3.bf16.msra.mxu1 %v6356_v48 }
 0x468   :  { %4904 = vmatpush1.bf16.msra.mxu0 %v6249_v58  ;;  %4813 = vmatprep.subr.bf16.mxu1 %v5816_v14  ;;  %v1029_v58 = vld [vmem:[#allocation11 + $0x40] sm:$0xff] }
 0x469   :  { %4906 = vmatprep.subr.bf16.mxu0 %v6252_v63  ;;  %v1030_v63 = vld [vmem:[#allocation11 + $0x48] sm:$0xff] }
 0x46c   :  { %4908 = vmatpush1.bf16.msra.mxu0 %v6255_v25  ;;  %v6360_v25 = vpack.c.bf16 %v1030_v63, %v1029_v58  ;;  %v1249_v58 = vld [vmem:[#allocation11 + $0xd0] sm:$0xff]  ;;  %v1250_v63 = vld [vmem:[#allocation11 + $0xd8] sm:$0xff] }
 0x46d   :  { %4910 = vmatprep.subr.bf16.mxu0 %v6258_v28  ;;  %v1031_v28 = vld [vmem:[#allocation11 + $0x50] sm:$0xff]  ;;  %v6402_v36 = vpack.c.bf16 %v1250_v63, %v1249_v58  ;;  %v1872_v58 = vld [vmem:[#allocation9 + $0x58] sm:$0xff] }
 0x46e   :  { %4815 = vmatpush3.bf16.msra.mxu1 %v6360_v25 }
 0x46f   :  { %4816 = vmatprep.subr.bf16.mxu1 %v5816_v14 }
 0x470   :  { %4912 = vmatpush1.bf16.msra.mxu0 %v6261_v46  ;;  %v1032_v46 = vld [vmem:[#allocation11 + $0x58] sm:$0xff] }
 0x471   :  { %4938 = vmatprep.subr.bf16.mxu0 %v6265_v33  ;;  %v6364_v33 = vpack.c.bf16 %v1032_v46, %v1031_v28 }
 0x473   :  { %4818 = vmatpush3.bf16.msra.mxu1 %v6364_v33 }
 0x474   :  { %4819 = vmatprep.subr.bf16.mxu1 %v5816_v14 }
 0x477   :  { %4821 = vmatpush3.bf16.msra.mxu1 %v6367_v49 }
 0x478   :  { %4822 = vmatprep.subr.bf16.mxu1 %v5816_v14 }
 0x47b   :  { %4824 = vmatpush3.bf16.msra.mxu1 %v6371_v3 }
 0x47c   :  { %4857 = vmatprep.subr.bf16.mxu1 %v5816_v14 }
 0x506   :  { %v6376_v13 = vpop.f32.mrb[8].mxu0 }
 0x507   :  { %v1105_v9 = vpop.f32.mrb[9].mxu0 }
 0x508   :  { %v1115_v21 = vadd.f32 %v1105_v9, %v987_v12  ;;  %v1253_v12 = vld [vmem:[#allocation11 + $0xf0] sm:$0xff]  ;;  %v1254_v9 = vld [vmem:[#allocation11 + $0xf8] sm:$0xff] }
 0x50a   :  { %v3678_v32 = vmul.f32 -1.442695, %v1115_v21  ;;  %v6410_v21 = vpack.c.bf16 %v1254_v9, %v1253_v12  ;;  %v1423_v12 = vld [vmem:[#allocation3 + $0x50] sm:$0xff] }
 0x50c   :  { %5498 = vpow2.f32 %v3678_v32 }
 0x516   :  { %v5499_v16 = vpop.eup %5498 }
 0x517   :  { %v1119_v19 = vadd.f32 1.0, %v5499_v16 }
 0x519   :  { %5500 = vrcp.f32 %v1119_v19  ;;  %v988_v19 = vld [vmem:[#allocation3 + $0x40] sm:$0xff] }
 0x523   :  { %v5501_v60 = vpop.eup %5500 }
 0x524   :  { %v1122_v8 = vmul.f32 %v5501_v60, %v6273_v2  ;;  %v1204_v60 = vld [vmem:[#allocation6 + $0x78] sm:$0xff] }
 0x526   :  { %4158 = vmatmul.mubr.f32.vlgmr.msra.gmra.mrb[8].mxu1 %v1122_v8  ;;  %v6381_v34 = vpop.f32.mrb[10].mxu0 }
 0x527   :  { %v1323_v56 = vpop.f32.mrb[11].mxu0  ;;  %4859 = vmatpush3.bf16.msra.mxu1 %v6378_v41  ;;  %4192 = vmatprep.mubr.msk.f32.mxu1 %vm5817_vm0, %v5815_v0 }
 0x528   :  { %v1333_v15 = vadd.f32 %v1323_v56, %v1205_v5  ;;  %4860 = vmatprep.subr.bf16.mxu1 %v5816_v14 }
 0x52a   :  { %v3681_v17 = vmul.f32 -1.442695, %v1333_v15 }
 0x52b   :  { %4862 = vmatpush3.bf16.msra.mxu1 %v6384_v47 }
 0x52c   :  { %5502 = vpow2.f32 %v3681_v17  ;;  %4863 = vmatprep.subr.bf16.mxu1 %v5816_v14 }
 0x52f   :  { %4865 = vmatpush3.bf16.msra.mxu1 %v6390_v35 }
 0x530   :  { %4866 = vmatprep.subr.bf16.mxu1 %v5816_v14 }
 0x533   :  { %4868 = vmatpush3.bf16.msra.mxu1 %v6394_v61 }
 0x534   :  { %4869 = vmatprep.subr.bf16.mxu1 %v5816_v14 }
 0x536   :  { %v5503_v28 = vpop.eup %5502 }
 0x537   :  { %v1337_v46 = vadd.f32 1.0, %v5503_v28  ;;  %4871 = vmatpush3.bf16.msra.mxu1 %v6398_v40  ;;  %v6474_v28 = vpack.c.bf16 %v1872_v58, %v1870_v31  ;;  %v1422_v58 = vld [vmem:[#allocation3 + $0x48] sm:$0xff] }
 0x538   :  { %4872 = vmatprep.subr.bf16.mxu1 %v5816_v14 }
 0x539   :  { %5504 = vrcp.f32 %v1337_v46  ;;  %v1869_v46 = vld [vmem:[#allocation9 + $0x40] sm:$0xff] }
 0x53a   :  { %v6477_v44 = vpack.c.bf16 %v1871_v43, %v1869_v46 }
 0x53b   :  { %4874 = vmatpush3.bf16.msra.mxu1 %v6402_v36 }
 0x53c   :  { %4875 = vmatprep.subr.bf16.mxu1 %v5816_v14 }
 0x53f   :  { %4877 = vmatpush3.bf16.msra.mxu1 %v6406_v59 }
 0x540   :  { %4878 = vmatprep.subr.bf16.mxu1 %v5816_v14 }
 0x543   :  { %v5505_v32 = vpop.eup %5504  ;;  %4880 = vmatpush3.bf16.msra.mxu1 %v6410_v21 }
 0x544   :  { %v1340_v16 = vmul.f32 %v5505_v32, %v6322_v18  ;;  %4913 = vmatprep.subr.bf16.mxu1 %v5816_v14 }
 0x546   :  { %4193 = vmatmul.mubr.f32.vlgmr.msra.gmra.mrb[10].mxu1 %v1340_v16 }
 0x547   :  { %4915 = vmatpush3.bf16.msra.mxu1 %v6344_v52  ;;  %4227 = vmatprep.mubr.msk.f32.mxu1 %vm5817_vm0, %v5815_v0  ;;  %v986_v52 = vld [vmem:[#allocation3 + $0x30] sm:$0xff] }
 0x548   :  { %4916 = vmatprep.subr.bf16.mxu1 %v5816_v14 }
 0x54b   :  { %4918 = vmatpush3.bf16.msra.mxu1 %v6348_v51  ;;  %v1108_v51 = vadd.f32 %v6376_v13, %v986_v52 }
 0x54c   :  { %4919 = vmatprep.subr.bf16.mxu1 %v5816_v14 }
 0x54f   :  { %4921 = vmatpush3.bf16.msra.mxu1 %v6352_v62  ;;  %v3677_v62 = vmul.f32 -1.442695, %v1108_v51 }
 0x550   :  { %4922 = vmatprep.subr.bf16.mxu1 %v5816_v14 }
 0x551   :  { %5506 = vpow2.f32 %v3677_v62 }
 0x553   :  { %4924 = vmatpush3.bf16.msra.mxu1 %v6356_v48 }
 0x554   :  { %4925 = vmatprep.subr.bf16.mxu1 %v5816_v14 }
 0x557   :  { %4927 = vmatpush3.bf16.msra.mxu1 %v6360_v25 }
 0x558   :  { %4928 = vmatprep.subr.bf16.mxu1 %v5816_v14 }
 0x55b   :  { %4930 = vmatpush3.bf16.msra.mxu1 %v6364_v33  ;;  %v5507_v48 = vpop.eup %5506 }
 0x55c   :  { %4931 = vmatprep.subr.bf16.mxu1 %v5816_v14  ;;  %v1112_v25 = vadd.f32 1.0, %v5507_v48 }
 0x55e   :  { %5508 = vrcp.f32 %v1112_v25 }
 0x55f   :  { %4933 = vmatpush3.bf16.msra.mxu1 %v6367_v49  ;;  %v1326_v49 = vadd.f32 %v6381_v34, %v1204_v60 }
 0x560   :  { %4934 = vmatprep.subr.bf16.mxu1 %v5816_v14 }
 0x563   :  { %4936 = vmatpush3.bf16.msra.mxu1 %v6371_v3  ;;  %v3680_v3 = vmul.f32 -1.442695, %v1326_v49 }
 0x564   :  { %4969 = vmatprep.subr.bf16.mxu1 %v5816_v14 }
 0x568   :  { %v5509_v8 = vpop.eup %5508 }
 0x569   :  { %v1196_v26 = vsub.f32 1.0, %v5509_v8  ;;  %v1195_v13 = vmul.f32 %v5509_v8, %v6273_v2  ;;  %v1873_v8 = vld [vmem:[#allocation9 + $0x60] sm:$0xff] }
 0x5f9   :  { %v1189_v33 = vpop.f32.mrb[8].mxu1 }
 0x5fa   :  { %v1193_v22 = vadd.f32 %v1189_v33, %v988_v19  ;;  %v4159_v23 = vpop.f32.mrb[9].mxu1  ;;  %v1641_v19 = vld [vmem:[#allocation6 + $0x68] sm:$0xff] }
 0x5fc   :  { %5510 = vtanh.f32 %v1193_v22 }
 0x5fd   :  { %5512 = vpow2.f32 %v3680_v3  ;;  %v1875_v3 = vld [vmem:[#allocation9 + $0x70] sm:$0xff] }
 0x606   :  { %v5511_v38 = vpop.eup %5510 }
 0x607   :  { %v1197_v5 = vmul.f32 %v5511_v38, %v1196_v26  ;;  %v5513_v34 = vpop.eup %5512  ;;  %v1880_v26 = vld [vmem:[#allocation9 + $0x98] sm:$0xff] }
 0x608   :  { %v1330_v2 = vadd.f32 1.0, %v5513_v34  ;;  %v1882_v34 = vld [vmem:[#allocation9 + $0xa8] sm:$0xff] }
 0x609   :  { %v1198_v56 = vadd.f32 %v1197_v5, %v1195_v13  ;;  %v1877_v13 = vld [vmem:[#allocation9 + $0x80] sm:$0xff]  ;;  %v1879_v5 = vld [vmem:[#allocation9 + $0x90] sm:$0xff] }
 0x60a   :  { %5514 = vrcp.f32 %v1330_v2  ;;  %v1884_v2 = vld [vmem:[#allocation9 + $0xb8] sm:$0xff] }
 0x60b   :  { %v6437_v15 = vclamps-f32 %v1198_v56, 0.5  ;;  %v6515_v56 = vpack.c.bf16 %v1879_v5, %v1877_v13  ;;  %v2088_v13 = vld [vmem:[#allocation9 + $0x148] sm:$0xff]  ;;  %v2090_v5 = vld [vmem:[#allocation9 + $0x158] sm:$0xff] }
 0x60d   :  { %1202 = vst [vmem:[#allocation12 + $0x10] sm:$0xff] %v6437_v15  ;;  %1538 = vmatmul.mubr.f32.vlgmr.msra.gmra.mrb[12].mxu0 %v6437_v15 }
 0x60e   :  { %4940 = vmatpush1.bf16.msra.mxu0 %v6271_v29  ;;  %1755 = vmatprep.mubr.f32.mxu0 %v5815_v0 }
 0x60f   :  { %4942 = vmatprep.subr.bf16.mxu0 %v6275_v11 }
 0x612   :  { %4944 = vmatpush1.bf16.msra.mxu0 %v6280_v42 }
 0x613   :  { %4946 = vmatprep.subr.bf16.mxu0 %v6284_v37 }
 0x614   :  { %v5515_v29 = vpop.eup %5514 }
 0x615   :  { %v1414_v11 = vsub.f32 1.0, %v5515_v29  ;;  %v1413_v37 = vmul.f32 %v5515_v29, %v6322_v18  ;;  %v1888_v29 = vld [vmem:[#allocation9 + $0xd8] sm:$0xff] }
 0x616   :  { %4948 = vmatpush1.bf16.msra.mxu0 %v6287_v1 }
 0x617   :  { %4950 = vmatprep.subr.bf16.mxu0 %v6290_v7 }
 0x619   :  { %v1407_v10 = vpop.f32.mrb[10].mxu1 }
 0x61a   :  { %v1411_v17 = vadd.f32 %v1407_v10, %v1206_v57  ;;  %v4194_v20 = vpop.f32.mrb[11].mxu1  ;;  %4952 = vmatpush1.bf16.msra.mxu0 %v6293_v27  ;;  %v1881_v57 = vld [vmem:[#allocation9 + $0xa0] sm:$0xff]  ;;  %v6518_v10 = vpack.c.bf16 %v1884_v2, %v1882_v34  ;;  %v6556_v34 = vpack.c.bf16 %v2090_v5, %v2088_v13  ;;  %v2109_v5 = vld [vmem:[#allocation9 + $0x1f0] sm:$0xff] }
 0x61b   :  { %4954 = vmatprep.subr.bf16.mxu0 %v6296_v53  ;;  %v1862_v53 = vld [vmem:[#allocation9 + $0x8] sm:$0xff]  ;;  %v2087_v2 = vld [vmem:[#allocation9 + $0x140] sm:$0xff] }
 0x61c   :  { %5516 = vtanh.f32 %v1411_v17  ;;  %v1883_v17 = vld [vmem:[#allocation9 + $0xb0] sm:$0xff]  ;;  %v1886_v20 = vld [vmem:[#allocation9 + $0xc8] sm:$0xff]  ;;  %v2107_v13 = vld [vmem:[#allocation9 + $0x1e0] sm:$0xff] }
 0x61e   :  { %4956 = vmatpush1.bf16.msra.mxu0 %v6299_v39  ;;  %v1864_v39 = vld [vmem:[#allocation9 + $0x18] sm:$0xff] }
 0x61f   :  { %4958 = vmatprep.subr.bf16.mxu0 %v6302_v50  ;;  %v1861_v50 = vld [vmem:[#allocation9] sm:$0xff] }
 0x622   :  { %4960 = vmatpush1.bf16.msra.mxu0 %v6305_v6  ;;  %v6463_v6 = vpack.c.bf16 %v1864_v39, %v1862_v53  ;;  %v1892_v53 = vld [vmem:[#allocation9 + $0xf8] sm:$0xff] }
 0x623   :  { %4962 = vmatprep.subr.bf16.mxu0 %v6308_v24  ;;  %v1863_v24 = vld [vmem:[#allocation9 + $0x10] sm:$0xff] }
 0x624   :  { %v6465_v18 = vpack.c.bf16 %v1863_v24, %v1861_v50  ;;  %v1889_v24 = vld [vmem:[#allocation9 + $0xe0] sm:$0xff] }
 0x626   :  { %v5517_v42 = vpop.eup %5516  ;;  %4964 = vmatpush1.bf16.msra.mxu0 %v6311_v54  ;;  %v1866_v54 = vld [vmem:[#allocation9 + $0x28] sm:$0xff] }
 0x627   :  { %4966 = vmatprep.subr.bf16.mxu0 %v6314_v30  ;;  %v1415_v1 = vmul.f32 %v5517_v42, %v1414_v11  ;;  %v1868_v30 = vld [vmem:[#allocation9 + $0x38] sm:$0xff]  ;;  %v6521_v11 = vpack.c.bf16 %v1883_v17, %v1881_v57  ;;  %v6524_v42 = vpack.c.bf16 %v1888_v29, %v1886_v20  ;;  %v2089_v57 = vld [vmem:[#allocation9 + $0x150] sm:$0xff]  ;;  %v2092_v17 = vld [vmem:[#allocation9 + $0x168] sm:$0xff] }
 0x628   :  { %v6467_v45 = vpack.c.bf16 %v1868_v30, %v1866_v54  ;;  %v1891_v54 = vld [vmem:[#allocation9 + $0xf0] sm:$0xff]  ;;  %v2094_v20 = vld [vmem:[#allocation9 + $0x178] sm:$0xff] }
 0x629   :  { %v1416_v7 = vadd.f32 %v1415_v1, %v1413_v37  ;;  %v1885_v37 = vld [vmem:[#allocation9 + $0xc0] sm:$0xff]  ;;  %v1887_v1 = vld [vmem:[#allocation9 + $0xd0] sm:$0xff]  ;;  %v6533_v30 = vpack.c.bf16 %v1891_v54, %v1889_v24  ;;  %v2096_v54 = vld [vmem:[#allocation9 + $0x188] sm:$0xff] }
 0x62a   :  { %4968 = vmatpush1.bf16.msra.mxu0 %v6317_v4  ;;  %v1865_v4 = vld [vmem:[#allocation9 + $0x20] sm:$0xff]  ;;  %v6527_v39 = vpack.c.bf16 %v1887_v1, %v1885_v37  ;;  %v6559_v37 = vpack.c.bf16 %v2089_v57, %v2087_v2  ;;  %v6562_v1 = vpack.c.bf16 %v2094_v20, %v2092_v17  ;;  %v6589_v17 = vpack.c.bf16 %v2109_v5, %v2107_v13 }
 0x62b   :  { %v6458_v27 = vclamps-f32 %v1416_v7, 0.5  ;;  %4994 = vmatprep.subr.bf16.mxu0 %v6463_v6  ;;  %v6471_v63 = vpack.c.bf16 %v1867_v55, %v1865_v4  ;;  %v1890_v7 = vld [vmem:[#allocation9 + $0xe8] sm:$0xff]  ;;  %v2082_v55 = vld [vmem:[#allocation9 + $0x118] sm:$0xff]  ;;  %v2077_v13 = vld [vmem:[#allocation6 + $0x50] sm:$0xff] }
 0x62c   :  { %v6530_v50 = vpack.c.bf16 %v1892_v53, %v1890_v7  ;;  %v2080_v4 = vld [vmem:[#allocation9 + $0x108] sm:$0xff]  ;;  %v2091_v7 = vld [vmem:[#allocation9 + $0x160] sm:$0xff]  ;;  %v2093_v53 = vld [vmem:[#allocation9 + $0x170] sm:$0xff] }
 0x62d   :  { %1420 = vst [vmem:[#allocation13 + $0x28] sm:$0xff] %v6458_v27  ;;  %1756 = vmatmul.mubr.f32.vlgmr.msra.gmra.mrb[14].mxu0 %v6458_v27  ;;  %v6537_v31 = vpack.c.bf16 %v2082_v55, %v2080_v4  ;;  %v2098_v4 = vld [vmem:[#allocation9 + $0x198] sm:$0xff]  ;;  %v6565_v55 = vpack.c.bf16 %v2093_v53, %v2091_v7 }
 0x62e   :  { %1973 = vmatprep.mubr.f32.mxu0 %v5815_v0  ;;  %4996 = vmatpush1.bf16.msra.mxu0 %v6465_v18 }
 0x62f   :  { %4998 = vmatprep.subr.bf16.mxu0 %v6467_v45 }
 0x632   :  { %5000 = vmatpush1.bf16.msra.mxu0 %v6471_v63 }
 0x633   :  { %5002 = vmatprep.subr.bf16.mxu0 %v6474_v28 }
 0x636   :  { %5004 = vmatpush1.bf16.msra.mxu0 %v6477_v44 }
 0x6e0   :  { %v6481_v9 = vpop.f32.mrb[12].mxu0 }
 0x6e1   :  { %v1541_v32 = vpop.f32.mrb[13].mxu0  ;;  %v1544_v46 = vadd.f32 %v6481_v9, %v1422_v58  ;;  %v1642_v58 = vld [vmem:[#allocation6 + $0x70] sm:$0xff] }
 0x6e2   :  { %v1551_v16 = vadd.f32 %v1541_v32, %v1423_v12 }
 0x6e3   :  { %v3683_v43 = vmul.f32 -1.442695, %v1544_v46  ;;  %v6568_v46 = vpack.c.bf16 %v2098_v4, %v2096_v54  ;;  %v1906_v54 = vld [vmem:[#allocation11 + $0x68] sm:$0xff] }
 0x6e4   :  { %v3684_v52 = vmul.f32 -1.442695, %v1551_v16  ;;  %v1424_v16 = vld [vmem:[#allocation3 + $0x58] sm:$0xff] }
 0x6e6   :  { %5518 = vpow2.f32 %v3684_v52 }
 0x6f0   :  { %v5519_v51 = vpop.eup %5518 }
 0x6f1   :  { %v1555_v62 = vadd.f32 1.0, %v5519_v51 }
 0x6f3   :  { %5520 = vrcp.f32 %v1555_v62 }
 0x6fd   :  { %v5521_v48 = vpop.eup %5520 }
 0x6fe   :  { %v1558_v25 = vmul.f32 %v5521_v48, %v6437_v15  ;;  %v1640_v48 = vld [vmem:[#allocation6 + $0x60] sm:$0xff] }
 0x700   :  { %4228 = vmatmul.mubr.f32.vlgmr.msra.gmra.mrb[12].mxu1 %v1558_v25  ;;  %v6484_v33 = vpop.f32.mrb[14].mxu0 }
 0x701   :  { %v1759_v22 = vpop.f32.mrb[15].mxu0  ;;  %4971 = vmatpush3.bf16.msra.mxu1 %v6378_v41  ;;  %4262 = vmatprep.mubr.msk.f32.mxu1 %vm5817_vm0, %v5815_v0  ;;  %v1762_v25 = vadd.f32 %v6484_v33, %v1640_v48  ;;  %v2083_v33 = vld [vmem:[#allocation9 + $0x120] sm:$0xff] }
 0x702   :  { %v1769_v23 = vadd.f32 %v1759_v22, %v1641_v19  ;;  %4972 = vmatprep.subr.bf16.mxu1 %v5816_v14 }
 0x703   :  { %v3686_v22 = vmul.f32 -1.442695, %v1762_v25 }
 0x704   :  { %v3687_v60 = vmul.f32 -1.442695, %v1769_v23 }
 0x705   :  { %4974 = vmatpush3.bf16.msra.mxu1 %v6384_v47 }
 0x706   :  { %5522 = vpow2.f32 %v3687_v60  ;;  %4975 = vmatprep.subr.bf16.mxu1 %v5816_v14 }
 0x709   :  { %4977 = vmatpush3.bf16.msra.mxu1 %v6390_v35 }
 0x70a   :  { %4978 = vmatprep.subr.bf16.mxu1 %v5816_v14 }
 0x70d   :  { %4980 = vmatpush3.bf16.msra.mxu1 %v6394_v61  ;;  %v1874_v61 = vld [vmem:[#allocation9 + $0x68] sm:$0xff] }
 0x70e   :  { %4981 = vmatprep.subr.bf16.mxu1 %v5816_v14 }
 0x710   :  { %v5523_v41 = vpop.eup %5522 }
 0x711   :  { %v1773_v49 = vadd.f32 1.0, %v5523_v41  ;;  %4983 = vmatpush3.bf16.msra.mxu1 %v6398_v40  ;;  %v1876_v40 = vld [vmem:[#allocation9 + $0x78] sm:$0xff] }
 0x712   :  { %4984 = vmatprep.subr.bf16.mxu1 %v5816_v14 }
 0x713   :  { %5524 = vrcp.f32 %v1773_v49  ;;  %v2079_v49 = vld [vmem:[#allocation9 + $0x100] sm:$0xff] }
 0x714   :  { %5526 = vpow2.f32 %v3683_v43  ;;  %v2095_v43 = vld [vmem:[#allocation9 + $0x180] sm:$0xff] }
 0x715   :  { %4986 = vmatpush3.bf16.msra.mxu1 %v6402_v36  ;;  %v6507_v36 = vpack.c.bf16 %v1876_v40, %v1874_v61  ;;  %v2086_v61 = vld [vmem:[#allocation9 + $0x138] sm:$0xff] }
 0x716   :  { %4987 = vmatprep.subr.bf16.mxu1 %v5816_v14 }
 0x717   :  { %5006 = vmatprep.subr.bf16.mxu0 %v6507_v36 }
 0x719   :  { %4989 = vmatpush3.bf16.msra.mxu1 %v6406_v59  ;;  %v6509_v59 = vpack.c.bf16 %v1875_v3, %v1873_v8 }
 0x71a   :  { %4990 = vmatprep.subr.bf16.mxu1 %v5816_v14 }
 0x71b   :  { %5008 = vmatpush1.bf16.msra.mxu0 %v6509_v59 }
 0x71d   :  { %v5525_v47 = vpop.eup %5524  ;;  %4992 = vmatpush3.bf16.msra.mxu1 %v6410_v21  ;;  %v1878_v21 = vld [vmem:[#allocation9 + $0x88] sm:$0xff] }
 0x71e   :  { %v1776_v35 = vmul.f32 %v5525_v47, %v6458_v27  ;;  %5025 = vmatprep.subr.bf16.mxu1 %v5816_v14  ;;  %v6513_v38 = vpack.c.bf16 %v1880_v26, %v1878_v21  ;;  %v5527_v12 = vpop.eup %5526  ;;  %v2081_v47 = vld [vmem:[#allocation9 + $0x110] sm:$0xff] }
 0x71f   :  { %v1548_v32 = vadd.f32 1.0, %v5527_v12  ;;  %v6543_v8 = vpack.c.bf16 %v2081_v47, %v2079_v49  ;;  %v2085_v26 = vld [vmem:[#allocation9 + $0x130] sm:$0xff]  ;;  %v2103_v49 = vld [vmem:[#allocation9 + $0x1c0] sm:$0xff] }
 0x720   :  { %4263 = vmatmul.mubr.f32.vlgmr.msra.gmra.mrb[14].mxu1 %v1776_v35  ;;  %5010 = vmatprep.subr.bf16.mxu0 %v6513_v38  ;;  %v2084_v35 = vld [vmem:[#allocation9 + $0x128] sm:$0xff]  ;;  %v2097_v12 = vld [vmem:[#allocation9 + $0x190] sm:$0xff] }
 0x721   :  { %4297 = vmatprep.mubr.msk.f32.mxu1 %vm5817_vm0, %v5815_v0  ;;  %5012 = vmatpush1.bf16.msra.mxu0 %v6515_v56  ;;  %5528 = vrcp.f32 %v1548_v32  ;;  %v6547_v21 = vpack.c.bf16 %v2086_v61, %v2084_v35  ;;  %v2100_v32 = vld [vmem:[#allocation9 + $0x1a8] sm:$0xff]  ;;  %v6571_v48 = vpack.c.bf16 %v2097_v12, %v2095_v43  ;;  %v2105_v47 = vld [vmem:[#allocation9 + $0x1d0] sm:$0xff]  ;;  %v2110_v61 = vld [vmem:[#allocation9 + $0x1f8] sm:$0xff] }
 0x722   :  { %5014 = vmatprep.subr.bf16.mxu0 %v6518_v10  ;;  %v2108_v35 = vld [vmem:[#allocation9 + $0x1e8] sm:$0xff]  ;;  %v1908_v43 = vld [vmem:[#allocation11 + $0x78] sm:$0xff] }
 0x725   :  { %5016 = vmatpush1.bf16.msra.mxu0 %v6521_v11 }
 0x726   :  { %5018 = vmatprep.subr.bf16.mxu0 %v6524_v42 }
 0x729   :  { %5020 = vmatpush1.bf16.msra.mxu0 %v6527_v39 }
 0x72a   :  { %5022 = vmatprep.subr.bf16.mxu0 %v6530_v50 }
 0x72b   :  { %v5529_v19 = vpop.eup %5528 }
 0x72c   :  { %v1632_v23 = vsub.f32 1.0, %v5529_v19  ;;  %v1631_v9 = vmul.f32 %v5529_v19, %v6437_v15  ;;  %v6552_v15 = vpack.c.bf16 %v2085_v26, %v2083_v33  ;;  %v2099_v19 = vld [vmem:[#allocation9 + $0x1a0] sm:$0xff]  ;;  %v6583_v33 = vpack.c.bf16 %v2105_v47, %v2103_v49 }
 0x72d   :  { %5024 = vmatpush1.bf16.msra.mxu0 %v6533_v30  ;;  %v6586_v26 = vpack.c.bf16 %v2110_v61, %v2108_v35  ;;  %v2113_v61 = vld [vmem:[#allocation11 + $0x90] sm:$0xff] }
 0x72e   :  { %5050 = vmatprep.subr.bf16.mxu0 %v6537_v31 }
 0x7d3   :  { %v1625_v52 = vpop.f32.mrb[12].mxu1 }
 0x7d4   :  { %v1629_v51 = vadd.f32 %v1625_v52, %v1424_v16  ;;  %v4229_v62 = vpop.f32.mrb[13].mxu1  ;;  %v2102_v16 = vld [vmem:[#allocation9 + $0x1b8] sm:$0xff] }
 0x7d5   :  { %v6574_v25 = vpack.c.bf16 %v2102_v16, %v2100_v32  ;;  %v1859_v32 = vld [vmem:[#allocation3 + $0x68] sm:$0xff] }
 0x7d6   :  { %5530 = vtanh.f32 %v1629_v51 }
 0x7d7   :  { %5532 = vpow2.f32 %v3686_v22  ;;  %v2101_v22 = vld [vmem:[#allocation9 + $0x1b0] sm:$0xff] }
 0x7e0   :  { %v5531_v60 = vpop.eup %5530 }
 0x7e1   :  { %v1633_v41 = vmul.f32 %v5531_v60, %v1632_v23  ;;  %v5533_v29 = vpop.eup %5532  ;;  %v2104_v23 = vld [vmem:[#allocation9 + $0x1c8] sm:$0xff]  ;;  %v2106_v60 = vld [vmem:[#allocation9 + $0x1d8] sm:$0xff] }
 0x7e2   :  { %v1766_v24 = vadd.f32 1.0, %v5533_v29 }
 0x7e3   :  { %v1634_v40 = vadd.f32 %v1633_v41, %v1631_v9  ;;  %v6577_v9 = vpack.c.bf16 %v2101_v22, %v2099_v19  ;;  %v6580_v41 = vpack.c.bf16 %v2106_v60, %v2104_v23  ;;  %v2111_v23 = vld [vmem:[#allocation11 + $0x80] sm:$0xff]  ;;  %v2112_v60 = vld [vmem:[#allocation11 + $0x88] sm:$0xff] }
 0x7e4   :  { %5534 = vrcp.f32 %v1766_v24  ;;  %v1905_v24 = vld [vmem:[#allocation11 + $0x60] sm:$0xff]  ;;  %v6650_v47 = vpack.c.bf16 %v2112_v60, %v2111_v23 }
 0x7e5   :  { %v6545_v3 = vclamps-f32 %v1634_v40, 0.5  ;;  %v6639_v4 = vpack.c.bf16 %v1906_v54, %v1905_v24  ;;  %v2123_v54 = vld [vmem:[#allocation11 + $0xe0] sm:$0xff] }
 0x7e7   :  { %1638 = vst [vmem:[#allocation12 + $0x18] sm:$0xff] %v6545_v3  ;;  %1974 = vmatmul.mubr.f32.vlgmr.msra.gmra.mrb[16].mxu0 %v6545_v3 }
 0x7e8   :  { %5052 = vmatpush1.bf16.msra.mxu0 %v6543_v8  ;;  %2191 = vmatprep.mubr.f32.mxu0 %v5815_v0 }
 0x7e9   :  { %5054 = vmatprep.subr.bf16.mxu0 %v6547_v21 }
 0x7ec   :  { %5056 = vmatpush1.bf16.msra.mxu0 %v6552_v15 }
 0x7ed   :  { %5058 = vmatprep.subr.bf16.mxu0 %v6556_v34 }
 0x7ee   :  { %v5535_v40 = vpop.eup %5534 }
 0x7ef   :  { %v1850_v2 = vsub.f32 1.0, %v5535_v40  ;;  %v1849_v20 = vmul.f32 %v5535_v40, %v6458_v27  ;;  %v1893_v27 = vld [vmem:[#allocation11] sm:$0xff]  ;;  %v2114_v40 = vld [vmem:[#allocation11 + $0x98] sm:$0xff] }
 0x7f0   :  { %5060 = vmatpush1.bf16.msra.mxu0 %v6559_v37 }
 0x7f1   :  { %5062 = vmatprep.subr.bf16.mxu0 %v6562_v1 }
 0x7f3   :  { %v1843_v52 = vpop.f32.mrb[14].mxu1 }
 0x7f4   :  { %v1847_v51 = vadd.f32 %v1843_v52, %v1642_v58  ;;  %v4264_v62 = vpop.f32.mrb[15].mxu1  ;;  %5064 = vmatpush1.bf16.msra.mxu0 %v6565_v55  ;;  %v1907_v58 = vld [vmem:[#allocation11 + $0x70] sm:$0xff] }
 0x7f5   :  { %5066 = vmatprep.subr.bf16.mxu0 %v6568_v46  ;;  %v6643_v12 = vpack.c.bf16 %v1908_v43, %v1907_v58  ;;  %v2124_v58 = vld [vmem:[#allocation11 + $0xe8] sm:$0xff] }
 0x7f6   :  { %5536 = vtanh.f32 %v1847_v51  ;;  %v6678_v43 = vpack.c.bf16 %v2124_v58, %v2123_v54  ;;  %v2743_v54 = vld [vmem:[#allocation9 + $0x50] sm:$0xff] }
 0x7f8   :  { %5068 = vmatpush1.bf16.msra.mxu0 %v6571_v48 }
 0x7f9   :  { %5070 = vmatprep.subr.bf16.mxu0 %v6574_v25 }
 0x7fc   :  { %5072 = vmatpush1.bf16.msra.mxu0 %v6577_v9 }
 0x7fd   :  { %5074 = vmatprep.subr.bf16.mxu0 %v6580_v41 }
 0x800   :  { %v5537_v57 = vpop.eup %5536  ;;  %5076 = vmatpush1.bf16.msra.mxu0 %v6583_v33 }
 0x801   :  { %5078 = vmatprep.subr.bf16.mxu0 %v6586_v26  ;;  %v1851_v29 = vmul.f32 %v5537_v57, %v1850_v2  ;;  %v6656_v57 = vpack.c.bf16 %v2114_v40, %v2113_v61 }
 0x803   :  { %v1852_v7 = vadd.f32 %v1851_v29, %v1849_v20  ;;  %v2115_v29 = vld [vmem:[#allocation11 + $0xa0] sm:$0xff] }
 0x804   :  { %5080 = vmatpush1.bf16.msra.mxu0 %v6589_v17 }
 0x805   :  { %v6594_v53 = vclamps-f32 %v1852_v7, 0.5  ;;  %5106 = vmatprep.subr.bf16.mxu0 %v6463_v6  ;;  %v1894_v6 = vld [vmem:[#allocation11 + $0x8] sm:$0xff] }
 0x806   :  { %v2116_v7 = vld [vmem:[#allocation11 + $0xa8] sm:$0xff] }
 0x807   :  { %1856 = vst [vmem:[#allocation13 + $0x20] sm:$0xff] %v6594_v53  ;;  %2192 = vmatmul.mubr.f32.vlgmr.msra.gmra.mrb[18].mxu0 %v6594_v53 }
 0x808   :  { %5108 = vmatpush1.bf16.msra.mxu0 %v6465_v18  ;;  %2409 = vmatprep.mubr.f32.mxu0 %v5815_v0  ;;  %v6616_v18 = vpack.c.bf16 %v1894_v6, %v1893_v27  ;;  %v6662_v6 = vpack.c.bf16 %v2116_v7, %v2115_v29  ;;  %v2078_v29 = vld [vmem:[#allocation6 + $0x58] sm:$0xff] }
 0x809   :  { %5110 = vmatprep.subr.bf16.mxu0 %v6467_v45  ;;  %v1895_v45 = vld [vmem:[#allocation11 + $0x10] sm:$0xff] }
 0x80a   :  { %5027 = vmatpush3.bf16.msra.mxu1 %v6616_v18 }
 0x80b   :  { %5028 = vmatprep.subr.bf16.mxu1 %v5816_v14 }
 0x80c   :  { %5112 = vmatpush1.bf16.msra.mxu0 %v6471_v63  ;;  %v1896_v63 = vld [vmem:[#allocation11 + $0x18] sm:$0xff] }
 0x80d   :  { %5114 = vmatprep.subr.bf16.mxu0 %v6474_v28  ;;  %v6620_v28 = vpack.c.bf16 %v1896_v63, %v1895_v45  ;;  %v2117_v45 = vld [vmem:[#allocation11 + $0xb0] sm:$0xff]  ;;  %v2118_v63 = vld [vmem:[#allocation11 + $0xb8] sm:$0xff] }
 0x80f   :  { %5030 = vmatpush3.bf16.msra.mxu1 %v6620_v28 }
 0x810   :  { %5116 = vmatpush1.bf16.msra.mxu0 %v6477_v44  ;;  %5031 = vmatprep.subr.bf16.mxu1 %v5816_v14  ;;  %v1897_v44 = vld [vmem:[#allocation11 + $0x20] sm:$0xff] }
 0x811   :  { %5118 = vmatprep.subr.bf16.mxu0 %v6507_v36  ;;  %v1898_v36 = vld [vmem:[#allocation11 + $0x28] sm:$0xff] }
 0x814   :  { %5120 = vmatpush1.bf16.msra.mxu0 %v6509_v59  ;;  %v6624_v59 = vpack.c.bf16 %v1898_v36, %v1897_v44  ;;  %v6666_v44 = vpack.c.bf16 %v2118_v63, %v2117_v45  ;;  %v2119_v36 = vld [vmem:[#allocation11 + $0xc0] sm:$0xff] }
 0x815   :  { %5122 = vmatprep.subr.bf16.mxu0 %v6513_v38  ;;  %v1899_v38 = vld [vmem:[#allocation11 + $0x30] sm:$0xff] }
 0x816   :  { %5033 = vmatpush3.bf16.msra.mxu1 %v6624_v59 }
 0x817   :  { %5034 = vmatprep.subr.bf16.mxu1 %v5816_v14 }
 0x818   :  { %5124 = vmatpush1.bf16.msra.mxu0 %v6515_v56  ;;  %v1900_v56 = vld [vmem:[#allocation11 + $0x38] sm:$0xff] }
 0x819   :  { %5126 = vmatprep.subr.bf16.mxu0 %v6518_v10  ;;  %v6628_v10 = vpack.c.bf16 %v1900_v56, %v1899_v38  ;;  %v2120_v38 = vld [vmem:[#allocation11 + $0xc8] sm:$0xff] }
 0x81a   :  { %v6670_v56 = vpack.c.bf16 %v2120_v38, %v2119_v36  ;;  %v2739_v36 = vld [vmem:[#allocation9 + $0x30] sm:$0xff]  ;;  %v2742_v38 = vld [vmem:[#allocation9 + $0x48] sm:$0xff] }
 0x81b   :  { %5036 = vmatpush3.bf16.msra.mxu1 %v6628_v10 }
 0x81c   :  { %5128 = vmatpush1.bf16.msra.mxu0 %v6521_v11  ;;  %5037 = vmatprep.subr.bf16.mxu1 %v5816_v14  ;;  %v1901_v11 = vld [vmem:[#allocation11 + $0x40] sm:$0xff] }
 0x81d   :  { %5130 = vmatprep.subr.bf16.mxu0 %v6524_v42  ;;  %v1902_v42 = vld [vmem:[#allocation11 + $0x48] sm:$0xff] }
 0x820   :  { %5132 = vmatpush1.bf16.msra.mxu0 %v6527_v39  ;;  %v6632_v39 = vpack.c.bf16 %v1902_v42, %v1901_v11  ;;  %v2121_v11 = vld [vmem:[#allocation11 + $0xd0] sm:$0xff]  ;;  %v2122_v42 = vld [vmem:[#allocation11 + $0xd8] sm:$0xff] }
 0x821   :  { %5134 = vmatprep.subr.bf16.mxu0 %v6530_v50  ;;  %v1903_v50 = vld [vmem:[#allocation11 + $0x50] sm:$0xff]  ;;  %v6674_v24 = vpack.c.bf16 %v2122_v42, %v2121_v11  ;;  %v2744_v11 = vld [vmem:[#allocation9 + $0x58] sm:$0xff] }
 0x822   :  { %5039 = vmatpush3.bf16.msra.mxu1 %v6632_v39 }
 0x823   :  { %5040 = vmatprep.subr.bf16.mxu1 %v5816_v14 }
 0x824   :  { %5136 = vmatpush1.bf16.msra.mxu0 %v6533_v30  ;;  %v1904_v30 = vld [vmem:[#allocation11 + $0x58] sm:$0xff] }
 0x825   :  { %5162 = vmatprep.subr.bf16.mxu0 %v6537_v31  ;;  %v6636_v31 = vpack.c.bf16 %v1904_v30, %v1903_v50 }
 0x827   :  { %5042 = vmatpush3.bf16.msra.mxu1 %v6636_v31 }
 0x828   :  { %5043 = vmatprep.subr.bf16.mxu1 %v5816_v14 }
 0x82b   :  { %5045 = vmatpush3.bf16.msra.mxu1 %v6639_v4 }
 0x82c   :  { %5046 = vmatprep.subr.bf16.mxu1 %v5816_v14 }
 0x82f   :  { %5048 = vmatpush3.bf16.msra.mxu1 %v6643_v12 }
 0x830   :  { %5081 = vmatprep.subr.bf16.mxu1 %v5816_v14 }
 0x8ba   :  { %v6648_v16 = vpop.f32.mrb[16].mxu0 }
 0x8bb   :  { %v1977_v52 = vpop.f32.mrb[17].mxu0 }
 0x8bc   :  { %v1987_v51 = vadd.f32 %v1977_v52, %v1859_v32  ;;  %v2125_v32 = vld [vmem:[#allocation11 + $0xf0] sm:$0xff]  ;;  %v2126_v52 = vld [vmem:[#allocation11 + $0xf8] sm:$0xff] }
 0x8be   :  { %v3690_v62 = vmul.f32 -1.442695, %v1987_v51  ;;  %v6682_v51 = vpack.c.bf16 %v2126_v52, %v2125_v32  ;;  %v2295_v32 = vld [vmem:[#allocation3 + $0x80] sm:$0xff] }
 0x8c0   :  { %5538 = vpow2.f32 %v3690_v62 }
 0x8ca   :  { %v5539_v19 = vpop.eup %5538 }
 0x8cb   :  { %v1991_v22 = vadd.f32 1.0, %v5539_v19 }
 0x8cd   :  { %5540 = vrcp.f32 %v1991_v22  ;;  %v1860_v22 = vld [vmem:[#allocation3 + $0x70] sm:$0xff] }
 0x8d7   :  { %v5541_v49 = vpop.eup %5540 }
 0x8d8   :  { %v1994_v35 = vmul.f32 %v5541_v49, %v6545_v3  ;;  %v2076_v49 = vld [vmem:[#allocation6 + $0x48] sm:$0xff] }
 0x8da   :  { %4298 = vmatmul.mubr.f32.vlgmr.msra.gmra.mrb[16].mxu1 %v1994_v35  ;;  %v6653_v5 = vpop.f32.mrb[18].mxu0 }
 0x8db   :  { %v2195_v2 = vpop.f32.mrb[19].mxu0  ;;  %5083 = vmatpush3.bf16.msra.mxu1 %v6650_v47  ;;  %4332 = vmatprep.mubr.msk.f32.mxu1 %vm5817_vm0, %v5815_v0 }
 0x8dc   :  { %v2205_v20 = vadd.f32 %v2195_v2, %v2077_v13  ;;  %5084 = vmatprep.subr.bf16.mxu1 %v5816_v14 }
 0x8de   :  { %v3693_v27 = vmul.f32 -1.442695, %v2205_v20 }
 0x8df   :  { %5086 = vmatpush3.bf16.msra.mxu1 %v6656_v57 }
 0x8e0   :  { %5542 = vpow2.f32 %v3693_v27  ;;  %5087 = vmatprep.subr.bf16.mxu1 %v5816_v14 }
 0x8e3   :  { %5089 = vmatpush3.bf16.msra.mxu1 %v6662_v6 }
 0x8e4   :  { %5090 = vmatprep.subr.bf16.mxu1 %v5816_v14 }
 0x8e7   :  { %5092 = vmatpush3.bf16.msra.mxu1 %v6666_v44 }
 0x8e8   :  { %5093 = vmatprep.subr.bf16.mxu1 %v5816_v14 }
 0x8ea   :  { %v5543_v50 = vpop.eup %5542 }
 0x8eb   :  { %v2209_v30 = vadd.f32 1.0, %v5543_v50  ;;  %5095 = vmatpush3.bf16.msra.mxu1 %v6670_v56  ;;  %v6746_v50 = vpack.c.bf16 %v2744_v11, %v2742_v38  ;;  %v2294_v11 = vld [vmem:[#allocation3 + $0x78] sm:$0xff] }
 0x8ec   :  { %5096 = vmatprep.subr.bf16.mxu1 %v5816_v14 }
 0x8ed   :  { %5544 = vrcp.f32 %v2209_v30  ;;  %v2741_v30 = vld [vmem:[#allocation9 + $0x40] sm:$0xff] }
 0x8ee   :  { %v6749_v58 = vpack.c.bf16 %v2743_v54, %v2741_v30 }
 0x8ef   :  { %5098 = vmatpush3.bf16.msra.mxu1 %v6674_v24 }
 0x8f0   :  { %5099 = vmatprep.subr.bf16.mxu1 %v5816_v14 }
 0x8f3   :  { %5101 = vmatpush3.bf16.msra.mxu1 %v6678_v43 }
 0x8f4   :  { %5102 = vmatprep.subr.bf16.mxu1 %v5816_v14 }
 0x8f7   :  { %v5545_v62 = vpop.eup %5544  ;;  %5104 = vmatpush3.bf16.msra.mxu1 %v6682_v51 }
 0x8f8   :  { %v2212_v19 = vmul.f32 %v5545_v62, %v6594_v53  ;;  %5137 = vmatprep.subr.bf16.mxu1 %v5816_v14 }
 0x8fa   :  { %4333 = vmatmul.mubr.f32.vlgmr.msra.gmra.mrb[18].mxu1 %v2212_v19 }
 0x8fb   :  { %5139 = vmatpush3.bf16.msra.mxu1 %v6616_v18  ;;  %4367 = vmatprep.mubr.msk.f32.mxu1 %vm5817_vm0, %v5815_v0  ;;  %v1858_v18 = vld [vmem:[#allocation3 + $0x60] sm:$0xff] }
 0x8fc   :  { %5140 = vmatprep.subr.bf16.mxu1 %v5816_v14 }
 0x8ff   :  { %5142 = vmatpush3.bf16.msra.mxu1 %v6620_v28  ;;  %v1980_v28 = vadd.f32 %v6648_v16, %v1858_v18 }
 0x900   :  { %5143 = vmatprep.subr.bf16.mxu1 %v5816_v14 }
 0x903   :  { %5145 = vmatpush3.bf16.msra.mxu1 %v6624_v59  ;;  %v3689_v59 = vmul.f32 -1.442695, %v1980_v28 }
 0x904   :  { %5146 = vmatprep.subr.bf16.mxu1 %v5816_v14 }
 0x905   :  { %5546 = vpow2.f32 %v3689_v59 }
 0x907   :  { %5148 = vmatpush3.bf16.msra.mxu1 %v6628_v10 }
 0x908   :  { %5149 = vmatprep.subr.bf16.mxu1 %v5816_v14 }
 0x90b   :  { %5151 = vmatpush3.bf16.msra.mxu1 %v6632_v39 }
 0x90c   :  { %5152 = vmatprep.subr.bf16.mxu1 %v5816_v14 }
 0x90f   :  { %5154 = vmatpush3.bf16.msra.mxu1 %v6636_v31  ;;  %v5547_v10 = vpop.eup %5546 }
 0x910   :  { %5155 = vmatprep.subr.bf16.mxu1 %v5816_v14  ;;  %v1984_v39 = vadd.f32 1.0, %v5547_v10 }
 0x912   :  { %5548 = vrcp.f32 %v1984_v39 }
 0x913   :  { %5157 = vmatpush3.bf16.msra.mxu1 %v6639_v4  ;;  %v2198_v4 = vadd.f32 %v6653_v5, %v2076_v49 }
 0x914   :  { %5158 = vmatprep.subr.bf16.mxu1 %v5816_v14 }
 0x917   :  { %5160 = vmatpush3.bf16.msra.mxu1 %v6643_v12  ;;  %v3692_v12 = vmul.f32 -1.442695, %v2198_v4 }
 0x918   :  { %5193 = vmatprep.subr.bf16.mxu1 %v5816_v14 }
 0x91c   :  { %v5549_v35 = vpop.eup %5548 }
 0x91d   :  { %v2068_v61 = vsub.f32 1.0, %v5549_v35  ;;  %v2067_v16 = vmul.f32 %v5549_v35, %v6545_v3  ;;  %v2745_v35 = vld [vmem:[#allocation9 + $0x60] sm:$0xff] }
 0x9ad   :  { %v2061_v31 = vpop.f32.mrb[16].mxu1 }
 0x9ae   :  { %v2065_v23 = vadd.f32 %v2061_v31, %v1860_v22  ;;  %v4299_v60 = vpop.f32.mrb[17].mxu1  ;;  %v2513_v22 = vld [vmem:[#allocation6 + $0x38] sm:$0xff] }
 0x9b0   :  { %5550 = vtanh.f32 %v2065_v23 }
 0x9b1   :  { %5552 = vpow2.f32 %v3692_v12  ;;  %v2747_v12 = vld [vmem:[#allocation9 + $0x70] sm:$0xff] }
 0x9ba   :  { %v5551_v40 = vpop.eup %5550 }
 0x9bb   :  { %v2069_v13 = vmul.f32 %v5551_v40, %v2068_v61  ;;  %v5553_v5 = vpop.eup %5552  ;;  %v2752_v61 = vld [vmem:[#allocation9 + $0x98] sm:$0xff] }
 0x9bc   :  { %v2202_v3 = vadd.f32 1.0, %v5553_v5  ;;  %v2754_v5 = vld [vmem:[#allocation9 + $0xa8] sm:$0xff] }
 0x9bd   :  { %v2070_v2 = vadd.f32 %v2069_v13, %v2067_v16  ;;  %v2749_v16 = vld [vmem:[#allocation9 + $0x80] sm:$0xff]  ;;  %v2751_v13 = vld [vmem:[#allocation9 + $0x90] sm:$0xff] }
 0x9be   :  { %5554 = vrcp.f32 %v2202_v3  ;;  %v2756_v3 = vld [vmem:[#allocation9 + $0xb8] sm:$0xff] }
 0x9bf   :  { %v6709_v20 = vclamps-f32 %v2070_v2, 0.5  ;;  %v6787_v2 = vpack.c.bf16 %v2751_v13, %v2749_v16  ;;  %v2960_v16 = vld [vmem:[#allocation9 + $0x148] sm:$0xff]  ;;  %v2962_v13 = vld [vmem:[#allocation9 + $0x158] sm:$0xff] }
 0x9c1   :  { %2074 = vst [vmem:[#allocation12 + $0x20] sm:$0xff] %v6709_v20  ;;  %2410 = vmatmul.mubr.f32.vlgmr.msra.gmra.mrb[20].mxu0 %v6709_v20 }
 0x9c2   :  { %5164 = vmatpush1.bf16.msra.mxu0 %v6543_v8  ;;  %2627 = vmatprep.mubr.f32.mxu0 %v5815_v0 }
 0x9c3   :  { %5166 = vmatprep.subr.bf16.mxu0 %v6547_v21 }
 0x9c6   :  { %5168 = vmatpush1.bf16.msra.mxu0 %v6552_v15 }
 0x9c7   :  { %5170 = vmatprep.subr.bf16.mxu0 %v6556_v34 }
 0x9c8   :  { %v5555_v8 = vpop.eup %5554 }
 0x9c9   :  { %v2286_v21 = vsub.f32 1.0, %v5555_v8  ;;  %v2285_v34 = vmul.f32 %v5555_v8, %v6594_v53  ;;  %v2760_v8 = vld [vmem:[#allocation9 + $0xd8] sm:$0xff] }
 0x9ca   :  { %5172 = vmatpush1.bf16.msra.mxu0 %v6559_v37 }
 0x9cb   :  { %5174 = vmatprep.subr.bf16.mxu0 %v6562_v1 }
 0x9cd   :  { %v2279_v7 = vpop.f32.mrb[18].mxu1 }
 0x9ce   :  { %v2283_v27 = vadd.f32 %v2279_v7, %v2078_v29  ;;  %v4334_v45 = vpop.f32.mrb[19].mxu1  ;;  %5176 = vmatpush1.bf16.msra.mxu0 %v6565_v55  ;;  %v2753_v29 = vld [vmem:[#allocation9 + $0xa0] sm:$0xff]  ;;  %v6790_v7 = vpack.c.bf16 %v2756_v3, %v2754_v5  ;;  %v6828_v5 = vpack.c.bf16 %v2962_v13, %v2960_v16  ;;  %v2981_v13 = vld [vmem:[#allocation9 + $0x1f0] sm:$0xff] }
 0x9cf   :  { %5178 = vmatprep.subr.bf16.mxu0 %v6568_v46  ;;  %v2734_v46 = vld [vmem:[#allocation9 + $0x8] sm:$0xff]  ;;  %v2959_v3 = vld [vmem:[#allocation9 + $0x140] sm:$0xff] }
 0x9d0   :  { %5556 = vtanh.f32 %v2283_v27  ;;  %v2755_v27 = vld [vmem:[#allocation9 + $0xb0] sm:$0xff]  ;;  %v2758_v45 = vld [vmem:[#allocation9 + $0xc8] sm:$0xff]  ;;  %v2979_v16 = vld [vmem:[#allocation9 + $0x1e0] sm:$0xff] }
 0x9d2   :  { %5180 = vmatpush1.bf16.msra.mxu0 %v6571_v48  ;;  %v2736_v48 = vld [vmem:[#allocation9 + $0x18] sm:$0xff] }
 0x9d3   :  { %5182 = vmatprep.subr.bf16.mxu0 %v6574_v25  ;;  %v2733_v25 = vld [vmem:[#allocation9] sm:$0xff] }
 0x9d6   :  { %5184 = vmatpush1.bf16.msra.mxu0 %v6577_v9  ;;  %v6735_v9 = vpack.c.bf16 %v2736_v48, %v2734_v46  ;;  %v2764_v46 = vld [vmem:[#allocation9 + $0xf8] sm:$0xff] }
 0x9d7   :  { %5186 = vmatprep.subr.bf16.mxu0 %v6580_v41  ;;  %v2735_v41 = vld [vmem:[#allocation9 + $0x10] sm:$0xff] }
 0x9d8   :  { %v6737_v53 = vpack.c.bf16 %v2735_v41, %v2733_v25  ;;  %v2761_v41 = vld [vmem:[#allocation9 + $0xe0] sm:$0xff] }
 0x9da   :  { %v5557_v15 = vpop.eup %5556  ;;  %5188 = vmatpush1.bf16.msra.mxu0 %v6583_v33  ;;  %v2738_v33 = vld [vmem:[#allocation9 + $0x28] sm:$0xff] }
 0x9db   :  { %5190 = vmatprep.subr.bf16.mxu0 %v6586_v26  ;;  %v2287_v37 = vmul.f32 %v5557_v15, %v2286_v21  ;;  %v2740_v26 = vld [vmem:[#allocation9 + $0x38] sm:$0xff]  ;;  %v6793_v21 = vpack.c.bf16 %v2755_v27, %v2753_v29  ;;  %v6796_v15 = vpack.c.bf16 %v2760_v8, %v2758_v45  ;;  %v2961_v29 = vld [vmem:[#allocation9 + $0x150] sm:$0xff]  ;;  %v2964_v27 = vld [vmem:[#allocation9 + $0x168] sm:$0xff] }
 0x9dc   :  { %v6739_v63 = vpack.c.bf16 %v2740_v26, %v2738_v33  ;;  %v2763_v33 = vld [vmem:[#allocation9 + $0xf0] sm:$0xff]  ;;  %v2966_v45 = vld [vmem:[#allocation9 + $0x178] sm:$0xff] }
 0x9dd   :  { %v2288_v1 = vadd.f32 %v2287_v37, %v2285_v34  ;;  %v2757_v34 = vld [vmem:[#allocation9 + $0xc0] sm:$0xff]  ;;  %v2759_v37 = vld [vmem:[#allocation9 + $0xd0] sm:$0xff]  ;;  %v6805_v26 = vpack.c.bf16 %v2763_v33, %v2761_v41  ;;  %v2968_v33 = vld [vmem:[#allocation9 + $0x188] sm:$0xff] }
 0x9de   :  { %5192 = vmatpush1.bf16.msra.mxu0 %v6589_v17  ;;  %v2737_v17 = vld [vmem:[#allocation9 + $0x20] sm:$0xff]  ;;  %v6799_v48 = vpack.c.bf16 %v2759_v37, %v2757_v34  ;;  %v6831_v34 = vpack.c.bf16 %v2961_v29, %v2959_v3  ;;  %v6834_v37 = vpack.c.bf16 %v2966_v45, %v2964_v27  ;;  %v6861_v27 = vpack.c.bf16 %v2981_v13, %v2979_v16  ;;  %v2949_v16 = vld [vmem:[#allocation6 + $0x20] sm:$0xff] }
 0x9df   :  { %v6730_v55 = vclamps-f32 %v2288_v1, 0.5  ;;  %5218 = vmatprep.subr.bf16.mxu0 %v6735_v9  ;;  %v6743_v42 = vpack.c.bf16 %v2739_v36, %v2737_v17  ;;  %v2762_v1 = vld [vmem:[#allocation9 + $0xe8] sm:$0xff]  ;;  %v2954_v36 = vld [vmem:[#allocation9 + $0x118] sm:$0xff] }
 0x9e0   :  { %v6802_v25 = vpack.c.bf16 %v2764_v46, %v2762_v1  ;;  %v2952_v17 = vld [vmem:[#allocation9 + $0x108] sm:$0xff]  ;;  %v2963_v1 = vld [vmem:[#allocation9 + $0x160] sm:$0xff]  ;;  %v2965_v46 = vld [vmem:[#allocation9 + $0x170] sm:$0xff] }
 0x9e1   :  { %2292 = vst [vmem:[#allocation13 + $0x18] sm:$0xff] %v6730_v55  ;;  %2628 = vmatmul.mubr.f32.vlgmr.msra.gmra.mrb[22].mxu0 %v6730_v55  ;;  %v6809_v38 = vpack.c.bf16 %v2954_v36, %v2952_v17  ;;  %v2970_v17 = vld [vmem:[#allocation9 + $0x198] sm:$0xff]  ;;  %v6837_v36 = vpack.c.bf16 %v2965_v46, %v2963_v1 }
 0x9e2   :  { %2845 = vmatprep.mubr.f32.mxu0 %v5815_v0  ;;  %5220 = vmatpush1.bf16.msra.mxu0 %v6737_v53 }
 0x9e3   :  { %5222 = vmatprep.subr.bf16.mxu0 %v6739_v63 }
 0x9e6   :  { %5224 = vmatpush1.bf16.msra.mxu0 %v6743_v42 }
 0x9e7   :  { %5226 = vmatprep.subr.bf16.mxu0 %v6746_v50 }
 0x9ea   :  { %5228 = vmatpush1.bf16.msra.mxu0 %v6749_v58 }
 0xa94   :  { %v6753_v52 = vpop.f32.mrb[20].mxu0 }
 0xa95   :  { %v2413_v62 = vpop.f32.mrb[21].mxu0  ;;  %v2416_v30 = vadd.f32 %v6753_v52, %v2294_v11  ;;  %v2514_v11 = vld [vmem:[#allocation6 + $0x40] sm:$0xff] }
 0xa96   :  { %v2423_v19 = vadd.f32 %v2413_v62, %v2295_v32 }
 0xa97   :  { %v3695_v54 = vmul.f32 -1.442695, %v2416_v30  ;;  %v6840_v30 = vpack.c.bf16 %v2970_v17, %v2968_v33  ;;  %v2778_v33 = vld [vmem:[#allocation11 + $0x68] sm:$0xff] }
 0xa98   :  { %v3696_v18 = vmul.f32 -1.442695, %v2423_v19  ;;  %v2296_v19 = vld [vmem:[#allocation3 + $0x88] sm:$0xff] }
 0xa9a   :  { %5558 = vpow2.f32 %v3696_v18 }
 0xaa4   :  { %v5559_v28 = vpop.eup %5558 }
 0xaa5   :  { %v2427_v59 = vadd.f32 1.0, %v5559_v28 }
 0xaa7   :  { %5560 = vrcp.f32 %v2427_v59 }
 0xab1   :  { %v5561_v10 = vpop.eup %5560 }
 0xab2   :  { %v2430_v39 = vmul.f32 %v5561_v10, %v6709_v20  ;;  %v2512_v10 = vld [vmem:[#allocation6 + $0x30] sm:$0xff] }
 0xab4   :  { %4368 = vmatmul.mubr.f32.vlgmr.msra.gmra.mrb[20].mxu1 %v2430_v39  ;;  %v6756_v31 = vpop.f32.mrb[22].mxu0 }
 0xab5   :  { %v2631_v23 = vpop.f32.mrb[23].mxu0  ;;  %5195 = vmatpush3.bf16.msra.mxu1 %v6650_v47  ;;  %4402 = vmatprep.mubr.msk.f32.mxu1 %vm5817_vm0, %v5815_v0  ;;  %v2634_v39 = vadd.f32 %v6756_v31, %v2512_v10  ;;  %v2955_v31 = vld [vmem:[#allocation9 + $0x120] sm:$0xff] }
 0xab6   :  { %v2641_v60 = vadd.f32 %v2631_v23, %v2513_v22  ;;  %5196 = vmatprep.subr.bf16.mxu1 %v5816_v14 }
 0xab7   :  { %v3698_v23 = vmul.f32 -1.442695, %v2634_v39 }
 0xab8   :  { %v3699_v49 = vmul.f32 -1.442695, %v2641_v60 }
 0xab9   :  { %5198 = vmatpush3.bf16.msra.mxu1 %v6656_v57 }
 0xaba   :  { %5562 = vpow2.f32 %v3699_v49  ;;  %5199 = vmatprep.subr.bf16.mxu1 %v5816_v14 }
 0xabd   :  { %5201 = vmatpush3.bf16.msra.mxu1 %v6662_v6 }
 0xabe   :  { %5202 = vmatprep.subr.bf16.mxu1 %v5816_v14 }
 0xac1   :  { %5204 = vmatpush3.bf16.msra.mxu1 %v6666_v44  ;;  %v2746_v44 = vld [vmem:[#allocation9 + $0x68] sm:$0xff] }
 0xac2   :  { %5205 = vmatprep.subr.bf16.mxu1 %v5816_v14 }
 0xac4   :  { %v5563_v47 = vpop.eup %5562 }
 0xac5   :  { %v2645_v4 = vadd.f32 1.0, %v5563_v47  ;;  %5207 = vmatpush3.bf16.msra.mxu1 %v6670_v56  ;;  %v2748_v56 = vld [vmem:[#allocation9 + $0x78] sm:$0xff] }
 0xac6   :  { %5208 = vmatprep.subr.bf16.mxu1 %v5816_v14 }
 0xac7   :  { %5564 = vrcp.f32 %v2645_v4  ;;  %v2951_v4 = vld [vmem:[#allocation9 + $0x100] sm:$0xff] }
 0xac8   :  { %5566 = vpow2.f32 %v3695_v54  ;;  %v2967_v54 = vld [vmem:[#allocation9 + $0x180] sm:$0xff] }
 0xac9   :  { %5210 = vmatpush3.bf16.msra.mxu1 %v6674_v24  ;;  %v6779_v24 = vpack.c.bf16 %v2748_v56, %v2746_v44  ;;  %v2958_v44 = vld [vmem:[#allocation9 + $0x138] sm:$0xff] }
 0xaca   :  { %5211 = vmatprep.subr.bf16.mxu1 %v5816_v14 }
 0xacb   :  { %5230 = vmatprep.subr.bf16.mxu0 %v6779_v24 }
 0xacd   :  { %5213 = vmatpush3.bf16.msra.mxu1 %v6678_v43  ;;  %v6781_v43 = vpack.c.bf16 %v2747_v12, %v2745_v35 }
 0xace   :  { %5214 = vmatprep.subr.bf16.mxu1 %v5816_v14 }
 0xacf   :  { %5232 = vmatpush1.bf16.msra.mxu0 %v6781_v43 }
 0xad1   :  { %v5565_v57 = vpop.eup %5564  ;;  %5216 = vmatpush3.bf16.msra.mxu1 %v6682_v51  ;;  %v2750_v51 = vld [vmem:[#allocation9 + $0x88] sm:$0xff] }
 0xad2   :  { %v2648_v6 = vmul.f32 %v5565_v57, %v6730_v55  ;;  %5249 = vmatprep.subr.bf16.mxu1 %v5816_v14  ;;  %v6785_v40 = vpack.c.bf16 %v2752_v61, %v2750_v51  ;;  %v5567_v32 = vpop.eup %5566  ;;  %v2953_v57 = vld [vmem:[#allocation9 + $0x110] sm:$0xff] }
 0xad3   :  { %v2420_v62 = vadd.f32 1.0, %v5567_v32  ;;  %v6815_v35 = vpack.c.bf16 %v2953_v57, %v2951_v4  ;;  %v2957_v61 = vld [vmem:[#allocation9 + $0x130] sm:$0xff]  ;;  %v2975_v4 = vld [vmem:[#allocation9 + $0x1c0] sm:$0xff] }
 0xad4   :  { %4403 = vmatmul.mubr.f32.vlgmr.msra.gmra.mrb[22].mxu1 %v2648_v6  ;;  %5234 = vmatprep.subr.bf16.mxu0 %v6785_v40  ;;  %v2956_v6 = vld [vmem:[#allocation9 + $0x128] sm:$0xff]  ;;  %v2969_v32 = vld [vmem:[#allocation9 + $0x190] sm:$0xff] }
 0xad5   :  { %4437 = vmatprep.mubr.msk.f32.mxu1 %vm5817_vm0, %v5815_v0  ;;  %5236 = vmatpush1.bf16.msra.mxu0 %v6787_v2  ;;  %5568 = vrcp.f32 %v2420_v62  ;;  %v6819_v51 = vpack.c.bf16 %v2958_v44, %v2956_v6  ;;  %v2972_v62 = vld [vmem:[#allocation9 + $0x1a8] sm:$0xff]  ;;  %v6843_v10 = vpack.c.bf16 %v2969_v32, %v2967_v54  ;;  %v2977_v57 = vld [vmem:[#allocation9 + $0x1d0] sm:$0xff]  ;;  %v2982_v44 = vld [vmem:[#allocation9 + $0x1f8] sm:$0xff] }
 0xad6   :  { %5238 = vmatprep.subr.bf16.mxu0 %v6790_v7  ;;  %v2980_v6 = vld [vmem:[#allocation9 + $0x1e8] sm:$0xff]  ;;  %v2780_v54 = vld [vmem:[#allocation11 + $0x78] sm:$0xff] }
 0xad9   :  { %5240 = vmatpush1.bf16.msra.mxu0 %v6793_v21 }
 0xada   :  { %5242 = vmatprep.subr.bf16.mxu0 %v6796_v15 }
 0xadd   :  { %5244 = vmatpush1.bf16.msra.mxu0 %v6799_v48 }
 0xade   :  { %5246 = vmatprep.subr.bf16.mxu0 %v6802_v25 }
 0xadf   :  { %v5569_v22 = vpop.eup %5568 }
 0xae0   :  { %v2504_v60 = vsub.f32 1.0, %v5569_v22  ;;  %v2503_v52 = vmul.f32 %v5569_v22, %v6709_v20  ;;  %v6824_v20 = vpack.c.bf16 %v2957_v61, %v2955_v31  ;;  %v2971_v22 = vld [vmem:[#allocation9 + $0x1a0] sm:$0xff]  ;;  %v6855_v31 = vpack.c.bf16 %v2977_v57, %v2975_v4 }
 0xae1   :  { %5248 = vmatpush1.bf16.msra.mxu0 %v6805_v26  ;;  %v6858_v61 = vpack.c.bf16 %v2982_v44, %v2980_v6  ;;  %v2985_v44 = vld [vmem:[#allocation11 + $0x90] sm:$0xff] }
 0xae2   :  { %5274 = vmatprep.subr.bf16.mxu0 %v6809_v38 }
 0xb87   :  { %v2497_v18 = vpop.f32.mrb[20].mxu1 }
 0xb88   :  { %v2501_v28 = vadd.f32 %v2497_v18, %v2296_v19  ;;  %v4369_v59 = vpop.f32.mrb[21].mxu1  ;;  %v2974_v19 = vld [vmem:[#allocation9 + $0x1b8] sm:$0xff] }
 0xb89   :  { %v6846_v39 = vpack.c.bf16 %v2974_v19, %v2972_v62  ;;  %v2731_v62 = vld [vmem:[#allocation3 + $0x98] sm:$0xff] }
 0xb8a   :  { %5570 = vtanh.f32 %v2501_v28 }
 0xb8b   :  { %5572 = vpow2.f32 %v3698_v23  ;;  %v2973_v23 = vld [vmem:[#allocation9 + $0x1b0] sm:$0xff] }
 0xb94   :  { %v5571_v49 = vpop.eup %5570 }
 0xb95   :  { %v2505_v47 = vmul.f32 %v5571_v49, %v2504_v60  ;;  %v5573_v8 = vpop.eup %5572  ;;  %v2976_v60 = vld [vmem:[#allocation9 + $0x1c8] sm:$0xff]  ;;  %v2978_v49 = vld [vmem:[#allocation9 + $0x1d8] sm:$0xff] }
 0xb96   :  { %v2638_v41 = vadd.f32 1.0, %v5573_v8 }
 0xb97   :  { %v2506_v56 = vadd.f32 %v2505_v47, %v2503_v52  ;;  %v6849_v52 = vpack.c.bf16 %v2973_v23, %v2971_v22  ;;  %v6852_v47 = vpack.c.bf16 %v2978_v49, %v2976_v60  ;;  %v2983_v60 = vld [vmem:[#allocation11 + $0x80] sm:$0xff]  ;;  %v2984_v49 = vld [vmem:[#allocation11 + $0x88] sm:$0xff] }
 0xb98   :  { %5574 = vrcp.f32 %v2638_v41  ;;  %v2777_v41 = vld [vmem:[#allocation11 + $0x60] sm:$0xff]  ;;  %v6922_v57 = vpack.c.bf16 %v2984_v49, %v2983_v60 }
 0xb99   :  { %v6817_v12 = vclamps-f32 %v2506_v56, 0.5  ;;  %v6911_v17 = vpack.c.bf16 %v2778_v33, %v2777_v41  ;;  %v2995_v33 = vld [vmem:[#allocation11 + $0xe0] sm:$0xff] }
 0xb9b   :  { %2510 = vst [vmem:[#allocation12 + $0x28] sm:$0xff] %v6817_v12  ;;  %2846 = vmatmul.mubr.f32.vlgmr.msra.gmra.mrb[24].mxu0 %v6817_v12 }
 0xb9c   :  { %5276 = vmatpush1.bf16.msra.mxu0 %v6815_v35  ;;  %3063 = vmatprep.mubr.f32.mxu0 %v5815_v0 }
 0xb9d   :  { %5278 = vmatprep.subr.bf16.mxu0 %v6819_v51 }
 0xba0   :  { %5280 = vmatpush1.bf16.msra.mxu0 %v6824_v20 }
 0xba1   :  { %5282 = vmatprep.subr.bf16.mxu0 %v6828_v5 }
 0xba2   :  { %v5575_v56 = vpop.eup %5574 }
 0xba3   :  { %v2722_v3 = vsub.f32 1.0, %v5575_v56  ;;  %v2721_v45 = vmul.f32 %v5575_v56, %v6730_v55  ;;  %v2765_v55 = vld [vmem:[#allocation11] sm:$0xff]  ;;  %v2986_v56 = vld [vmem:[#allocation11 + $0x98] sm:$0xff] }
 0xba4   :  { %5284 = vmatpush1.bf16.msra.mxu0 %v6831_v34 }
 0xba5   :  { %5286 = vmatprep.subr.bf16.mxu0 %v6834_v37 }
 0xba7   :  { %v2715_v18 = vpop.f32.mrb[22].mxu1 }
 0xba8   :  { %v2719_v28 = vadd.f32 %v2715_v18, %v2514_v11  ;;  %v4404_v59 = vpop.f32.mrb[23].mxu1  ;;  %5288 = vmatpush1.bf16.msra.mxu0 %v6837_v36  ;;  %v2779_v11 = vld [vmem:[#allocation11 + $0x70] sm:$0xff] }
 0xba9   :  { %5290 = vmatprep.subr.bf16.mxu0 %v6840_v30  ;;  %v6915_v32 = vpack.c.bf16 %v2780_v54, %v2779_v11  ;;  %v2996_v11 = vld [vmem:[#allocation11 + $0xe8] sm:$0xff] }
 0xbaa   :  { %5576 = vtanh.f32 %v2719_v28  ;;  %v6950_v54 = vpack.c.bf16 %v2996_v11, %v2995_v33  ;;  %v3168_v11 = vld [vmem:[#allocation3 + $0xb8] sm:$0xff] }
 0xbac   :  { %5292 = vmatpush1.bf16.msra.mxu0 %v6843_v10 }
 0xbad   :  { %5294 = vmatprep.subr.bf16.mxu0 %v6846_v39 }
 0xbb0   :  { %5296 = vmatpush1.bf16.msra.mxu0 %v6849_v52 }
 0xbb1   :  { %5298 = vmatprep.subr.bf16.mxu0 %v6852_v47 }
 0xbb4   :  { %v5577_v29 = vpop.eup %5576  ;;  %5300 = vmatpush1.bf16.msra.mxu0 %v6855_v31 }
 0xbb5   :  { %5302 = vmatprep.subr.bf16.mxu0 %v6858_v61  ;;  %v2723_v8 = vmul.f32 %v5577_v29, %v2722_v3  ;;  %v6928_v29 = vpack.c.bf16 %v2986_v56, %v2985_v44 }
 0xbb7   :  { %v2724_v1 = vadd.f32 %v2723_v8, %v2721_v45  ;;  %v2987_v8 = vld [vmem:[#allocation11 + $0xa0] sm:$0xff] }
 0xbb8   :  { %5304 = vmatpush1.bf16.msra.mxu0 %v6861_v27 }
 0xbb9   :  { %v6866_v46 = vclamps-f32 %v2724_v1, 0.5  ;;  %5330 = vmatprep.subr.bf16.mxu0 %v6735_v9  ;;  %v2766_v9 = vld [vmem:[#allocation11 + $0x8] sm:$0xff] }
 0xbba   :  { %v2988_v1 = vld [vmem:[#allocation11 + $0xa8] sm:$0xff] }
 0xbbb   :  { %2728 = vst [vmem:[#allocation13 + $0x10] sm:$0xff] %v6866_v46  ;;  %3064 = vmatmul.mubr.f32.vlgmr.msra.gmra.mrb[26].mxu0 %v6866_v46 }
 0xbbc   :  { %5332 = vmatpush1.bf16.msra.mxu0 %v6737_v53  ;;  %3281 = vmatprep.mubr.f32.mxu0 %v5815_v0  ;;  %v6888_v53 = vpack.c.bf16 %v2766_v9, %v2765_v55  ;;  %v6934_v9 = vpack.c.bf16 %v2988_v1, %v2987_v8  ;;  %v2950_v8 = vld [vmem:[#allocation6 + $0x28] sm:$0xff] }
 0xbbd   :  { %5334 = vmatprep.subr.bf16.mxu0 %v6739_v63  ;;  %v2767_v63 = vld [vmem:[#allocation11 + $0x10] sm:$0xff] }
 0xbbe   :  { %5251 = vmatpush3.bf16.msra.mxu1 %v6888_v53 }
 0xbbf   :  { %5252 = vmatprep.subr.bf16.mxu1 %v5816_v14 }
 0xbc0   :  { %5336 = vmatpush1.bf16.msra.mxu0 %v6743_v42  ;;  %v2768_v42 = vld [vmem:[#allocation11 + $0x18] sm:$0xff] }
 0xbc1   :  { %5338 = vmatprep.subr.bf16.mxu0 %v6746_v50  ;;  %v6892_v50 = vpack.c.bf16 %v2768_v42, %v2767_v63  ;;  %v2989_v63 = vld [vmem:[#allocation11 + $0xb0] sm:$0xff]  ;;  %v2990_v42 = vld [vmem:[#allocation11 + $0xb8] sm:$0xff] }
 0xbc3   :  { %5254 = vmatpush3.bf16.msra.mxu1 %v6892_v50 }
 0xbc4   :  { %5340 = vmatpush1.bf16.msra.mxu0 %v6749_v58  ;;  %5255 = vmatprep.subr.bf16.mxu1 %v5816_v14  ;;  %v2769_v58 = vld [vmem:[#allocation11 + $0x20] sm:$0xff] }
 0xbc5   :  { %5342 = vmatprep.subr.bf16.mxu0 %v6779_v24  ;;  %v2770_v24 = vld [vmem:[#allocation11 + $0x28] sm:$0xff] }
 0xbc8   :  { %5344 = vmatpush1.bf16.msra.mxu0 %v6781_v43  ;;  %v6896_v43 = vpack.c.bf16 %v2770_v24, %v2769_v58  ;;  %v6938_v58 = vpack.c.bf16 %v2990_v42, %v2989_v63  ;;  %v2991_v24 = vld [vmem:[#allocation11 + $0xc0] sm:$0xff] }
 0xbc9   :  { %5346 = vmatprep.subr.bf16.mxu0 %v6785_v40  ;;  %v2771_v40 = vld [vmem:[#allocation11 + $0x30] sm:$0xff] }
 0xbca   :  { %5257 = vmatpush3.bf16.msra.mxu1 %v6896_v43 }
 0xbcb   :  { %5258 = vmatprep.subr.bf16.mxu1 %v5816_v14 }
 0xbcc   :  { %5348 = vmatpush1.bf16.msra.mxu0 %v6787_v2  ;;  %v2772_v2 = vld [vmem:[#allocation11 + $0x38] sm:$0xff] }
 0xbcd   :  { %5350 = vmatprep.subr.bf16.mxu0 %v6790_v7  ;;  %v6900_v7 = vpack.c.bf16 %v2772_v2, %v2771_v40  ;;  %v2992_v40 = vld [vmem:[#allocation11 + $0xc8] sm:$0xff] }
 0xbce   :  { %v6942_v2 = vpack.c.bf16 %v2992_v40, %v2991_v24  ;;  %v3384_v24 = vld [vmem:[#allocation6 + $0x8] sm:$0xff] }
 0xbcf   :  { %5260 = vmatpush3.bf16.msra.mxu1 %v6900_v7 }
 0xbd0   :  { %5352 = vmatpush1.bf16.msra.mxu0 %v6793_v21  ;;  %5261 = vmatprep.subr.bf16.mxu1 %v5816_v14  ;;  %v2773_v21 = vld [vmem:[#allocation11 + $0x40] sm:$0xff] }
 0xbd1   :  { %5354 = vmatprep.subr.bf16.mxu0 %v6796_v15  ;;  %v2774_v15 = vld [vmem:[#allocation11 + $0x48] sm:$0xff] }
 0xbd4   :  { %5356 = vmatpush1.bf16.msra.mxu0 %v6799_v48  ;;  %v6904_v48 = vpack.c.bf16 %v2774_v15, %v2773_v21  ;;  %v2993_v21 = vld [vmem:[#allocation11 + $0xd0] sm:$0xff]  ;;  %v2994_v15 = vld [vmem:[#allocation11 + $0xd8] sm:$0xff] }
 0xbd5   :  { %5358 = vmatprep.subr.bf16.mxu0 %v6802_v25  ;;  %v2775_v25 = vld [vmem:[#allocation11 + $0x50] sm:$0xff]  ;;  %v6946_v41 = vpack.c.bf16 %v2994_v15, %v2993_v21 }
 0xbd6   :  { %5263 = vmatpush3.bf16.msra.mxu1 %v6904_v48 }
 0xbd7   :  { %5264 = vmatprep.subr.bf16.mxu1 %v5816_v14 }
 0xbd8   :  { %5360 = vmatpush1.bf16.msra.mxu0 %v6805_v26  ;;  %v2776_v26 = vld [vmem:[#allocation11 + $0x58] sm:$0xff] }
 0xbd9   :  { %5386 = vmatprep.subr.bf16.mxu0 %v6809_v38  ;;  %v6908_v38 = vpack.c.bf16 %v2776_v26, %v2775_v25 }
 0xbdb   :  { %5266 = vmatpush3.bf16.msra.mxu1 %v6908_v38 }
 0xbdc   :  { %5267 = vmatprep.subr.bf16.mxu1 %v5816_v14 }
 0xbdf   :  { %5269 = vmatpush3.bf16.msra.mxu1 %v6911_v17 }
 0xbe0   :  { %5270 = vmatprep.subr.bf16.mxu1 %v5816_v14 }
 0xbe3   :  { %5272 = vmatpush3.bf16.msra.mxu1 %v6915_v32 }
 0xbe4   :  { %5305 = vmatprep.subr.bf16.mxu1 %v5816_v14 }
 0xc6e   :  { %v6920_v19 = vpop.f32.mrb[24].mxu0 }
 0xc6f   :  { %v2849_v18 = vpop.f32.mrb[25].mxu0 }
 0xc70   :  { %v2859_v28 = vadd.f32 %v2849_v18, %v2731_v62  ;;  %v2997_v62 = vld [vmem:[#allocation11 + $0xf0] sm:$0xff]  ;;  %v2998_v18 = vld [vmem:[#allocation11 + $0xf8] sm:$0xff] }
 0xc72   :  { %v3702_v59 = vmul.f32 -1.442695, %v2859_v28  ;;  %v6954_v28 = vpack.c.bf16 %v2998_v18, %v2997_v62 }
 0xc74   :  { %5578 = vpow2.f32 %v3702_v59 }
 0xc7e   :  { %v5579_v22 = vpop.eup %5578 }
 0xc7f   :  { %v2863_v23 = vadd.f32 1.0, %v5579_v22 }
 0xc81   :  { %5580 = vrcp.f32 %v2863_v23  ;;  %v2732_v23 = vld [vmem:[#allocation3 + $0xa0] sm:$0xff] }
 0xc8b   :  { %v5581_v4 = vpop.eup %5580 }
 0xc8c   :  { %v2866_v6 = vmul.f32 %v5581_v4, %v6817_v12  ;;  %v2948_v4 = vld [vmem:[#allocation6 + $0x18] sm:$0xff] }
 0xc8e   :  { %4438 = vmatmul.mubr.f32.vlgmr.msra.gmra.mrb[24].mxu1 %v2866_v6  ;;  %v6925_v13 = vpop.f32.mrb[26].mxu0 }
 0xc8f   :  { %v3067_v3 = vpop.f32.mrb[27].mxu0  ;;  %5307 = vmatpush3.bf16.msra.mxu1 %v6922_v57  ;;  %4472 = vmatprep.mubr.msk.f32.mxu1 %vm5817_vm0, %v5815_v0 }
 0xc90   :  { %v3077_v45 = vadd.f32 %v3067_v3, %v2949_v16  ;;  %5308 = vmatprep.subr.bf16.mxu1 %v5816_v14 }
 0xc92   :  { %v3705_v55 = vmul.f32 -1.442695, %v3077_v45 }
 0xc93   :  { %5310 = vmatpush3.bf16.msra.mxu1 %v6928_v29 }
 0xc94   :  { %5582 = vpow2.f32 %v3705_v55  ;;  %5311 = vmatprep.subr.bf16.mxu1 %v5816_v14 }
 0xc97   :  { %5313 = vmatpush3.bf16.msra.mxu1 %v6934_v9 }
 0xc98   :  { %5314 = vmatprep.subr.bf16.mxu1 %v5816_v14 }
 0xc9b   :  { %5316 = vmatpush3.bf16.msra.mxu1 %v6938_v58 }
 0xc9c   :  { %5317 = vmatprep.subr.bf16.mxu1 %v5816_v14 }
 0xc9e   :  { %v5583_v25 = vpop.eup %5582 }
 0xc9f   :  { %v3081_v26 = vadd.f32 1.0, %v5583_v25  ;;  %5319 = vmatpush3.bf16.msra.mxu1 %v6942_v2 }
 0xca0   :  { %5320 = vmatprep.subr.bf16.mxu1 %v5816_v14 }
 0xca1   :  { %5584 = vrcp.f32 %v3081_v26 }
 0xca3   :  { %5322 = vmatpush3.bf16.msra.mxu1 %v6946_v41 }
 0xca4   :  { %5323 = vmatprep.subr.bf16.mxu1 %v5816_v14 }
 0xca7   :  { %5325 = vmatpush3.bf16.msra.mxu1 %v6950_v54 }
 0xca8   :  { %5326 = vmatprep.subr.bf16.mxu1 %v5816_v14 }
 0xcab   :  { %v5585_v59 = vpop.eup %5584  ;;  %5328 = vmatpush3.bf16.msra.mxu1 %v6954_v28 }
 0xcac   :  { %v3084_v22 = vmul.f32 %v5585_v59, %v6866_v46  ;;  %5361 = vmatprep.subr.bf16.mxu1 %v5816_v14 }
 0xcae   :  { %4473 = vmatmul.mubr.f32.vlgmr.msra.gmra.mrb[26].mxu1 %v3084_v22 }
 0xcaf   :  { %5363 = vmatpush3.bf16.msra.mxu1 %v6888_v53  ;;  %4507 = vmatprep.mubr.msk.f32.mxu1 %vm5817_vm0, %v5815_v0  ;;  %v2730_v53 = vld [vmem:[#allocation3 + $0x90] sm:$0xff] }
 0xcb0   :  { %5364 = vmatprep.subr.bf16.mxu1 %v5816_v14 }
 0xcb3   :  { %5366 = vmatpush3.bf16.msra.mxu1 %v6892_v50  ;;  %v2852_v50 = vadd.f32 %v6920_v19, %v2730_v53 }
 0xcb4   :  { %5367 = vmatprep.subr.bf16.mxu1 %v5816_v14 }
 0xcb7   :  { %5369 = vmatpush3.bf16.msra.mxu1 %v6896_v43  ;;  %v3701_v43 = vmul.f32 -1.442695, %v2852_v50 }
 0xcb8   :  { %5370 = vmatprep.subr.bf16.mxu1 %v5816_v14 }
 0xcb9   :  { %5586 = vpow2.f32 %v3701_v43 }
 0xcbb   :  { %5372 = vmatpush3.bf16.msra.mxu1 %v6900_v7 }
 0xcbc   :  { %5373 = vmatprep.subr.bf16.mxu1 %v5816_v14 }
 0xcbf   :  { %5375 = vmatpush3.bf16.msra.mxu1 %v6904_v48 }
 0xcc0   :  { %5376 = vmatprep.subr.bf16.mxu1 %v5816_v14 }
 0xcc3   :  { %5378 = vmatpush3.bf16.msra.mxu1 %v6908_v38  ;;  %v5587_v7 = vpop.eup %5586 }
 0xcc4   :  { %5379 = vmatprep.subr.bf16.mxu1 %v5816_v14  ;;  %v2856_v48 = vadd.f32 1.0, %v5587_v7 }
 0xcc6   :  { %5588 = vrcp.f32 %v2856_v48 }
 0xcc7   :  { %5381 = vmatpush3.bf16.msra.mxu1 %v6911_v17  ;;  %v3070_v17 = vadd.f32 %v6925_v13, %v2948_v4 }
 0xcc8   :  { %5382 = vmatprep.subr.bf16.mxu1 %v5816_v14 }
 0xccb   :  { %5384 = vmatpush3.bf16.msra.mxu1 %v6915_v32  ;;  %v3704_v32 = vmul.f32 -1.442695, %v3070_v17 }
 0xccc   :  { %5417 = vmatprep.subr.bf16.mxu1 %v5816_v14 }
 0xcd0   :  { %v5589_v6 = vpop.eup %5588 }
 0xcd1   :  { %v2940_v44 = vsub.f32 1.0, %v5589_v6  ;;  %v2939_v19 = vmul.f32 %v5589_v6, %v6817_v12 }
 0xd61   :  { %v2933_v38 = vpop.f32.mrb[24].mxu1 }
 0xd62   :  { %v2937_v60 = vadd.f32 %v2933_v38, %v2732_v23  ;;  %v4439_v49 = vpop.f32.mrb[25].mxu1 }
 0xd64   :  { %5590 = vtanh.f32 %v2937_v60 }
 0xd65   :  { %5592 = vpow2.f32 %v3704_v32 }
 0xd6e   :  { %v5591_v56 = vpop.eup %5590 }
 0xd6f   :  { %v2941_v16 = vmul.f32 %v5591_v56, %v2940_v44  ;;  %v5593_v13 = vpop.eup %5592 }
 0xd70   :  { %v3074_v12 = vadd.f32 1.0, %v5593_v13 }
 0xd71   :  { %v2942_v3 = vadd.f32 %v2941_v16, %v2939_v19 }
 0xd72   :  { %5594 = vrcp.f32 %v3074_v12 }
 0xd73   :  { %v6981_v45 = vclamps-f32 %v2942_v3, 0.5 }
 0xd75   :  { %2946 = vst [vmem:[#allocation12 + $0x30] sm:$0xff] %v6981_v45  ;;  %3282 = vmatmul.mubr.f32.vlgmr.msra.gmra.mrb[28].mxu0 %v6981_v45 }
 0xd76   :  { %5388 = vmatpush1.bf16.msra.mxu0 %v6815_v35  ;;  %3498 = vmatprep.mubr.f32.mxu0 %v5815_v0 }
 0xd77   :  { %5390 = vmatprep.subr.bf16.mxu0 %v6819_v51 }
 0xd7a   :  { %5392 = vmatpush1.bf16.msra.mxu0 %v6824_v20 }
 0xd7b   :  { %5394 = vmatprep.subr.bf16.mxu0 %v6828_v5 }
 0xd7c   :  { %v5595_v35 = vpop.eup %5594 }
 0xd7d   :  { %v3158_v51 = vsub.f32 1.0, %v5595_v35  ;;  %v3157_v5 = vmul.f32 %v5595_v35, %v6866_v46 }
 0xd7e   :  { %5396 = vmatpush1.bf16.msra.mxu0 %v6831_v34 }
 0xd7f   :  { %5398 = vmatprep.subr.bf16.mxu0 %v6834_v37 }
 0xd81   :  { %v3151_v1 = vpop.f32.mrb[26].mxu1 }
 0xd82   :  { %v3155_v55 = vadd.f32 %v3151_v1, %v2950_v8  ;;  %v4474_v63 = vpop.f32.mrb[27].mxu1  ;;  %5400 = vmatpush1.bf16.msra.mxu0 %v6837_v36 }
 0xd83   :  { %5402 = vmatprep.subr.bf16.mxu0 %v6840_v30  ;;  %v3167_v30 = vld [vmem:[#allocation3 + $0xb0] sm:$0xff] }
 0xd84   :  { %5596 = vtanh.f32 %v3155_v55 }
 0xd86   :  { %5404 = vmatpush1.bf16.msra.mxu0 %v6843_v10 }
 0xd87   :  { %5406 = vmatprep.subr.bf16.mxu0 %v6846_v39 }
 0xd8a   :  { %5408 = vmatpush1.bf16.msra.mxu0 %v6849_v52 }
 0xd8b   :  { %5410 = vmatprep.subr.bf16.mxu0 %v6852_v47 }
 0xd8e   :  { %v5597_v20 = vpop.eup %5596  ;;  %5412 = vmatpush1.bf16.msra.mxu0 %v6855_v31 }
 0xd8f   :  { %5414 = vmatprep.subr.bf16.mxu0 %v6858_v61  ;;  %v3159_v34 = vmul.f32 %v5597_v20, %v3158_v51 }
 0xd91   :  { %v3160_v37 = vadd.f32 %v3159_v34, %v3157_v5 }
 0xd92   :  { %5416 = vmatpush1.bf16.msra.mxu0 %v6861_v27 }
 0xd93   :  { %v7002_v36 = vclamps-f32 %v3160_v37, 0.5 }
 0xd95   :  { %3164 = vst [vmem:[#allocation13 + $0x8] sm:$0xff] %v7002_v36  ;;  %3499 = vmatmul.mubr.f32.vlgmr.msra.gmra.mrb[30].mxu0 %v7002_v36 }
 0xe48   :  { %v3283_v10 = vpop.f32.mrb[28].mxu0 }
 0xe49   :  { %v3285_v39 = vpop.f32.mrb[29].mxu0 }
 0xe4a   :  { %v3295_v52 = vadd.f32 %v3285_v39, %v3167_v30 }
 0xe4c   :  { %v3708_v47 = vmul.f32 -1.442695, %v3295_v52 }
 0xe4e   :  { %5598 = vpow2.f32 %v3708_v47 }
 0xe58   :  { %v5599_v31 = vpop.eup %5598 }
 0xe59   :  { %v3299_v61 = vadd.f32 1.0, %v5599_v31 }
 0xe5b   :  { %5600 = vrcp.f32 %v3299_v61 }
 0xe65   :  { %v5601_v46 = vpop.eup %5600 }
 0xe66   :  { %v3302_v42 = vmul.f32 %v5601_v46, %v6981_v45 }
 0xe68   :  { %4508 = vmatmul.mubr.f32.vlgmr.msra.gmra.mrb[28].mxu1 %v3302_v42  ;;  %v3500_v27 = vpop.f32.mrb[30].mxu0 }
 0xe69   :  { %v3502_v40 = vpop.f32.mrb[31].mxu0  ;;  %5419 = vmatpush3.bf16.msra.mxu1 %v6922_v57  ;;  %4542 = vmatprep.mubr.msk.f32.mxu1 %vm5817_vm0, %v5815_v0 }
 0xe6a   :  { %v3512_v21 = vadd.f32 %v3502_v40, %v3384_v24  ;;  %5420 = vmatprep.subr.bf16.mxu1 %v5816_v14 }
 0xe6c   :  { %v3711_v15 = vmul.f32 -1.442695, %v3512_v21 }
 0xe6d   :  { %5422 = vmatpush3.bf16.msra.mxu1 %v6928_v29 }
 0xe6e   :  { %5602 = vpow2.f32 %v3711_v15  ;;  %5423 = vmatprep.subr.bf16.mxu1 %v5816_v14 }
 0xe71   :  { %5425 = vmatpush3.bf16.msra.mxu1 %v6934_v9  ;;  %v3166_v9 = vld [vmem:[#allocation3 + $0xa8] sm:$0xff] }
 0xe72   :  { %5426 = vmatprep.subr.bf16.mxu1 %v5816_v14 }
 0xe75   :  { %5428 = vmatpush3.bf16.msra.mxu1 %v6938_v58  ;;  %v3288_v58 = vadd.f32 %v3283_v10, %v3166_v9 }
 0xe76   :  { %5429 = vmatprep.subr.bf16.mxu1 %v5816_v14 }
 0xe78   :  { %v5603_v57 = vpop.eup %5602 }
 0xe79   :  { %v3516_v25 = vadd.f32 1.0, %v5603_v57  ;;  %5431 = vmatpush3.bf16.msra.mxu1 %v6942_v2  ;;  %v3707_v2 = vmul.f32 -1.442695, %v3288_v58 }
 0xe7a   :  { %5432 = vmatprep.subr.bf16.mxu1 %v5816_v14 }
 0xe7b   :  { %5604 = vrcp.f32 %v3516_v25 }
 0xe7c   :  { %5606 = vpow2.f32 %v3707_v2 }
 0xe7d   :  { %5434 = vmatpush3.bf16.msra.mxu1 %v6946_v41 }
 0xe7e   :  { %5435 = vmatprep.subr.bf16.mxu1 %v5816_v14 }
 0xe81   :  { %5437 = vmatpush3.bf16.msra.mxu1 %v6950_v54  ;;  %v3383_v54 = vld [vmem:[#allocation6] sm:$0xff] }
 0xe82   :  { %5438 = vmatprep.subr.bf16.mxu1 %v5816_v14  ;;  %v3505_v14 = vadd.f32 %v3500_v27, %v3383_v54 }
 0xe84   :  { %v3710_v22 = vmul.f32 -1.442695, %v3505_v14 }
 0xe85   :  { %v5605_v0 = vpop.eup %5604  ;;  %5440 = vmatpush3.bf16.msra.mxu1 %v6954_v28 }
 0xe86   :  { %v3519_v29 = vmul.f32 %v5605_v0, %v7002_v36  ;;  %v5607_v26 = vpop.eup %5606 }
 0xe87   :  { %v3292_v33 = vadd.f32 1.0, %v5607_v26 }
 0xe88   :  { %4543 = vmatmul.mubr.f32.vlgmr.msra.gmra.mrb[30].mxu1 %v3519_v29 }
 0xe89   :  { %5608 = vrcp.f32 %v3292_v33 }
 0xe93   :  { %v5609_v59 = vpop.eup %5608 }
 0xe94   :  { %v3376_v28 = vsub.f32 1.0, %v5609_v59  ;;  %v3375_v50 = vmul.f32 %v5609_v59, %v6981_v45 }
 0xf3b   :  { %v3369_v41 = vpop.f32.mrb[28].mxu1 }
 0xf3c   :  { %v3373_v62 = vadd.f32 %v3369_v41, %v3168_v11  ;;  %v4509_v18 = vpop.f32.mrb[29].mxu1 }
 0xf3e   :  { %5610 = vtanh.f32 %v3373_v62 }
 0xf3f   :  { %5612 = vpow2.f32 %v3710_v22 }
 0xf48   :  { %v5611_v53 = vpop.eup %5610 }
 0xf49   :  { %v3377_v43 = vmul.f32 %v5611_v53, %v3376_v28 }
 0xf4b   :  { %v3378_v7 = vadd.f32 %v3377_v43, %v3375_v50 }
 0xf4d   :  { %v3709_v48 = vclamps-f32 %v3378_v7, 0.5 }
 0xf4f   :  { %3382 = vst [vmem:[#allocation12 + $0x38] sm:$0xff] %v3709_v48  ;;  %3604 = vst [vmem:[#allocation15] sm:$0xff] %v3709_v48 }
 0xf50   :  { %5739 = shalt.err (!%p5736_p2)
}
 0xf51   :  { %s5740_s21 = scalar_lea.hbm %s7084_s5, 1024 }
 0xf52   :  { %p5741_p3 = scmp.ne.s32.totalorder %s7084_s5, %s5740_s21  ;;  %p5744_p4 = scmp.lt.u32.totalorder %s5740_s21, %s7084_s5 }
 0xf54   :  { %p5746_p5 = pnand %p5744_p4, %p5741_p3 }
 0xf56   :  { %5749 = shalt.err (!%p5746_p5)
}
 0xf57   :  { %3618 = dma.vmem_to_hbm [thread:$0]  %s3613_s3, 1024, %s7084_s5, [#allocation5], %s5812_s0, %s5812_s0, %s5813_s13   ;;  %v5613_v23 = vpop.eup %5612  ;;  %v3385_v60 = vld [vmem:[#allocation6 + $0x10] sm:$0xff] }
 0xf58   :  { %v3509_v38 = vadd.f32 1.0, %v5613_v23  ;;  %s5819_s14 = smov [#allocation13]   ;;  %s5820_s29 = smov [#allocation15]  }
 0xf59   :  { %s3628_s28 = sshll.u32 %s5819_s14, 4  ;;  %s3640_s30 = sshll.u32 %s5820_s29, 4  ;;  %s3629_s28 = int_to_ptr.vmem [resolvable:$true] %s3628_s28  ;;  %s7042_s30 = int_to_ptr.vmem [resolvable:$true] %s3640_s30 }
 0xf5a   :  { %5614 = vrcp.f32 %v3509_v38  ;;  %s5750_s5 = scalar_lea.vmem %s3629_s28, 1024  ;;  %p5755_p7 = scmp.lt.s32.totalorder %s3629_s28, %s3629_s28 }
 0xf5b   :  { %v3586_v49 = vpop.f32.mrb[30].mxu1  ;;  %p5751_p6 = scmp.ne.s32.totalorder %s3629_s28, %s5750_s5  ;;  %p5756_p8 = scmp.lt.s32.totalorder %s5750_s5, %s5750_s5 }
 0xf5c   :  { %v3590_v4 = vadd.f32 %v3586_v49, %v3385_v60  ;;  %v4544_v17 = vpop.f32.mrb[31].mxu1 }
 0xf5d   :  { %p5757_p9 = por %p5756_p8, %p5755_p7 }
 0xf5e   :  { %5616 = vtanh.f32 %v3590_v4 }
 0xf5f   :  { %p5758_p10 = pnand %p5757_p9, %p5751_p6 }
 0xf64   :  { %v5615_v6 = vpop.eup %5614 }
 0xf65   :  { %v3593_v32 = vsub.f32 1.0, %v5615_v6  ;;  %v3592_v56 = vmul.f32 %v5615_v6, %v7002_v36 }
 0xf68   :  { %v5617_v44 = vpop.eup %5616 }
 0xf69   :  { %v3594_v19 = vmul.f32 %v5617_v44, %v3593_v32 }
 0xf6b   :  { %v3595_v16 = vadd.f32 %v3594_v19, %v3592_v56 }
 0xf6d   :  { %v3712_v3 = vclamps-f32 %v3595_v16, 0.5 }
 0xf6f   :  { %3598 = vst [vmem:[#allocation13] sm:$0xff] %v3712_v3  ;;  %3606 = vst [vmem:[#allocation15 + $0x8] sm:$0xff] %v3712_v3 }
 0xf70   :  { %5761 = shalt.err (!%p5758_p10)
}
 0xf71   :  { %s5762_s11 = scalar_lea.hbm %s7085_s6, 1024 }
 0xf72   :  { %p5763_p11 = scmp.ne.s32.totalorder %s7085_s6, %s5762_s11  ;;  %p5766_p12 = scmp.lt.u32.totalorder %s5762_s11, %s7085_s6 }
 0xf74   :  { %p5768_p13 = pnand %p5766_p12, %p5763_p11 }
 0xf76   :  { %5771 = shalt.err (!%p5768_p13)
}
 0xf77   :  { %3634 = dma.vmem_to_hbm [thread:$0]  %s3629_s28, 1024, %s7085_s6, [#allocation14], %s5812_s0, %s5812_s0, %s5813_s13  }
 0xf78   :  { %s5772_s9 = scalar_lea.vmem %s7042_s30, 256  ;;  %p5777_p1 = scmp.lt.s32.totalorder %s7042_s30, %s7042_s30 }
 0xf79   :  { %p5773_p0 = scmp.ne.s32.totalorder %s7042_s30, %s5772_s9  ;;  %p5778_p2 = scmp.lt.s32.totalorder %s5772_s9, %s5772_s9 }
 0xf7b   :  { %p5779_p3 = por %p5778_p2, %p5777_p1 }
 0xf7d   :  { %p5780_p4 = pnand %p5779_p3, %p5773_p0 }
 0xf7f   :  { %5783 = shalt.err (!%p5780_p4)
}
 0xf80   :  { %s5784_s27 = scalar_lea.hbm %s7086_s7, 256 }
 0xf81   :  { %p5785_p5 = scmp.ne.s32.totalorder %s7086_s7, %s5784_s27  ;;  %p5788_p6 = scmp.lt.u32.totalorder %s5784_s27, %s7086_s7 }
 0xf83   :  { %p5790_p7 = pnand %p5788_p6, %p5785_p5 }
 0xf85   :  { %5793 = shalt.err (!%p5790_p7)
}
 0xf86   :  { %3646 = dma.vmem_to_hbm [thread:$0]  %s7042_s30, 256, %s7086_s7, [#allocation14], %s5812_s0, %s5812_s0, %s5813_s13  }
 0xf87   :  { %5800 = dma.done.wait [#allocation5], 1024  }
 0xf88   :  { %5801 = vsyncadd [#allocation5], 4294966272 }
 0xf89   :  { %5802 = dma.done.wait [#allocation14], 1280  }
 0xf8a   :  { %5803 = vsyncadd [#allocation14], 4294966016 }
 0xf8b   :  { %3656 = vsyncpa [#allocation4], 1 }
 0xf8c   :  { %3657 = vsyncpa [#allocation7], 1 }
 0xf8d   :  { %3658 = vsyncpa [#allocation10], 1 }
 0xf8e   :  { %3659 = vsyncpa [#allocation5], 1 }
 0xf8f   :  { %3660 = vsyncpa [#allocation14], 1 }

</bundles_post_ra>
